<compile_context>
chip_gen: v7x
topology: tpu7x:2x2x1
jax: 0.10.0
libtpu: 0.0.40
codegen_flags: <defaults>
</compile_context>

<pallas_src>
import jax
import jax.numpy as jnp
from jax.experimental import pallas as pl
from jax.experimental.pallas import tpu as pltpu


# ----------------------------- reverse_seq (glue) -----------------------------
def reverse_seq_jax(X, mask):
    """X: (seq, batch, dim); mask: (batch, seq) -> (seq, batch, dim).

    Per batch b with length c_b = sum(mask[b]):
       out[t, b] = X[c_b - 1 - t, b]  for t <  c_b
       out[t, b] = 0                  for t >= c_b
    (matches torch reverse_seq when max(c_b) == seq)
    """
    seq = X.shape[0]
    lengths = jnp.sum(mask, axis=1).astype(jnp.int32)            # (batch,)
    t_idx = jnp.arange(seq, dtype=jnp.int32)[:, None]            # (seq, 1)
    src = lengths[None, :] - 1 - t_idx                           # (seq, batch)
    valid = t_idx < lengths[None, :]                             # (seq, batch)
    src = jnp.clip(src, 0, seq - 1)
    idx = jnp.broadcast_to(src[:, :, None], X.shape)
    gathered = jnp.take_along_axis(X, idx, axis=0)
    return jnp.where(valid[:, :, None], gathered, 0.0)


# --------------------------- hoisted input projection --------------------------
def _input_projection(x, wih, b):
    """x: (seq, B, D), wih: (D, 4D), b: (4D,) -> (seq, B, 4D) f32.

    One big single-pass bf16 MXU matmul with f32 accumulation (the 2e-3..1e-2
    tolerance of this op absorbs the bf16 rounding).
    """
    seq, B, D = x.shape
    g = jnp.dot(x.reshape(seq * B, D).astype(jnp.bfloat16),
                wih.astype(jnp.bfloat16),
                preferred_element_type=jnp.float32)
    return (g + b).reshape(seq, B, 4 * D)


# ------------------------------- Pallas kernel --------------------------------
def _lstm_gates(gates, c):
    """Apply LSTMCell nonlinearities given pre-activations gates (B, 4D).

    Gate order [i, f, g, o] (PyTorch nn.LSTMCell convention). c stays f32.
    """
    D = c.shape[-1]
    sif = jax.nn.sigmoid(gates[:, :2 * D])        # i|f in one wide EUP launch
    g = jnp.tanh(gates[:, 2 * D:3 * D])
    o = jax.nn.sigmoid(gates[:, 3 * D:])
    c_new = sif[:, D:] * c + sif[:, :D] * g
    h_new = o * jnp.tanh(c_new)
    return h_new, c_new


def lstmhidden_kernel(gxf_ref, gxb_ref, w1_ref, w2_ref,
                      front_out_ref, back_out_ref,
                      h1_ref, c1_ref, s1_ref,
                      h2_ref, c2_ref, s2_ref):
    T = front_out_ref.shape[0]

    @pl.when(pl.program_id(0) == 0)
    def _():
        # zero-init persistent state on the first (sequential) grid step
        for r in (h1_ref, c1_ref, s1_ref, h2_ref, c2_ref, s2_ref):
            r[...] = jnp.zeros_like(r)

    # TODO(synk): on v7x the two independent directions could be mapped onto
    # the two TensorCores (pl.core_map / core-parallel leading grid axis with
    # per-core weight residency + per-core init); kept single-core-per-chip
    # here for portability across v5e/v6e/v7x.

    # Unrolled T-step chunk (static trip count; small T keeps vreg pressure low).
    for t in range(T):
        # Output appended at step t is the cumulative hidden sum over steps < t.
        # Read running sums once per step into locals (single vld each).
        s1 = s1_ref[...]
        s2 = s2_ref[...]
        front_out_ref[t] = s1
        back_out_ref[t] = s2

        # Issue both directions' h @ W_hh MXU pushes back-to-back so the second
        # matmul's latency is hidden under the first direction's VPU/EUP work
        # (the recurrence is latency-bound: B rows << MXU rows).
        g1 = gxf_ref[t] + jnp.dot(h1_ref[...].astype(jnp.bfloat16), w1_ref[...],
                                  preferred_element_type=jnp.float32)
        g2 = gxb_ref[t] + jnp.dot(h2_ref[...].astype(jnp.bfloat16), w2_ref[...],
                                  preferred_element_type=jnp.float32)

        h1, c1 = _lstm_gates(g1, c1_ref[...])
        h2, c2 = _lstm_gates(g2, c2_ref[...])

        h1_ref[...] = h1
        c1_ref[...] = c1
        s1_ref[...] = s1 + h1
        h2_ref[...] = h2
        c2_ref[...] = c2
        s2_ref[...] = s2 + h2


def _vmem_limit_bytes(T, B, D):
    """Explicit VMEM budget: resident bf16 weights (double-buffered by the
    pipeline, constant block index so never re-fetched) + double-buffered f32
    gx/out blocks + 6 state buffers, with headroom. Capped at 64 MiB so the
    same number is valid on v7x (64 MiB/TC) as well as v5e/v6e (128 MiB)."""
    w = 2 * 2 * D * (4 * D) * 2           # 2 dirs x 2 bufs x (D, 4D) bf16
    gx = 2 * 2 * T * B * (4 * D) * 4      # 2 dirs x 2 bufs x (T, B, 4D) f32
    out = 2 * 2 * T * B * D * 4           # 2 dirs x 2 bufs x (T, B, D) f32
    state = 6 * B * D * 4                 # h/c/sum x 2 dirs, f32
    budget = int((w + gx + out + state) * 1.5) + (4 << 20)
    return max(32 << 20, min(budget, 64 << 20))


def lstmhidden_pallas(emotions_feat, umask, params, *, time_chunk=8):
    """emotions_feat: (seq, batch, dim) f32; umask: (batch, seq) f32."""
    seq, B, D = emotions_feat.shape
    wih1, whh1, b1, wih2, whh2, b2 = params

    # Hoisted, MXU-friendly input projections (M = seq*B rows instead of M = B).
    x_bwd = reverse_seq_jax(emotions_feat, umask)
    gx_fwd = _input_projection(emotions_feat, wih1, b1)
    gx_bwd = _input_projection(x_bwd, wih2, b2)

    T = min(int(time_chunk), seq)
    n_chunks = pl.cdiv(seq, T)
    seq_pad = n_chunks * T
    if seq_pad != seq:
        # extra padded steps only write discarded output rows (out[t] depends
        # only on steps < t), so valid outputs are unaffected
        pad = ((0, seq_pad - seq), (0, 0), (0, 0))
        gx_fwd = jnp.pad(gx_fwd, pad)
        gx_bwd = jnp.pad(gx_bwd, pad)

    # Recurrent weights held resident in bf16: half the VMEM / load DMA and a
    # guaranteed single MXU pass per step. Constant block index -> fetched in
    # the pipeline prologue (overlapping the first gx DMA) and never re-fetched.
    whh1_bf16 = whh1.astype(jnp.bfloat16)
    whh2_bf16 = whh2.astype(jnp.bfloat16)

    gx_spec = pl.BlockSpec((T, B, 4 * D), lambda i: (i, 0, 0))
    w_spec = pl.BlockSpec((D, 4 * D), lambda i: (0, 0))
    out_spec = pl.BlockSpec((T, B, D), lambda i: (i, 0, 0))

    front_sum, back_sum = pl.pallas_call(
        lstmhidden_kernel,
        out_shape=(jax.ShapeDtypeStruct((seq_pad, B, D), jnp.float32),
                   jax.ShapeDtypeStruct((seq_pad, B, D), jnp.float32)),
        grid_spec=pltpu.PrefetchScalarGridSpec(
            num_scalar_prefetch=0,
            grid=(n_chunks,),
            in_specs=[gx_spec, gx_spec, w_spec, w_spec],
            out_specs=[out_spec, out_spec],
            scratch_shapes=[pltpu.VMEM((B, D), jnp.float32)] * 6,  # h/c/sum x 2
        ),
        compiler_params=pltpu.CompilerParams(
            dimension_semantics=("arbitrary",),   # recurrence: sequential grid
            vmem_limit_bytes=_vmem_limit_bytes(T, B, D)),
    )(gx_fwd, gx_bwd, whh1_bf16, whh2_bf16)

    front_sum = front_sum[:seq]
    back_sum = back_sum[:seq]
    # back_sum_hidden = reverse_seq(back_sum_hidden, umask); XLA fuses this
    # gather with the final add (single pass over the (seq, B, D) output).
    return front_sum + reverse_seq_jax(back_sum, umask)


# ------------------------------ pure-JAX reference -----------------------------
def _lstm_cell_ref(x, h, c, wih, whh, b):
    D = h.shape[-1]
    gates = (jnp.dot(x, wih, precision=jax.lax.Precision.HIGHEST)
             + jnp.dot(h, whh, precision=jax.lax.Precision.HIGHEST) + b)
    i = jax.nn.sigmoid(gates[:, 0 * D:1 * D])
    f = jax.nn.sigmoid(gates[:, 1 * D:2 * D])
    g = jnp.tanh(gates[:, 2 * D:3 * D])
    o = jax.nn.sigmoid(gates[:, 3 * D:4 * D])
    c_new = f * c + i * g
    return o * jnp.tanh(c_new), c_new


def lstmhidden_ref(emotions_feat, umask, params):
    seq, B, D = emotions_feat.shape
    wih1, whh1, b1, wih2, whh2, b2 = params
    x_bwd = reverse_seq_jax(emotions_feat, umask)

    h1 = c1 = h2 = c2 = jnp.zeros((B, D), jnp.float32)
    s1 = s2 = jnp.zeros((B, D), jnp.float32)
    front_list, back_list = [], []
    for t in range(seq):
        front_list.append(s1)
        back_list.append(s2)
        h1, c1 = _lstm_cell_ref(emotions_feat[t], h1, c1, wih1, whh1, b1)
        s1 = s1 + h1
        h2, c2 = _lstm_cell_ref(x_bwd[t], h2, c2, wih2, whh2, b2)
        s2 = s2 + h2
    front = jnp.stack(front_list, 0)
    back = reverse_seq_jax(jnp.stack(back_list, 0), umask)
    return front + back


# ----------------------------------- main --------------------------------------
if __name__ == "__main__":
    # Module dims are 300/900 (depending on args); use a small TPU-tile-aligned dim.
    SEQ, B, D = 8, 8, 128

    key = jax.random.PRNGKey(0)
    ks = jax.random.split(key, 10)
    bound = 1.0 / jnp.sqrt(D)

    def u(k, shape):
        return jax.random.uniform(k, shape, jnp.float32, -bound, bound)

    # PyTorch LSTMCell params: W_ih (4D, D), W_hh (4D, D), b_ih (4D,), b_hh (4D,)
    W_ih1, W_hh1 = u(ks[0], (4 * D, D)), u(ks[1], (4 * D, D))
    b_ih1, b_hh1 = u(ks[2], (4 * D,)), u(ks[3], (4 * D,))
    W_ih2, W_hh2 = u(ks[4], (4 * D, D)), u(ks[5], (4 * D, D))
    b_ih2, b_hh2 = u(ks[6], (4 * D,)), u(ks[7], (4 * D,))

    # Pre-transpose for the kernel: gates = x @ W_ih.T + h @ W_hh.T + (b_ih + b_hh)
    params = (W_ih1.T, W_hh1.T, b_ih1 + b_hh1,
              W_ih2.T, W_hh2.T, b_ih2 + b_hh2)

    emotions_feat = jax.random.normal(ks[8], (SEQ, B, D), jnp.float32)
    # variable lengths, at least one batch element at full length
    lengths = jnp.array([8, 8, 5, 7, 4, 8, 6, 3], dtype=jnp.int32)
    umask = (jnp.arange(SEQ)[None, :] < lengths[:, None]).astype(jnp.float32)

    out = jax.jit(lstmhidden_pallas)(emotions_feat, umask, params)
    out = jax.block_until_ready(out)

    ref = lstmhidden_ref(emotions_feat, umask, params)
    assert out.shape == (SEQ, B, D)
    err = float(jnp.max(jnp.abs(out - ref)))
    # bf16 MXU passes (projection + recurrent weights) vs HIGHEST reference:
    # tolerance widened accordingly.
    assert jnp.allclose(out, ref, atol=1e-2, rtol=1e-2), err

    print("KERNEL_OK")
</pallas_src>

<mosaic_0001>
module attributes {stable_mosaic.version = 11 : i64} {
  func.func private @main(%arg0: i32) attributes {dimension_semantics = [#tpu.dimension_semantics<core_parallel>], iteration_bounds = array<i64: 2>, tpu.core_type = #tpu.core_type<sc_scalar_subcore>, window_params = []} {
    return
  }
}

module attributes {stable_mosaic.version = 11 : i64} {
  func.func private @main(%arg0: i32) attributes {dimension_semantics = [#tpu.dimension_semantics<core_parallel>], iteration_bounds = array<i64: 2>, tpu.core_type = #tpu.core_type<sc_scalar_subcore>, window_params = []} {
    return
  }
}

module attributes {stable_mosaic.version = 11 : i64} {
  func.func @lstmhidden_kernel(%arg0: i32, %arg1: memref<8x8x512xf32, #tpu.memory_space<vmem>>, %arg2: memref<8x8x512xf32, #tpu.memory_space<vmem>>, %arg3: memref<128x512xbf16, #tpu.memory_space<vmem>>, %arg4: memref<128x512xbf16, #tpu.memory_space<vmem>>, %arg5: memref<8x8x128xf32, #tpu.memory_space<vmem>>, %arg6: memref<8x8x128xf32, #tpu.memory_space<vmem>>, %arg7: memref<8x128xf32, #tpu.memory_space<vmem>>, %arg8: memref<8x128xf32, #tpu.memory_space<vmem>>, %arg9: memref<8x128xf32, #tpu.memory_space<vmem>>, %arg10: memref<8x128xf32, #tpu.memory_space<vmem>>, %arg11: memref<8x128xf32, #tpu.memory_space<vmem>>, %arg12: memref<8x128xf32, #tpu.memory_space<vmem>>) attributes {dimension_semantics = [#tpu.dimension_semantics<arbitrary>], iteration_bounds = array<i64: 1>, scalar_prefetch = 0 : i64, scratch_operands = 6 : i64, tpu.core_type = #tpu.core_type<tc>, window_params = [{transform_indices = @transform_0, window_bounds = array<i64: 8, 8, 512>}, {transform_indices = @transform_1, window_bounds = array<i64: 8, 8, 512>}, {pipeline_mode = #tpu.pipeline_mode<synchronous>, transform_indices = @transform_2, window_bounds = array<i64: 128, 512>}, {pipeline_mode = #tpu.pipeline_mode<synchronous>, transform_indices = @transform_3, window_bounds = array<i64: 128, 512>}, {transform_indices = @transform_4, window_bounds = array<i64: 8, 8, 128>}, {transform_indices = @transform_5, window_bounds = array<i64: 8, 8, 128>}]} {
    %c0_i32 = arith.constant 0 : i32
    %0 = arith.cmpi eq, %arg0, %c0_i32 : i32
    %1 = arith.extui %0 : i1 to i32
    %c0_i32_0 = arith.constant 0 : i32
    %2 = arith.cmpi ne, %1, %c0_i32_0 : i32
    scf.if %2 {
      %cst_360 = arith.constant 0.000000e+00 : f32
      %595 = vector.broadcast %cst_360 : f32 to vector<8x128xf32>
      %c0_361 = arith.constant 0 : index
      %c0_362 = arith.constant 0 : index
      %596 = vector.load %arg7[%c0_361, %c0_362] : memref<8x128xf32, #tpu.memory_space<vmem>>, vector<8x128xf32>
      tpu.vector_store %arg7[%c0_361, %c0_362], %595 {strides = array<i32>} : memref<8x128xf32, #tpu.memory_space<vmem>>, vector<8x128xf32>,
      %cst_363 = arith.constant 0.000000e+00 : f32
      %597 = vector.broadcast %cst_363 : f32 to vector<8x128xf32>
      %c0_364 = arith.constant 0 : index
      %c0_365 = arith.constant 0 : index
      %598 = vector.load %arg8[%c0_364, %c0_365] : memref<8x128xf32, #tpu.memory_space<vmem>>, vector<8x128xf32>
      tpu.vector_store %arg8[%c0_364, %c0_365], %597 {strides = array<i32>} : memref<8x128xf32, #tpu.memory_space<vmem>>, vector<8x128xf32>,
      %cst_366 = arith.constant 0.000000e+00 : f32
      %599 = vector.broadcast %cst_366 : f32 to vector<8x128xf32>
      %c0_367 = arith.constant 0 : index
      %c0_368 = arith.constant 0 : index
      %600 = vector.load %arg9[%c0_367, %c0_368] : memref<8x128xf32, #tpu.memory_space<vmem>>, vector<8x128xf32>
      tpu.vector_store %arg9[%c0_367, %c0_368], %599 {strides = array<i32>} : memref<8x128xf32, #tpu.memory_space<vmem>>, vector<8x128xf32>,
      %cst_369 = arith.constant 0.000000e+00 : f32
      %601 = vector.broadcast %cst_369 : f32 to vector<8x128xf32>
      %c0_370 = arith.constant 0 : index
      %c0_371 = arith.constant 0 : index
      %602 = vector.load %arg10[%c0_370, %c0_371] : memref<8x128xf32, #tpu.memory_space<vmem>>, vector<8x128xf32>
      tpu.vector_store %arg10[%c0_370, %c0_371], %601 {strides = array<i32>} : memref<8x128xf32, #tpu.memory_space<vmem>>, vector<8x128xf32>,
      %cst_372 = arith.constant 0.000000e+00 : f32
      %603 = vector.broadcast %cst_372 : f32 to vector<8x128xf32>
      %c0_373 = arith.constant 0 : index
      %c0_374 = arith.constant 0 : index
      %604 = vector.load %arg11[%c0_373, %c0_374] : memref<8x128xf32, #tpu.memory_space<vmem>>, vector<8x128xf32>
      tpu.vector_store %arg11[%c0_373, %c0_374], %603 {strides = array<i32>} : memref<8x128xf32, #tpu.memory_space<vmem>>, vector<8x128xf32>,
      %cst_375 = arith.constant 0.000000e+00 : f32
      %605 = vector.broadcast %cst_375 : f32 to vector<8x128xf32>
      %c0_376 = arith.constant 0 : index
      %c0_377 = arith.constant 0 : index
      %606 = vector.load %arg12[%c0_376, %c0_377] : memref<8x128xf32, #tpu.memory_space<vmem>>, vector<8x128xf32>
      tpu.vector_store %arg12[%c0_376, %c0_377], %605 {strides = array<i32>} : memref<8x128xf32, #tpu.memory_space<vmem>>, vector<8x128xf32>,
    } else {
    }
    %c0 = arith.constant 0 : index
    %c0_1 = arith.constant 0 : index
    %3 = vector.load %arg9[%c0, %c0_1] : memref<8x128xf32, #tpu.memory_space<vmem>>, vector<8x128xf32>
    %c0_2 = arith.constant 0 : index
    %c0_3 = arith.constant 0 : index
    %4 = vector.load %arg12[%c0_2, %c0_3] : memref<8x128xf32, #tpu.memory_space<vmem>>, vector<8x128xf32>
    %c0_4 = arith.constant 0 : index
    %c0_5 = arith.constant 0 : index
    %c0_6 = arith.constant 0 : index
    %5 = vector.load %arg5[%c0_4, %c0_5, %c0_6] : memref<8x8x128xf32, #tpu.memory_space<vmem>>, vector<1x8x128xf32>
    %6 = vector.shape_cast %5 : vector<1x8x128xf32> to vector<8x128xf32>
    %7 = vector.shape_cast %3 : vector<8x128xf32> to vector<1x8x128xf32>
    tpu.vector_store %arg5[%c0_4, %c0_5, %c0_6], %7 {strides = array<i32>} : memref<8x8x128xf32, #tpu.memory_space<vmem>>, vector<1x8x128xf32>,
    %c0_7 = arith.constant 0 : index
    %c0_8 = arith.constant 0 : index
    %c0_9 = arith.constant 0 : index
    %8 = vector.load %arg6[%c0_7, %c0_8, %c0_9] : memref<8x8x128xf32, #tpu.memory_space<vmem>>, vector<1x8x128xf32>
    %9 = vector.shape_cast %8 : vector<1x8x128xf32> to vector<8x128xf32>
    %10 = vector.shape_cast %4 : vector<8x128xf32> to vector<1x8x128xf32>
    tpu.vector_store %arg6[%c0_7, %c0_8, %c0_9], %10 {strides = array<i32>} : memref<8x8x128xf32, #tpu.memory_space<vmem>>, vector<1x8x128xf32>,
    %c0_10 = arith.constant 0 : index
    %c0_11 = arith.constant 0 : index
    %c0_12 = arith.constant 0 : index
    %11 = vector.load %arg1[%c0_10, %c0_11, %c0_12] : memref<8x8x512xf32, #tpu.memory_space<vmem>>, vector<1x8x512xf32>
    %12 = vector.shape_cast %11 : vector<1x8x512xf32> to vector<8x512xf32>
    %c0_13 = arith.constant 0 : index
    %c0_14 = arith.constant 0 : index
    %13 = vector.load %arg7[%c0_13, %c0_14] : memref<8x128xf32, #tpu.memory_space<vmem>>, vector<8x128xf32>
    %14 = arith.truncf %13 : vector<8x128xf32> to vector<8x128xbf16>
    %c0_15 = arith.constant 0 : index
    %c0_16 = arith.constant 0 : index
    %15 = vector.load %arg3[%c0_15, %c0_16] : memref<128x512xbf16, #tpu.memory_space<vmem>>, vector<128x512xbf16>
    %cst = arith.constant dense<0.000000e+00> : vector<8x512xf32>
    %16 = tpu.matmul %14, %15, %cst {dimension_numbers = #tpu.dot_dimension_numbers<[1], [0], [0], [1], [0, 0, 1, 1], [], []>} : vector<8x128xbf16>, vector<128x512xbf16>, vector<8x512xf32> -> vector<8x512xf32>
    %17 = arith.addf %12, %16 : vector<8x512xf32>
    %c0_17 = arith.constant 0 : index
    %c0_18 = arith.constant 0 : index
    %c0_19 = arith.constant 0 : index
    %18 = vector.load %arg2[%c0_17, %c0_18, %c0_19] : memref<8x8x512xf32, #tpu.memory_space<vmem>>, vector<1x8x512xf32>
    %19 = vector.shape_cast %18 : vector<1x8x512xf32> to vector<8x512xf32>
    %c0_20 = arith.constant 0 : index
    %c0_21 = arith.constant 0 : index
    %20 = vector.load %arg10[%c0_20, %c0_21] : memref<8x128xf32, #tpu.memory_space<vmem>>, vector<8x128xf32>
    %21 = arith.truncf %20 : vector<8x128xf32> to vector<8x128xbf16>
    %c0_22 = arith.constant 0 : index
    %c0_23 = arith.constant 0 : index
    %22 = vector.load %arg4[%c0_22, %c0_23] : memref<128x512xbf16, #tpu.memory_space<vmem>>, vector<128x512xbf16>
    %cst_24 = arith.constant dense<0.000000e+00> : vector<8x512xf32>
    %23 = tpu.matmul %21, %22, %cst_24 {dimension_numbers = #tpu.dot_dimension_numbers<[1], [0], [0], [1], [0, 0, 1, 1], [], []>} : vector<8x128xbf16>, vector<128x512xbf16>, vector<8x512xf32> -> vector<8x512xf32>
    %24 = arith.addf %19, %23 : vector<8x512xf32>
    %c0_25 = arith.constant 0 : index
    %c0_26 = arith.constant 0 : index
    %25 = vector.load %arg8[%c0_25, %c0_26] : memref<8x128xf32, #tpu.memory_space<vmem>>, vector<8x128xf32>
    %26 = vector.extract_strided_slice %17 {offsets = [0, 0], sizes = [8, 256], strides = [1, 1]} : vector<8x512xf32> to vector<8x256xf32>
    %27 = arith.negf %26 : vector<8x256xf32>
    %28 = math.exp %27 : vector<8x256xf32>
    %cst_27 = arith.constant 1.000000e+00 : f32
    %29 = vector.broadcast %cst_27 : f32 to vector<8x256xf32>
    %30 = arith.addf %29, %28 : vector<8x256xf32>
    %31 = arith.divf %29, %30 : vector<8x256xf32>
    %32 = vector.extract_strided_slice %17 {offsets = [0, 256], sizes = [8, 128], strides = [1, 1]} : vector<8x512xf32> to vector<8x128xf32>
    %33 = math.tanh %32 : vector<8x128xf32>
    %34 = vector.extract_strided_slice %17 {offsets = [0, 384], sizes = [8, 128], strides = [1, 1]} : vector<8x512xf32> to vector<8x128xf32>
    %35 = arith.negf %34 : vector<8x128xf32>
    %36 = math.exp %35 : vector<8x128xf32>
    %cst_28 = arith.constant 1.000000e+00 : f32
    %37 = vector.broadcast %cst_28 : f32 to vector<8x128xf32>
    %38 = arith.addf %37, %36 : vector<8x128xf32>
    %39 = arith.divf %37, %38 : vector<8x128xf32>
    %40 = vector.extract_strided_slice %31 {offsets = [0, 128], sizes = [8, 128], strides = [1, 1]} : vector<8x256xf32> to vector<8x128xf32>
    %41 = arith.mulf %40, %25 : vector<8x128xf32>
    %42 = vector.extract_strided_slice %31 {offsets = [0, 0], sizes = [8, 128], strides = [1, 1]} : vector<8x256xf32> to vector<8x128xf32>
    %43 = arith.mulf %42, %33 : vector<8x128xf32>
    %44 = arith.addf %41, %43 : vector<8x128xf32>
    %45 = math.tanh %44 : vector<8x128xf32>
    %46 = arith.mulf %39, %45 : vector<8x128xf32>
    %c0_29 = arith.constant 0 : index
    %c0_30 = arith.constant 0 : index
    %47 = vector.load %arg11[%c0_29, %c0_30] : memref<8x128xf32, #tpu.memory_space<vmem>>, vector<8x128xf32>
    %48 = vector.extract_strided_slice %24 {offsets = [0, 0], sizes = [8, 256], strides = [1, 1]} : vector<8x512xf32> to vector<8x256xf32>
    %49 = arith.negf %48 : vector<8x256xf32>
    %50 = math.exp %49 : vector<8x256xf32>
    %cst_31 = arith.constant 1.000000e+00 : f32
    %51 = vector.broadcast %cst_31 : f32 to vector<8x256xf32>
    %52 = arith.addf %51, %50 : vector<8x256xf32>
    %53 = arith.divf %51, %52 : vector<8x256xf32>
    %54 = vector.extract_strided_slice %24 {offsets = [0, 256], sizes = [8, 128], strides = [1, 1]} : vector<8x512xf32> to vector<8x128xf32>
    %55 = math.tanh %54 : vector<8x128xf32>
    %56 = vector.extract_strided_slice %24 {offsets = [0, 384], sizes = [8, 128], strides = [1, 1]} : vector<8x512xf32> to vector<8x128xf32>
    %57 = arith.negf %56 : vector<8x128xf32>
    %58 = math.exp %57 : vector<8x128xf32>
    %cst_32 = arith.constant 1.000000e+00 : f32
    %59 = vector.broadcast %cst_32 : f32 to vector<8x128xf32>
    %60 = arith.addf %59, %58 : vector<8x128xf32>
    %61 = arith.divf %59, %60 : vector<8x128xf32>
    %62 = vector.extract_strided_slice %53 {offsets = [0, 128], sizes = [8, 128], strides = [1, 1]} : vector<8x256xf32> to vector<8x128xf32>
    %63 = arith.mulf %62, %47 : vector<8x128xf32>
    %64 = vector.extract_strided_slice %53 {offsets = [0, 0], sizes = [8, 128], strides = [1, 1]} : vector<8x256xf32> to vector<8x128xf32>
    %65 = arith.mulf %64, %55 : vector<8x128xf32>
    %66 = arith.addf %63, %65 : vector<8x128xf32>
    %67 = math.tanh %66 : vector<8x128xf32>
    %68 = arith.mulf %61, %67 : vector<8x128xf32>
    %c0_33 = arith.constant 0 : index
    %c0_34 = arith.constant 0 : index
    %69 = vector.load %arg7[%c0_33, %c0_34] : memref<8x128xf32, #tpu.memory_space<vmem>>, vector<8x128xf32>
    tpu.vector_store %arg7[%c0_33, %c0_34], %46 {strides = array<i32>} : memref<8x128xf32, #tpu.memory_space<vmem>>, vector<8x128xf32>,
    %c0_35 = arith.constant 0 : index
    %c0_36 = arith.constant 0 : index
    %70 = vector.load %arg8[%c0_35, %c0_36] : memref<8x128xf32, #tpu.memory_space<vmem>>, vector<8x128xf32>
    tpu.vector_store %arg8[%c0_35, %c0_36], %44 {strides = array<i32>} : memref<8x128xf32, #tpu.memory_space<vmem>>, vector<8x128xf32>,
    %71 = arith.addf %3, %46 : vector<8x128xf32>
    %c0_37 = arith.constant 0 : index
    %c0_38 = arith.constant 0 : index
    %72 = vector.load %arg9[%c0_37, %c0_38] : memref<8x128xf32, #tpu.memory_space<vmem>>, vector<8x128xf32>
    tpu.vector_store %arg9[%c0_37, %c0_38], %71 {strides = array<i32>} : memref<8x128xf32, #tpu.memory_space<vmem>>, vector<8x128xf32>,
    %c0_39 = arith.constant 0 : index
    %c0_40 = arith.constant 0 : index
    %73 = vector.load %arg10[%c0_39, %c0_40] : memref<8x128xf32, #tpu.memory_space<vmem>>, vector<8x128xf32>
    tpu.vector_store %arg10[%c0_39, %c0_40], %68 {strides = array<i32>} : memref<8x128xf32, #tpu.memory_space<vmem>>, vector<8x128xf32>,
    %c0_41 = arith.constant 0 : index
    %c0_42 = arith.constant 0 : index
    %74 = vector.load %arg11[%c0_41, %c0_42] : memref<8x128xf32, #tpu.memory_space<vmem>>, vector<8x128xf32>
    tpu.vector_store %arg11[%c0_41, %c0_42], %66 {strides = array<i32>} : memref<8x128xf32, #tpu.memory_space<vmem>>, vector<8x128xf32>,
    %75 = arith.addf %4, %68 : vector<8x128xf32>
    %c0_43 = arith.constant 0 : index
    %c0_44 = arith.constant 0 : index
    %76 = vector.load %arg12[%c0_43, %c0_44] : memref<8x128xf32, #tpu.memory_space<vmem>>, vector<8x128xf32>
    tpu.vector_store %arg12[%c0_43, %c0_44], %75 {strides = array<i32>} : memref<8x128xf32, #tpu.memory_space<vmem>>, vector<8x128xf32>,
    %c0_45 = arith.constant 0 : index
    %c0_46 = arith.constant 0 : index
    %77 = vector.load %arg9[%c0_45, %c0_46] : memref<8x128xf32, #tpu.memory_space<vmem>>, vector<8x128xf32>
    %c0_47 = arith.constant 0 : index
    %c0_48 = arith.constant 0 : index
    %78 = vector.load %arg12[%c0_47, %c0_48] : memref<8x128xf32, #tpu.memory_space<vmem>>, vector<8x128xf32>
    %c1 = arith.constant 1 : index
    %c0_49 = arith.constant 0 : index
    %c0_50 = arith.constant 0 : index
    %79 = vector.load %arg5[%c1, %c0_49, %c0_50] : memref<8x8x128xf32, #tpu.memory_space<vmem>>, vector<1x8x128xf32>
    %80 = vector.shape_cast %79 : vector<1x8x128xf32> to vector<8x128xf32>
    %81 = vector.shape_cast %77 : vector<8x128xf32> to vector<1x8x128xf32>
    tpu.vector_store %arg5[%c1, %c0_49, %c0_50], %81 {strides = array<i32>} : memref<8x8x128xf32, #tpu.memory_space<vmem>>, vector<1x8x128xf32>,
    %c1_51 = arith.constant 1 : index
    %c0_52 = arith.constant 0 : index
    %c0_53 = arith.constant 0 : index
    %82 = vector.load %arg6[%c1_51, %c0_52, %c0_53] : memref<8x8x128xf32, #tpu.memory_space<vmem>>, vector<1x8x128xf32>
    %83 = vector.shape_cast %82 : vector<1x8x128xf32> to vector<8x128xf32>
    %84 = vector.shape_cast %78 : vector<8x128xf32> to vector<1x8x128xf32>
    tpu.vector_store %arg6[%c1_51, %c0_52, %c0_53], %84 {strides = array<i32>} : memref<8x8x128xf32, #tpu.memory_space<vmem>>, vector<1x8x128xf32>,
    %c1_54 = arith.constant 1 : index
    %c0_55 = arith.constant 0 : index
    %c0_56 = arith.constant 0 : index
    %85 = vector.load %arg1[%c1_54, %c0_55, %c0_56] : memref<8x8x512xf32, #tpu.memory_space<vmem>>, vector<1x8x512xf32>
    %86 = vector.shape_cast %85 : vector<1x8x512xf32> to vector<8x512xf32>
    %c0_57 = arith.constant 0 : index
    %c0_58 = arith.constant 0 : index
    %87 = vector.load %arg7[%c0_57, %c0_58] : memref<8x128xf32, #tpu.memory_space<vmem>>, vector<8x128xf32>
    %88 = arith.truncf %87 : vector<8x128xf32> to vector<8x128xbf16>
    %c0_59 = arith.constant 0 : index
    %c0_60 = arith.constant 0 : index
    %89 = vector.load %arg3[%c0_59, %c0_60] : memref<128x512xbf16, #tpu.memory_space<vmem>>, vector<128x512xbf16>
    %cst_61 = arith.constant dense<0.000000e+00> : vector<8x512xf32>
    %90 = tpu.matmul %88, %89, %cst_61 {dimension_numbers = #tpu.dot_dimension_numbers<[1], [0], [0], [1], [0, 0, 1, 1], [], []>} : vector<8x128xbf16>, vector<128x512xbf16>, vector<8x512xf32> -> vector<8x512xf32>
    %91 = arith.addf %86, %90 : vector<8x512xf32>
    %c1_62 = arith.constant 1 : index
    %c0_63 = arith.constant 0 : index
    %c0_64 = arith.constant 0 : index
    %92 = vector.load %arg2[%c1_62, %c0_63, %c0_64] : memref<8x8x512xf32, #tpu.memory_space<vmem>>, vector<1x8x512xf32>
    %93 = vector.shape_cast %92 : vector<1x8x512xf32> to vector<8x512xf32>
    %c0_65 = arith.constant 0 : index
    %c0_66 = arith.constant 0 : index
    %94 = vector.load %arg10[%c0_65, %c0_66] : memref<8x128xf32, #tpu.memory_space<vmem>>, vector<8x128xf32>
    %95 = arith.truncf %94 : vector<8x128xf32> to vector<8x128xbf16>
    %c0_67 = arith.constant 0 : index
    %c0_68 = arith.constant 0 : index
    %96 = vector.load %arg4[%c0_67, %c0_68] : memref<128x512xbf16, #tpu.memory_space<vmem>>, vector<128x512xbf16>
    %cst_69 = arith.constant dense<0.000000e+00> : vector<8x512xf32>
    %97 = tpu.matmul %95, %96, %cst_69 {dimension_numbers = #tpu.dot_dimension_numbers<[1], [0], [0], [1], [0, 0, 1, 1], [], []>} : vector<8x128xbf16>, vector<128x512xbf16>, vector<8x512xf32> -> vector<8x512xf32>
    %98 = arith.addf %93, %97 : vector<8x512xf32>
    %c0_70 = arith.constant 0 : index
    %c0_71 = arith.constant 0 : index
    %99 = vector.load %arg8[%c0_70, %c0_71] : memref<8x128xf32, #tpu.memory_space<vmem>>, vector<8x128xf32>
    %100 = vector.extract_strided_slice %91 {offsets = [0, 0], sizes = [8, 256], strides = [1, 1]} : vector<8x512xf32> to vector<8x256xf32>
    %101 = arith.negf %100 : vector<8x256xf32>
    %102 = math.exp %101 : vector<8x256xf32>
    %cst_72 = arith.constant 1.000000e+00 : f32
    %103 = vector.broadcast %cst_72 : f32 to vector<8x256xf32>
    %104 = arith.addf %103, %102 : vector<8x256xf32>
    %105 = arith.divf %103, %104 : vector<8x256xf32>
    %106 = vector.extract_strided_slice %91 {offsets = [0, 256], sizes = [8, 128], strides = [1, 1]} : vector<8x512xf32> to vector<8x128xf32>
    %107 = math.tanh %106 : vector<8x128xf32>
    %108 = vector.extract_strided_slice %91 {offsets = [0, 384], sizes = [8, 128], strides = [1, 1]} : vector<8x512xf32> to vector<8x128xf32>
    %109 = arith.negf %108 : vector<8x128xf32>
    %110 = math.exp %109 : vector<8x128xf32>
    %cst_73 = arith.constant 1.000000e+00 : f32
    %111 = vector.broadcast %cst_73 : f32 to vector<8x128xf32>
    %112 = arith.addf %111, %110 : vector<8x128xf32>
    %113 = arith.divf %111, %112 : vector<8x128xf32>
    %114 = vector.extract_strided_slice %105 {offsets = [0, 128], sizes = [8, 128], strides = [1, 1]} : vector<8x256xf32> to vector<8x128xf32>
    %115 = arith.mulf %114, %99 : vector<8x128xf32>
    %116 = vector.extract_strided_slice %105 {offsets = [0, 0], sizes = [8, 128], strides = [1, 1]} : vector<8x256xf32> to vector<8x128xf32>
    %117 = arith.mulf %116, %107 : vector<8x128xf32>
    %118 = arith.addf %115, %117 : vector<8x128xf32>
    %119 = math.tanh %118 : vector<8x128xf32>
    %120 = arith.mulf %113, %119 : vector<8x128xf32>
    %c0_74 = arith.constant 0 : index
    %c0_75 = arith.constant 0 : index
    %121 = vector.load %arg11[%c0_74, %c0_75] : memref<8x128xf32, #tpu.memory_space<vmem>>, vector<8x128xf32>
    %122 = vector.extract_strided_slice %98 {offsets = [0, 0], sizes = [8, 256], strides = [1, 1]} : vector<8x512xf32> to vector<8x256xf32>
    %123 = arith.negf %122 : vector<8x256xf32>
    %124 = math.exp %123 : vector<8x256xf32>
    %cst_76 = arith.constant 1.000000e+00 : f32
    %125 = vector.broadcast %cst_76 : f32 to vector<8x256xf32>
    %126 = arith.addf %125, %124 : vector<8x256xf32>
    %127 = arith.divf %125, %126 : vector<8x256xf32>
    %128 = vector.extract_strided_slice %98 {offsets = [0, 256], sizes = [8, 128], strides = [1, 1]} : vector<8x512xf32> to vector<8x128xf32>
    %129 = math.tanh %128 : vector<8x128xf32>
    %130 = vector.extract_strided_slice %98 {offsets = [0, 384], sizes = [8, 128], strides = [1, 1]} : vector<8x512xf32> to vector<8x128xf32>
    %131 = arith.negf %130 : vector<8x128xf32>
    %132 = math.exp %131 : vector<8x128xf32>
    %cst_77 = arith.constant 1.000000e+00 : f32
    %133 = vector.broadcast %cst_77 : f32 to vector<8x128xf32>
    %134 = arith.addf %133, %132 : vector<8x128xf32>
    %135 = arith.divf %133, %134 : vector<8x128xf32>
    %136 = vector.extract_strided_slice %127 {offsets = [0, 128], sizes = [8, 128], strides = [1, 1]} : vector<8x256xf32> to vector<8x128xf32>
    %137 = arith.mulf %136, %121 : vector<8x128xf32>
    %138 = vector.extract_strided_slice %127 {offsets = [0, 0], sizes = [8, 128], strides = [1, 1]} : vector<8x256xf32> to vector<8x128xf32>
    %139 = arith.mulf %138, %129 : vector<8x128xf32>
    %140 = arith.addf %137, %139 : vector<8x128xf32>
    %141 = math.tanh %140 : vector<8x128xf32>
    %142 = arith.mulf %135, %141 : vector<8x128xf32>
    %c0_78 = arith.constant 0 : index
    %c0_79 = arith.constant 0 : index
    %143 = vector.load %arg7[%c0_78, %c0_79] : memref<8x128xf32, #tpu.memory_space<vmem>>, vector<8x128xf32>
    tpu.vector_store %arg7[%c0_78, %c0_79], %120 {strides = array<i32>} : memref<8x128xf32, #tpu.memory_space<vmem>>, vector<8x128xf32>,
    %c0_80 = arith.constant 0 : index
    %c0_81 = arith.constant 0 : index
    %144 = vector.load %arg8[%c0_80, %c0_81] : memref<8x128xf32, #tpu.memory_space<vmem>>, vector<8x128xf32>
    tpu.vector_store %arg8[%c0_80, %c0_81], %118 {strides = array<i32>} : memref<8x128xf32, #tpu.memory_space<vmem>>, vector<8x128xf32>,
    %145 = arith.addf %77, %120 : vector<8x128xf32>
    %c0_82 = arith.constant 0 : index
    %c0_83 = arith.constant 0 : index
    %146 = vector.load %arg9[%c0_82, %c0_83] : memref<8x128xf32, #tpu.memory_space<vmem>>, vector<8x128xf32>
    tpu.vector_store %arg9[%c0_82, %c0_83], %145 {strides = array<i32>} : memref<8x128xf32, #tpu.memory_space<vmem>>, vector<8x128xf32>,
    %c0_84 = arith.constant 0 : index
    %c0_85 = arith.constant 0 : index
    %147 = vector.load %arg10[%c0_84, %c0_85] : memref<8x128xf32, #tpu.memory_space<vmem>>, vector<8x128xf32>
    tpu.vector_store %arg10[%c0_84, %c0_85], %142 {strides = array<i32>} : memref<8x128xf32, #tpu.memory_space<vmem>>, vector<8x128xf32>,
    %c0_86 = arith.constant 0 : index
    %c0_87 = arith.constant 0 : index
    %148 = vector.load %arg11[%c0_86, %c0_87] : memref<8x128xf32, #tpu.memory_space<vmem>>, vector<8x128xf32>
    tpu.vector_store %arg11[%c0_86, %c0_87], %140 {strides = array<i32>} : memref<8x128xf32, #tpu.memory_space<vmem>>, vector<8x128xf32>,
    %149 = arith.addf %78, %142 : vector<8x128xf32>
    %c0_88 = arith.constant 0 : index
    %c0_89 = arith.constant 0 : index
    %150 = vector.load %arg12[%c0_88, %c0_89] : memref<8x128xf32, #tpu.memory_space<vmem>>, vector<8x128xf32>
    tpu.vector_store %arg12[%c0_88, %c0_89], %149 {strides = array<i32>} : memref<8x128xf32, #tpu.memory_space<vmem>>, vector<8x128xf32>,
    %c0_90 = arith.constant 0 : index
    %c0_91 = arith.constant 0 : index
    %151 = vector.load %arg9[%c0_90, %c0_91] : memref<8x128xf32, #tpu.memory_space<vmem>>, vector<8x128xf32>
    %c0_92 = arith.constant 0 : index
    %c0_93 = arith.constant 0 : index
    %152 = vector.load %arg12[%c0_92, %c0_93] : memref<8x128xf32, #tpu.memory_space<vmem>>, vector<8x128xf32>
    %c2 = arith.constant 2 : index
    %c0_94 = arith.constant 0 : index
    %c0_95 = arith.constant 0 : index
    %153 = vector.load %arg5[%c2, %c0_94, %c0_95] : memref<8x8x128xf32, #tpu.memory_space<vmem>>, vector<1x8x128xf32>
    %154 = vector.shape_cast %153 : vector<1x8x128xf32> to vector<8x128xf32>
    %155 = vector.shape_cast %151 : vector<8x128xf32> to vector<1x8x128xf32>
    tpu.vector_store %arg5[%c2, %c0_94, %c0_95], %155 {strides = array<i32>} : memref<8x8x128xf32, #tpu.memory_space<vmem>>, vector<1x8x128xf32>,
    %c2_96 = arith.constant 2 : index
    %c0_97 = arith.constant 0 : index
    %c0_98 = arith.constant 0 : index
    %156 = vector.load %arg6[%c2_96, %c0_97, %c0_98] : memref<8x8x128xf32, #tpu.memory_space<vmem>>, vector<1x8x128xf32>
    %157 = vector.shape_cast %156 : vector<1x8x128xf32> to vector<8x128xf32>
    %158 = vector.shape_cast %152 : vector<8x128xf32> to vector<1x8x128xf32>
    tpu.vector_store %arg6[%c2_96, %c0_97, %c0_98], %158 {strides = array<i32>} : memref<8x8x128xf32, #tpu.memory_space<vmem>>, vector<1x8x128xf32>,
    %c2_99 = arith.constant 2 : index
    %c0_100 = arith.constant 0 : index
    %c0_101 = arith.constant 0 : index
    %159 = vector.load %arg1[%c2_99, %c0_100, %c0_101] : memref<8x8x512xf32, #tpu.memory_space<vmem>>, vector<1x8x512xf32>
    %160 = vector.shape_cast %159 : vector<1x8x512xf32> to vector<8x512xf32>
    %c0_102 = arith.constant 0 : index
    %c0_103 = arith.constant 0 : index
    %161 = vector.load %arg7[%c0_102, %c0_103] : memref<8x128xf32, #tpu.memory_space<vmem>>, vector<8x128xf32>
    %162 = arith.truncf %161 : vector<8x128xf32> to vector<8x128xbf16>
    %c0_104 = arith.constant 0 : index
    %c0_105 = arith.constant 0 : index
    %163 = vector.load %arg3[%c0_104, %c0_105] : memref<128x512xbf16, #tpu.memory_space<vmem>>, vector<128x512xbf16>
    %cst_106 = arith.constant dense<0.000000e+00> : vector<8x512xf32>
    %164 = tpu.matmul %162, %163, %cst_106 {dimension_numbers = #tpu.dot_dimension_numbers<[1], [0], [0], [1], [0, 0, 1, 1], [], []>} : vector<8x128xbf16>, vector<128x512xbf16>, vector<8x512xf32> -> vector<8x512xf32>
    %165 = arith.addf %160, %164 : vector<8x512xf32>
    %c2_107 = arith.constant 2 : index
    %c0_108 = arith.constant 0 : index
    %c0_109 = arith.constant 0 : index
    %166 = vector.load %arg2[%c2_107, %c0_108, %c0_109] : memref<8x8x512xf32, #tpu.memory_space<vmem>>, vector<1x8x512xf32>
    %167 = vector.shape_cast %166 : vector<1x8x512xf32> to vector<8x512xf32>
    %c0_110 = arith.constant 0 : index
    %c0_111 = arith.constant 0 : index
    %168 = vector.load %arg10[%c0_110, %c0_111] : memref<8x128xf32, #tpu.memory_space<vmem>>, vector<8x128xf32>
    %169 = arith.truncf %168 : vector<8x128xf32> to vector<8x128xbf16>
    %c0_112 = arith.constant 0 : index
    %c0_113 = arith.constant 0 : index
    %170 = vector.load %arg4[%c0_112, %c0_113] : memref<128x512xbf16, #tpu.memory_space<vmem>>, vector<128x512xbf16>
    %cst_114 = arith.constant dense<0.000000e+00> : vector<8x512xf32>
    %171 = tpu.matmul %169, %170, %cst_114 {dimension_numbers = #tpu.dot_dimension_numbers<[1], [0], [0], [1], [0, 0, 1, 1], [], []>} : vector<8x128xbf16>, vector<128x512xbf16>, vector<8x512xf32> -> vector<8x512xf32>
    %172 = arith.addf %167, %171 : vector<8x512xf32>
    %c0_115 = arith.constant 0 : index
    %c0_116 = arith.constant 0 : index
    %173 = vector.load %arg8[%c0_115, %c0_116] : memref<8x128xf32, #tpu.memory_space<vmem>>, vector<8x128xf32>
    %174 = vector.extract_strided_slice %165 {offsets = [0, 0], sizes = [8, 256], strides = [1, 1]} : vector<8x512xf32> to vector<8x256xf32>
    %175 = arith.negf %174 : vector<8x256xf32>
    %176 = math.exp %175 : vector<8x256xf32>
    %cst_117 = arith.constant 1.000000e+00 : f32
    %177 = vector.broadcast %cst_117 : f32 to vector<8x256xf32>
    %178 = arith.addf %177, %176 : vector<8x256xf32>
    %179 = arith.divf %177, %178 : vector<8x256xf32>
    %180 = vector.extract_strided_slice %165 {offsets = [0, 256], sizes = [8, 128], strides = [1, 1]} : vector<8x512xf32> to vector<8x128xf32>
    %181 = math.tanh %180 : vector<8x128xf32>
    %182 = vector.extract_strided_slice %165 {offsets = [0, 384], sizes = [8, 128], strides = [1, 1]} : vector<8x512xf32> to vector<8x128xf32>
    %183 = arith.negf %182 : vector<8x128xf32>
    %184 = math.exp %183 : vector<8x128xf32>
    %cst_118 = arith.constant 1.000000e+00 : f32
    %185 = vector.broadcast %cst_118 : f32 to vector<8x128xf32>
    %186 = arith.addf %185, %184 : vector<8x128xf32>
    %187 = arith.divf %185, %186 : vector<8x128xf32>
    %188 = vector.extract_strided_slice %179 {offsets = [0, 128], sizes = [8, 128], strides = [1, 1]} : vector<8x256xf32> to vector<8x128xf32>
    %189 = arith.mulf %188, %173 : vector<8x128xf32>
    %190 = vector.extract_strided_slice %179 {offsets = [0, 0], sizes = [8, 128], strides = [1, 1]} : vector<8x256xf32> to vector<8x128xf32>
    %191 = arith.mulf %190, %181 : vector<8x128xf32>
    %192 = arith.addf %189, %191 : vector<8x128xf32>
    %193 = math.tanh %192 : vector<8x128xf32>
    %194 = arith.mulf %187, %193 : vector<8x128xf32>
    %c0_119 = arith.constant 0 : index
    %c0_120 = arith.constant 0 : index
    %195 = vector.load %arg11[%c0_119, %c0_120] : memref<8x128xf32, #tpu.memory_space<vmem>>, vector<8x128xf32>
    %196 = vector.extract_strided_slice %172 {offsets = [0, 0], sizes = [8, 256], strides = [1, 1]} : vector<8x512xf32> to vector<8x256xf32>
    %197 = arith.negf %196 : vector<8x256xf32>
    %198 = math.exp %197 : vector<8x256xf32>
    %cst_121 = arith.constant 1.000000e+00 : f32
    %199 = vector.broadcast %cst_121 : f32 to vector<8x256xf32>
    %200 = arith.addf %199, %198 : vector<8x256xf32>
    %201 = arith.divf %199, %200 : vector<8x256xf32>
    %202 = vector.extract_strided_slice %172 {offsets = [0, 256], sizes = [8, 128], strides = [1, 1]} : vector<8x512xf32> to vector<8x128xf32>
    %203 = math.tanh %202 : vector<8x128xf32>
    %204 = vector.extract_strided_slice %172 {offsets = [0, 384], sizes = [8, 128], strides = [1, 1]} : vector<8x512xf32> to vector<8x128xf32>
    %205 = arith.negf %204 : vector<8x128xf32>
    %206 = math.exp %205 : vector<8x128xf32>
    %cst_122 = arith.constant 1.000000e+00 : f32
    %207 = vector.broadcast %cst_122 : f32 to vector<8x128xf32>
    %208 = arith.addf %207, %206 : vector<8x128xf32>
    %209 = arith.divf %207, %208 : vector<8x128xf32>
    %210 = vector.extract_strided_slice %201 {offsets = [0, 128], sizes = [8, 128], strides = [1, 1]} : vector<8x256xf32> to vector<8x128xf32>
    %211 = arith.mulf %210, %195 : vector<8x128xf32>
    %212 = vector.extract_strided_slice %201 {offsets = [0, 0], sizes = [8, 128], strides = [1, 1]} : vector<8x256xf32> to vector<8x128xf32>
    %213 = arith.mulf %212, %203 : vector<8x128xf32>
    %214 = arith.addf %211, %213 : vector<8x128xf32>
    %215 = math.tanh %214 : vector<8x128xf32>
    %216 = arith.mulf %209, %215 : vector<8x128xf32>
    %c0_123 = arith.constant 0 : index
    %c0_124 = arith.constant 0 : index
    %217 = vector.load %arg7[%c0_123, %c0_124] : memref<8x128xf32, #tpu.memory_space<vmem>>, vector<8x128xf32>
    tpu.vector_store %arg7[%c0_123, %c0_124], %194 {strides = array<i32>} : memref<8x128xf32, #tpu.memory_space<vmem>>, vector<8x128xf32>,
    %c0_125 = arith.constant 0 : index
    %c0_126 = arith.constant 0 : index
    %218 = vector.load %arg8[%c0_125, %c0_126] : memref<8x128xf32, #tpu.memory_space<vmem>>, vector<8x128xf32>
    tpu.vector_store %arg8[%c0_125, %c0_126], %192 {strides = array<i32>} : memref<8x128xf32, #tpu.memory_space<vmem>>, vector<8x128xf32>,
    %219 = arith.addf %151, %194 : vector<8x128xf32>
    %c0_127 = arith.constant 0 : index
    %c0_128 = arith.constant 0 : index
    %220 = vector.load %arg9[%c0_127, %c0_128] : memref<8x128xf32, #tpu.memory_space<vmem>>, vector<8x128xf32>
    tpu.vector_store %arg9[%c0_127, %c0_128], %219 {strides = array<i32>} : memref<8x128xf32, #tpu.memory_space<vmem>>, vector<8x128xf32>,
    %c0_129 = arith.constant 0 : index
    %c0_130 = arith.constant 0 : index
    %221 = vector.load %arg10[%c0_129, %c0_130] : memref<8x128xf32, #tpu.memory_space<vmem>>, vector<8x128xf32>
    tpu.vector_store %arg10[%c0_129, %c0_130], %216 {strides = array<i32>} : memref<8x128xf32, #tpu.memory_space<vmem>>, vector<8x128xf32>,
    %c0_131 = arith.constant 0 : index
    %c0_132 = arith.constant 0 : index
    %222 = vector.load %arg11[%c0_131, %c0_132] : memref<8x128xf32, #tpu.memory_space<vmem>>, vector<8x128xf32>
    tpu.vector_store %arg11[%c0_131, %c0_132], %214 {strides = array<i32>} : memref<8x128xf32, #tpu.memory_space<vmem>>, vector<8x128xf32>,
    %223 = arith.addf %152, %216 : vector<8x128xf32>
    %c0_133 = arith.constant 0 : index
    %c0_134 = arith.constant 0 : index
    %224 = vector.load %arg12[%c0_133, %c0_134] : memref<8x128xf32, #tpu.memory_space<vmem>>, vector<8x128xf32>
    tpu.vector_store %arg12[%c0_133, %c0_134], %223 {strides = array<i32>} : memref<8x128xf32, #tpu.memory_space<vmem>>, vector<8x128xf32>,
    %c0_135 = arith.constant 0 : index
    %c0_136 = arith.constant 0 : index
    %225 = vector.load %arg9[%c0_135, %c0_136] : memref<8x128xf32, #tpu.memory_space<vmem>>, vector<8x128xf32>
    %c0_137 = arith.constant 0 : index
    %c0_138 = arith.constant 0 : index
    %226 = vector.load %arg12[%c0_137, %c0_138] : memref<8x128xf32, #tpu.memory_space<vmem>>, vector<8x128xf32>
    %c3 = arith.constant 3 : index
    %c0_139 = arith.constant 0 : index
    %c0_140 = arith.constant 0 : index
    %227 = vector.load %arg5[%c3, %c0_139, %c0_140] : memref<8x8x128xf32, #tpu.memory_space<vmem>>, vector<1x8x128xf32>
    %228 = vector.shape_cast %227 : vector<1x8x128xf32> to vector<8x128xf32>
    %229 = vector.shape_cast %225 : vector<8x128xf32> to vector<1x8x128xf32>
    tpu.vector_store %arg5[%c3, %c0_139, %c0_140], %229 {strides = array<i32>} : memref<8x8x128xf32, #tpu.memory_space<vmem>>, vector<1x8x128xf32>,
    %c3_141 = arith.constant 3 : index
    %c0_142 = arith.constant 0 : index
    %c0_143 = arith.constant 0 : index
    %230 = vector.load %arg6[%c3_141, %c0_142, %c0_143] : memref<8x8x128xf32, #tpu.memory_space<vmem>>, vector<1x8x128xf32>
    %231 = vector.shape_cast %230 : vector<1x8x128xf32> to vector<8x128xf32>
    %232 = vector.shape_cast %226 : vector<8x128xf32> to vector<1x8x128xf32>
    tpu.vector_store %arg6[%c3_141, %c0_142, %c0_143], %232 {strides = array<i32>} : memref<8x8x128xf32, #tpu.memory_space<vmem>>, vector<1x8x128xf32>,
    %c3_144 = arith.constant 3 : index
    %c0_145 = arith.constant 0 : index
    %c0_146 = arith.constant 0 : index
    %233 = vector.load %arg1[%c3_144, %c0_145, %c0_146] : memref<8x8x512xf32, #tpu.memory_space<vmem>>, vector<1x8x512xf32>
    %234 = vector.shape_cast %233 : vector<1x8x512xf32> to vector<8x512xf32>
    %c0_147 = arith.constant 0 : index
    %c0_148 = arith.constant 0 : index
    %235 = vector.load %arg7[%c0_147, %c0_148] : memref<8x128xf32, #tpu.memory_space<vmem>>, vector<8x128xf32>
    %236 = arith.truncf %235 : vector<8x128xf32> to vector<8x128xbf16>
    %c0_149 = arith.constant 0 : index
    %c0_150 = arith.constant 0 : index
    %237 = vector.load %arg3[%c0_149, %c0_150] : memref<128x512xbf16, #tpu.memory_space<vmem>>, vector<128x512xbf16>
    %cst_151 = arith.constant dense<0.000000e+00> : vector<8x512xf32>
    %238 = tpu.matmul %236, %237, %cst_151 {dimension_numbers = #tpu.dot_dimension_numbers<[1], [0], [0], [1], [0, 0, 1, 1], [], []>} : vector<8x128xbf16>, vector<128x512xbf16>, vector<8x512xf32> -> vector<8x512xf32>
    %239 = arith.addf %234, %238 : vector<8x512xf32>
    %c3_152 = arith.constant 3 : index
    %c0_153 = arith.constant 0 : index
    %c0_154 = arith.constant 0 : index
    %240 = vector.load %arg2[%c3_152, %c0_153, %c0_154] : memref<8x8x512xf32, #tpu.memory_space<vmem>>, vector<1x8x512xf32>
    %241 = vector.shape_cast %240 : vector<1x8x512xf32> to vector<8x512xf32>
    %c0_155 = arith.constant 0 : index
    %c0_156 = arith.constant 0 : index
    %242 = vector.load %arg10[%c0_155, %c0_156] : memref<8x128xf32, #tpu.memory_space<vmem>>, vector<8x128xf32>
    %243 = arith.truncf %242 : vector<8x128xf32> to vector<8x128xbf16>
    %c0_157 = arith.constant 0 : index
    %c0_158 = arith.constant 0 : index
    %244 = vector.load %arg4[%c0_157, %c0_158] : memref<128x512xbf16, #tpu.memory_space<vmem>>, vector<128x512xbf16>
    %cst_159 = arith.constant dense<0.000000e+00> : vector<8x512xf32>
    %245 = tpu.matmul %243, %244, %cst_159 {dimension_numbers = #tpu.dot_dimension_numbers<[1], [0], [0], [1], [0, 0, 1, 1], [], []>} : vector<8x128xbf16>, vector<128x512xbf16>, vector<8x512xf32> -> vector<8x512xf32>
    %246 = arith.addf %241, %245 : vector<8x512xf32>
    %c0_160 = arith.constant 0 : index
    %c0_161 = arith.constant 0 : index
    %247 = vector.load %arg8[%c0_160, %c0_161] : memref<8x128xf32, #tpu.memory_space<vmem>>, vector<8x128xf32>
    %248 = vector.extract_strided_slice %239 {offsets = [0, 0], sizes = [8, 256], strides = [1, 1]} : vector<8x512xf32> to vector<8x256xf32>
    %249 = arith.negf %248 : vector<8x256xf32>
    %250 = math.exp %249 : vector<8x256xf32>
    %cst_162 = arith.constant 1.000000e+00 : f32
    %251 = vector.broadcast %cst_162 : f32 to vector<8x256xf32>
    %252 = arith.addf %251, %250 : vector<8x256xf32>
    %253 = arith.divf %251, %252 : vector<8x256xf32>
    %254 = vector.extract_strided_slice %239 {offsets = [0, 256], sizes = [8, 128], strides = [1, 1]} : vector<8x512xf32> to vector<8x128xf32>
    %255 = math.tanh %254 : vector<8x128xf32>
    %256 = vector.extract_strided_slice %239 {offsets = [0, 384], sizes = [8, 128], strides = [1, 1]} : vector<8x512xf32> to vector<8x128xf32>
    %257 = arith.negf %256 : vector<8x128xf32>
    %258 = math.exp %257 : vector<8x128xf32>
    %cst_163 = arith.constant 1.000000e+00 : f32
    %259 = vector.broadcast %cst_163 : f32 to vector<8x128xf32>
    %260 = arith.addf %259, %258 : vector<8x128xf32>
    %261 = arith.divf %259, %260 : vector<8x128xf32>
    %262 = vector.extract_strided_slice %253 {offsets = [0, 128], sizes = [8, 128], strides = [1, 1]} : vector<8x256xf32> to vector<8x128xf32>
    %263 = arith.mulf %262, %247 : vector<8x128xf32>
    %264 = vector.extract_strided_slice %253 {offsets = [0, 0], sizes = [8, 128], strides = [1, 1]} : vector<8x256xf32> to vector<8x128xf32>
    %265 = arith.mulf %264, %255 : vector<8x128xf32>
    %266 = arith.addf %263, %265 : vector<8x128xf32>
    %267 = math.tanh %266 : vector<8x128xf32>
    %268 = arith.mulf %261, %267 : vector<8x128xf32>
    %c0_164 = arith.constant 0 : index
    %c0_165 = arith.constant 0 : index
    %269 = vector.load %arg11[%c0_164, %c0_165] : memref<8x128xf32, #tpu.memory_space<vmem>>, vector<8x128xf32>
    %270 = vector.extract_strided_slice %246 {offsets = [0, 0], sizes = [8, 256], strides = [1, 1]} : vector<8x512xf32> to vector<8x256xf32>
    %271 = arith.negf %270 : vector<8x256xf32>
    %272 = math.exp %271 : vector<8x256xf32>
    %cst_166 = arith.constant 1.000000e+00 : f32
    %273 = vector.broadcast %cst_166 : f32 to vector<8x256xf32>
    %274 = arith.addf %273, %272 : vector<8x256xf32>
    %275 = arith.divf %273, %274 : vector<8x256xf32>
    %276 = vector.extract_strided_slice %246 {offsets = [0, 256], sizes = [8, 128], strides = [1, 1]} : vector<8x512xf32> to vector<8x128xf32>
    %277 = math.tanh %276 : vector<8x128xf32>
    %278 = vector.extract_strided_slice %246 {offsets = [0, 384], sizes = [8, 128], strides = [1, 1]} : vector<8x512xf32> to vector<8x128xf32>
    %279 = arith.negf %278 : vector<8x128xf32>
    %280 = math.exp %279 : vector<8x128xf32>
    %cst_167 = arith.constant 1.000000e+00 : f32
    %281 = vector.broadcast %cst_167 : f32 to vector<8x128xf32>
    %282 = arith.addf %281, %280 : vector<8x128xf32>
    %283 = arith.divf %281, %282 : vector<8x128xf32>
    %284 = vector.extract_strided_slice %275 {offsets = [0, 128], sizes = [8, 128], strides = [1, 1]} : vector<8x256xf32> to vector<8x128xf32>
    %285 = arith.mulf %284, %269 : vector<8x128xf32>
    %286 = vector.extract_strided_slice %275 {offsets = [0, 0], sizes = [8, 128], strides = [1, 1]} : vector<8x256xf32> to vector<8x128xf32>
    %287 = arith.mulf %286, %277 : vector<8x128xf32>
    %288 = arith.addf %285, %287 : vector<8x128xf32>
    %289 = math.tanh %288 : vector<8x128xf32>
    %290 = arith.mulf %283, %289 : vector<8x128xf32>
    %c0_168 = arith.constant 0 : index
    %c0_169 = arith.constant 0 : index
    %291 = vector.load %arg7[%c0_168, %c0_169] : memref<8x128xf32, #tpu.memory_space<vmem>>, vector<8x128xf32>
    tpu.vector_store %arg7[%c0_168, %c0_169], %268 {strides = array<i32>} : memref<8x128xf32, #tpu.memory_space<vmem>>, vector<8x128xf32>,
    %c0_170 = arith.constant 0 : index
    %c0_171 = arith.constant 0 : index
    %292 = vector.load %arg8[%c0_170, %c0_171] : memref<8x128xf32, #tpu.memory_space<vmem>>, vector<8x128xf32>
    tpu.vector_store %arg8[%c0_170, %c0_171], %266 {strides = array<i32>} : memref<8x128xf32, #tpu.memory_space<vmem>>, vector<8x128xf32>,
    %293 = arith.addf %225, %268 : vector<8x128xf32>
    %c0_172 = arith.constant 0 : index
    %c0_173 = arith.constant 0 : index
    %294 = vector.load %arg9[%c0_172, %c0_173] : memref<8x128xf32, #tpu.memory_space<vmem>>, vector<8x128xf32>
    tpu.vector_store %arg9[%c0_172, %c0_173], %293 {strides = array<i32>} : memref<8x128xf32, #tpu.memory_space<vmem>>, vector<8x128xf32>,
    %c0_174 = arith.constant 0 : index
    %c0_175 = arith.constant 0 : index
    %295 = vector.load %arg10[%c0_174, %c0_175] : memref<8x128xf32, #tpu.memory_space<vmem>>, vector<8x128xf32>
    tpu.vector_store %arg10[%c0_174, %c0_175], %290 {strides = array<i32>} : memref<8x128xf32, #tpu.memory_space<vmem>>, vector<8x128xf32>,
    %c0_176 = arith.constant 0 : index
    %c0_177 = arith.constant 0 : index
    %296 = vector.load %arg11[%c0_176, %c0_177] : memref<8x128xf32, #tpu.memory_space<vmem>>, vector<8x128xf32>
    tpu.vector_store %arg11[%c0_176, %c0_177], %288 {strides = array<i32>} : memref<8x128xf32, #tpu.memory_space<vmem>>, vector<8x128xf32>,
    %297 = arith.addf %226, %290 : vector<8x128xf32>
    %c0_178 = arith.constant 0 : index
    %c0_179 = arith.constant 0 : index
    %298 = vector.load %arg12[%c0_178, %c0_179] : memref<8x128xf32, #tpu.memory_space<vmem>>, vector<8x128xf32>
    tpu.vector_store %arg12[%c0_178, %c0_179], %297 {strides = array<i32>} : memref<8x128xf32, #tpu.memory_space<vmem>>, vector<8x128xf32>,
    %c0_180 = arith.constant 0 : index
    %c0_181 = arith.constant 0 : index
    %299 = vector.load %arg9[%c0_180, %c0_181] : memref<8x128xf32, #tpu.memory_space<vmem>>, vector<8x128xf32>
    %c0_182 = arith.constant 0 : index
    %c0_183 = arith.constant 0 : index
    %300 = vector.load %arg12[%c0_182, %c0_183] : memref<8x128xf32, #tpu.memory_space<vmem>>, vector<8x128xf32>
    %c4 = arith.constant 4 : index
    %c0_184 = arith.constant 0 : index
    %c0_185 = arith.constant 0 : index
    %301 = vector.load %arg5[%c4, %c0_184, %c0_185] : memref<8x8x128xf32, #tpu.memory_space<vmem>>, vector<1x8x128xf32>
    %302 = vector.shape_cast %301 : vector<1x8x128xf32> to vector<8x128xf32>
    %303 = vector.shape_cast %299 : vector<8x128xf32> to vector<1x8x128xf32>
    tpu.vector_store %arg5[%c4, %c0_184, %c0_185], %303 {strides = array<i32>} : memref<8x8x128xf32, #tpu.memory_space<vmem>>, vector<1x8x128xf32>,
    %c4_186 = arith.constant 4 : index
    %c0_187 = arith.constant 0 : index
    %c0_188 = arith.constant 0 : index
    %304 = vector.load %arg6[%c4_186, %c0_187, %c0_188] : memref<8x8x128xf32, #tpu.memory_space<vmem>>, vector<1x8x128xf32>
    %305 = vector.shape_cast %304 : vector<1x8x128xf32> to vector<8x128xf32>
    %306 = vector.shape_cast %300 : vector<8x128xf32> to vector<1x8x128xf32>
    tpu.vector_store %arg6[%c4_186, %c0_187, %c0_188], %306 {strides = array<i32>} : memref<8x8x128xf32, #tpu.memory_space<vmem>>, vector<1x8x128xf32>,
    %c4_189 = arith.constant 4 : index
    %c0_190 = arith.constant 0 : index
    %c0_191 = arith.constant 0 : index
    %307 = vector.load %arg1[%c4_189, %c0_190, %c0_191] : memref<8x8x512xf32, #tpu.memory_space<vmem>>, vector<1x8x512xf32>
    %308 = vector.shape_cast %307 : vector<1x8x512xf32> to vector<8x512xf32>
    %c0_192 = arith.constant 0 : index
    %c0_193 = arith.constant 0 : index
    %309 = vector.load %arg7[%c0_192, %c0_193] : memref<8x128xf32, #tpu.memory_space<vmem>>, vector<8x128xf32>
    %310 = arith.truncf %309 : vector<8x128xf32> to vector<8x128xbf16>
    %c0_194 = arith.constant 0 : index
    %c0_195 = arith.constant 0 : index
    %311 = vector.load %arg3[%c0_194, %c0_195] : memref<128x512xbf16, #tpu.memory_space<vmem>>, vector<128x512xbf16>
    %cst_196 = arith.constant dense<0.000000e+00> : vector<8x512xf32>
    %312 = tpu.matmul %310, %311, %cst_196 {dimension_numbers = #tpu.dot_dimension_numbers<[1], [0], [0], [1], [0, 0, 1, 1], [], []>} : vector<8x128xbf16>, vector<128x512xbf16>, vector<8x512xf32> -> vector<8x512xf32>
    %313 = arith.addf %308, %312 : vector<8x512xf32>
    %c4_197 = arith.constant 4 : index
    %c0_198 = arith.constant 0 : index
    %c0_199 = arith.constant 0 : index
    %314 = vector.load %arg2[%c4_197, %c0_198, %c0_199] : memref<8x8x512xf32, #tpu.memory_space<vmem>>, vector<1x8x512xf32>
    %315 = vector.shape_cast %314 : vector<1x8x512xf32> to vector<8x512xf32>
    %c0_200 = arith.constant 0 : index
    %c0_201 = arith.constant 0 : index
    %316 = vector.load %arg10[%c0_200, %c0_201] : memref<8x128xf32, #tpu.memory_space<vmem>>, vector<8x128xf32>
    %317 = arith.truncf %316 : vector<8x128xf32> to vector<8x128xbf16>
    %c0_202 = arith.constant 0 : index
    %c0_203 = arith.constant 0 : index
    %318 = vector.load %arg4[%c0_202, %c0_203] : memref<128x512xbf16, #tpu.memory_space<vmem>>, vector<128x512xbf16>
    %cst_204 = arith.constant dense<0.000000e+00> : vector<8x512xf32>
    %319 = tpu.matmul %317, %318, %cst_204 {dimension_numbers = #tpu.dot_dimension_numbers<[1], [0], [0], [1], [0, 0, 1, 1], [], []>} : vector<8x128xbf16>, vector<128x512xbf16>, vector<8x512xf32> -> vector<8x512xf32>
    %320 = arith.addf %315, %319 : vector<8x512xf32>
    %c0_205 = arith.constant 0 : index
    %c0_206 = arith.constant 0 : index
    %321 = vector.load %arg8[%c0_205, %c0_206] : memref<8x128xf32, #tpu.memory_space<vmem>>, vector<8x128xf32>
    %322 = vector.extract_strided_slice %313 {offsets = [0, 0], sizes = [8, 256], strides = [1, 1]} : vector<8x512xf32> to vector<8x256xf32>
    %323 = arith.negf %322 : vector<8x256xf32>
    %324 = math.exp %323 : vector<8x256xf32>
    %cst_207 = arith.constant 1.000000e+00 : f32
    %325 = vector.broadcast %cst_207 : f32 to vector<8x256xf32>
    %326 = arith.addf %325, %324 : vector<8x256xf32>
    %327 = arith.divf %325, %326 : vector<8x256xf32>
    %328 = vector.extract_strided_slice %313 {offsets = [0, 256], sizes = [8, 128], strides = [1, 1]} : vector<8x512xf32> to vector<8x128xf32>
    %329 = math.tanh %328 : vector<8x128xf32>
    %330 = vector.extract_strided_slice %313 {offsets = [0, 384], sizes = [8, 128], strides = [1, 1]} : vector<8x512xf32> to vector<8x128xf32>
    %331 = arith.negf %330 : vector<8x128xf32>
    %332 = math.exp %331 : vector<8x128xf32>
    %cst_208 = arith.constant 1.000000e+00 : f32
    %333 = vector.broadcast %cst_208 : f32 to vector<8x128xf32>
    %334 = arith.addf %333, %332 : vector<8x128xf32>
    %335 = arith.divf %333, %334 : vector<8x128xf32>
    %336 = vector.extract_strided_slice %327 {offsets = [0, 128], sizes = [8, 128], strides = [1, 1]} : vector<8x256xf32> to vector<8x128xf32>
    %337 = arith.mulf %336, %321 : vector<8x128xf32>
    %338 = vector.extract_strided_slice %327 {offsets = [0, 0], sizes = [8, 128], strides = [1, 1]} : vector<8x256xf32> to vector<8x128xf32>
    %339 = arith.mulf %338, %329 : vector<8x128xf32>
    %340 = arith.addf %337, %339 : vector<8x128xf32>
    %341 = math.tanh %340 : vector<8x128xf32>
    %342 = arith.mulf %335, %341 : vector<8x128xf32>
    %c0_209 = arith.constant 0 : index
    %c0_210 = arith.constant 0 : index
    %343 = vector.load %arg11[%c0_209, %c0_210] : memref<8x128xf32, #tpu.memory_space<vmem>>, vector<8x128xf32>
    %344 = vector.extract_strided_slice %320 {offsets = [0, 0], sizes = [8, 256], strides = [1, 1]} : vector<8x512xf32> to vector<8x256xf32>
    %345 = arith.negf %344 : vector<8x256xf32>
    %346 = math.exp %345 : vector<8x256xf32>
    %cst_211 = arith.constant 1.000000e+00 : f32
    %347 = vector.broadcast %cst_211 : f32 to vector<8x256xf32>
    %348 = arith.addf %347, %346 : vector<8x256xf32>
    %349 = arith.divf %347, %348 : vector<8x256xf32>
    %350 = vector.extract_strided_slice %320 {offsets = [0, 256], sizes = [8, 128], strides = [1, 1]} : vector<8x512xf32> to vector<8x128xf32>
    %351 = math.tanh %350 : vector<8x128xf32>
    %352 = vector.extract_strided_slice %320 {offsets = [0, 384], sizes = [8, 128], strides = [1, 1]} : vector<8x512xf32> to vector<8x128xf32>
    %353 = arith.negf %352 : vector<8x128xf32>
    %354 = math.exp %353 : vector<8x128xf32>
    %cst_212 = arith.constant 1.000000e+00 : f32
    %355 = vector.broadcast %cst_212 : f32 to vector<8x128xf32>
    %356 = arith.addf %355, %354 : vector<8x128xf32>
    %357 = arith.divf %355, %356 : vector<8x128xf32>
    %358 = vector.extract_strided_slice %349 {offsets = [0, 128], sizes = [8, 128], strides = [1, 1]} : vector<8x256xf32> to vector<8x128xf32>
    %359 = arith.mulf %358, %343 : vector<8x128xf32>
    %360 = vector.extract_strided_slice %349 {offsets = [0, 0], sizes = [8, 128], strides = [1, 1]} : vector<8x256xf32> to vector<8x128xf32>
    %361 = arith.mulf %360, %351 : vector<8x128xf32>
    %362 = arith.addf %359, %361 : vector<8x128xf32>
    %363 = math.tanh %362 : vector<8x128xf32>
    %364 = arith.mulf %357, %363 : vector<8x128xf32>
    %c0_213 = arith.constant 0 : index
    %c0_214 = arith.constant 0 : index
    %365 = vector.load %arg7[%c0_213, %c0_214] : memref<8x128xf32, #tpu.memory_space<vmem>>, vector<8x128xf32>
    tpu.vector_store %arg7[%c0_213, %c0_214], %342 {strides = array<i32>} : memref<8x128xf32, #tpu.memory_space<vmem>>, vector<8x128xf32>,
    %c0_215 = arith.constant 0 : index
    %c0_216 = arith.constant 0 : index
    %366 = vector.load %arg8[%c0_215, %c0_216] : memref<8x128xf32, #tpu.memory_space<vmem>>, vector<8x128xf32>
    tpu.vector_store %arg8[%c0_215, %c0_216], %340 {strides = array<i32>} : memref<8x128xf32, #tpu.memory_space<vmem>>, vector<8x128xf32>,
    %367 = arith.addf %299, %342 : vector<8x128xf32>
    %c0_217 = arith.constant 0 : index
    %c0_218 = arith.constant 0 : index
    %368 = vector.load %arg9[%c0_217, %c0_218] : memref<8x128xf32, #tpu.memory_space<vmem>>, vector<8x128xf32>
    tpu.vector_store %arg9[%c0_217, %c0_218], %367 {strides = array<i32>} : memref<8x128xf32, #tpu.memory_space<vmem>>, vector<8x128xf32>,
    %c0_219 = arith.constant 0 : index
    %c0_220 = arith.constant 0 : index
    %369 = vector.load %arg10[%c0_219, %c0_220] : memref<8x128xf32, #tpu.memory_space<vmem>>, vector<8x128xf32>
    tpu.vector_store %arg10[%c0_219, %c0_220], %364 {strides = array<i32>} : memref<8x128xf32, #tpu.memory_space<vmem>>, vector<8x128xf32>,
    %c0_221 = arith.constant 0 : index
    %c0_222 = arith.constant 0 : index
    %370 = vector.load %arg11[%c0_221, %c0_222] : memref<8x128xf32, #tpu.memory_space<vmem>>, vector<8x128xf32>
    tpu.vector_store %arg11[%c0_221, %c0_222], %362 {strides = array<i32>} : memref<8x128xf32, #tpu.memory_space<vmem>>, vector<8x128xf32>,
    %371 = arith.addf %300, %364 : vector<8x128xf32>
    %c0_223 = arith.constant 0 : index
    %c0_224 = arith.constant 0 : index
    %372 = vector.load %arg12[%c0_223, %c0_224] : memref<8x128xf32, #tpu.memory_space<vmem>>, vector<8x128xf32>
    tpu.vector_store %arg12[%c0_223, %c0_224], %371 {strides = array<i32>} : memref<8x128xf32, #tpu.memory_space<vmem>>, vector<8x128xf32>,
    %c0_225 = arith.constant 0 : index
    %c0_226 = arith.constant 0 : index
    %373 = vector.load %arg9[%c0_225, %c0_226] : memref<8x128xf32, #tpu.memory_space<vmem>>, vector<8x128xf32>
    %c0_227 = arith.constant 0 : index
    %c0_228 = arith.constant 0 : index
    %374 = vector.load %arg12[%c0_227, %c0_228] : memref<8x128xf32, #tpu.memory_space<vmem>>, vector<8x128xf32>
    %c5 = arith.constant 5 : index
    %c0_229 = arith.constant 0 : index
    %c0_230 = arith.constant 0 : index
    %375 = vector.load %arg5[%c5, %c0_229, %c0_230] : memref<8x8x128xf32, #tpu.memory_space<vmem>>, vector<1x8x128xf32>
    %376 = vector.shape_cast %375 : vector<1x8x128xf32> to vector<8x128xf32>
    %377 = vector.shape_cast %373 : vector<8x128xf32> to vector<1x8x128xf32>
    tpu.vector_store %arg5[%c5, %c0_229, %c0_230], %377 {strides = array<i32>} : memref<8x8x128xf32, #tpu.memory_space<vmem>>, vector<1x8x128xf32>,
    %c5_231 = arith.constant 5 : index
    %c0_232 = arith.constant 0 : index
    %c0_233 = arith.constant 0 : index
    %378 = vector.load %arg6[%c5_231, %c0_232, %c0_233] : memref<8x8x128xf32, #tpu.memory_space<vmem>>, vector<1x8x128xf32>
    %379 = vector.shape_cast %378 : vector<1x8x128xf32> to vector<8x128xf32>
    %380 = vector.shape_cast %374 : vector<8x128xf32> to vector<1x8x128xf32>
    tpu.vector_store %arg6[%c5_231, %c0_232, %c0_233], %380 {strides = array<i32>} : memref<8x8x128xf32, #tpu.memory_space<vmem>>, vector<1x8x128xf32>,
    %c5_234 = arith.constant 5 : index
    %c0_235 = arith.constant 0 : index
    %c0_236 = arith.constant 0 : index
    %381 = vector.load %arg1[%c5_234, %c0_235, %c0_236] : memref<8x8x512xf32, #tpu.memory_space<vmem>>, vector<1x8x512xf32>
    %382 = vector.shape_cast %381 : vector<1x8x512xf32> to vector<8x512xf32>
    %c0_237 = arith.constant 0 : index
    %c0_238 = arith.constant 0 : index
    %383 = vector.load %arg7[%c0_237, %c0_238] : memref<8x128xf32, #tpu.memory_space<vmem>>, vector<8x128xf32>
    %384 = arith.truncf %383 : vector<8x128xf32> to vector<8x128xbf16>
    %c0_239 = arith.constant 0 : index
    %c0_240 = arith.constant 0 : index
    %385 = vector.load %arg3[%c0_239, %c0_240] : memref<128x512xbf16, #tpu.memory_space<vmem>>, vector<128x512xbf16>
    %cst_241 = arith.constant dense<0.000000e+00> : vector<8x512xf32>
    %386 = tpu.matmul %384, %385, %cst_241 {dimension_numbers = #tpu.dot_dimension_numbers<[1], [0], [0], [1], [0, 0, 1, 1], [], []>} : vector<8x128xbf16>, vector<128x512xbf16>, vector<8x512xf32> -> vector<8x512xf32>
    %387 = arith.addf %382, %386 : vector<8x512xf32>
    %c5_242 = arith.constant 5 : index
    %c0_243 = arith.constant 0 : index
    %c0_244 = arith.constant 0 : index
    %388 = vector.load %arg2[%c5_242, %c0_243, %c0_244] : memref<8x8x512xf32, #tpu.memory_space<vmem>>, vector<1x8x512xf32>
    %389 = vector.shape_cast %388 : vector<1x8x512xf32> to vector<8x512xf32>
    %c0_245 = arith.constant 0 : index
    %c0_246 = arith.constant 0 : index
    %390 = vector.load %arg10[%c0_245, %c0_246] : memref<8x128xf32, #tpu.memory_space<vmem>>, vector<8x128xf32>
    %391 = arith.truncf %390 : vector<8x128xf32> to vector<8x128xbf16>
    %c0_247 = arith.constant 0 : index
    %c0_248 = arith.constant 0 : index
    %392 = vector.load %arg4[%c0_247, %c0_248] : memref<128x512xbf16, #tpu.memory_space<vmem>>, vector<128x512xbf16>
    %cst_249 = arith.constant dense<0.000000e+00> : vector<8x512xf32>
    %393 = tpu.matmul %391, %392, %cst_249 {dimension_numbers = #tpu.dot_dimension_numbers<[1], [0], [0], [1], [0, 0, 1, 1], [], []>} : vector<8x128xbf16>, vector<128x512xbf16>, vector<8x512xf32> -> vector<8x512xf32>
    %394 = arith.addf %389, %393 : vector<8x512xf32>
    %c0_250 = arith.constant 0 : index
    %c0_251 = arith.constant 0 : index
    %395 = vector.load %arg8[%c0_250, %c0_251] : memref<8x128xf32, #tpu.memory_space<vmem>>, vector<8x128xf32>
    %396 = vector.extract_strided_slice %387 {offsets = [0, 0], sizes = [8, 256], strides = [1, 1]} : vector<8x512xf32> to vector<8x256xf32>
    %397 = arith.negf %396 : vector<8x256xf32>
    %398 = math.exp %397 : vector<8x256xf32>
    %cst_252 = arith.constant 1.000000e+00 : f32
    %399 = vector.broadcast %cst_252 : f32 to vector<8x256xf32>
    %400 = arith.addf %399, %398 : vector<8x256xf32>
    %401 = arith.divf %399, %400 : vector<8x256xf32>
    %402 = vector.extract_strided_slice %387 {offsets = [0, 256], sizes = [8, 128], strides = [1, 1]} : vector<8x512xf32> to vector<8x128xf32>
    %403 = math.tanh %402 : vector<8x128xf32>
    %404 = vector.extract_strided_slice %387 {offsets = [0, 384], sizes = [8, 128], strides = [1, 1]} : vector<8x512xf32> to vector<8x128xf32>
    %405 = arith.negf %404 : vector<8x128xf32>
    %406 = math.exp %405 : vector<8x128xf32>
    %cst_253 = arith.constant 1.000000e+00 : f32
    %407 = vector.broadcast %cst_253 : f32 to vector<8x128xf32>
    %408 = arith.addf %407, %406 : vector<8x128xf32>
    %409 = arith.divf %407, %408 : vector<8x128xf32>
    %410 = vector.extract_strided_slice %401 {offsets = [0, 128], sizes = [8, 128], strides = [1, 1]} : vector<8x256xf32> to vector<8x128xf32>
    %411 = arith.mulf %410, %395 : vector<8x128xf32>
    %412 = vector.extract_strided_slice %401 {offsets = [0, 0], sizes = [8, 128], strides = [1, 1]} : vector<8x256xf32> to vector<8x128xf32>
    %413 = arith.mulf %412, %403 : vector<8x128xf32>
    %414 = arith.addf %411, %413 : vector<8x128xf32>
    %415 = math.tanh %414 : vector<8x128xf32>
    %416 = arith.mulf %409, %415 : vector<8x128xf32>
    %c0_254 = arith.constant 0 : index
    %c0_255 = arith.constant 0 : index
    %417 = vector.load %arg11[%c0_254, %c0_255] : memref<8x128xf32, #tpu.memory_space<vmem>>, vector<8x128xf32>
    %418 = vector.extract_strided_slice %394 {offsets = [0, 0], sizes = [8, 256], strides = [1, 1]} : vector<8x512xf32> to vector<8x256xf32>
    %419 = arith.negf %418 : vector<8x256xf32>
    %420 = math.exp %419 : vector<8x256xf32>
    %cst_256 = arith.constant 1.000000e+00 : f32
    %421 = vector.broadcast %cst_256 : f32 to vector<8x256xf32>
    %422 = arith.addf %421, %420 : vector<8x256xf32>
    %423 = arith.divf %421, %422 : vector<8x256xf32>
    %424 = vector.extract_strided_slice %394 {offsets = [0, 256], sizes = [8, 128], strides = [1, 1]} : vector<8x512xf32> to vector<8x128xf32>
    %425 = math.tanh %424 : vector<8x128xf32>
    %426 = vector.extract_strided_slice %394 {offsets = [0, 384], sizes = [8, 128], strides = [1, 1]} : vector<8x512xf32> to vector<8x128xf32>
    %427 = arith.negf %426 : vector<8x128xf32>
    %428 = math.exp %427 : vector<8x128xf32>
    %cst_257 = arith.constant 1.000000e+00 : f32
    %429 = vector.broadcast %cst_257 : f32 to vector<8x128xf32>
    %430 = arith.addf %429, %428 : vector<8x128xf32>
    %431 = arith.divf %429, %430 : vector<8x128xf32>
    %432 = vector.extract_strided_slice %423 {offsets = [0, 128], sizes = [8, 128], strides = [1, 1]} : vector<8x256xf32> to vector<8x128xf32>
    %433 = arith.mulf %432, %417 : vector<8x128xf32>
    %434 = vector.extract_strided_slice %423 {offsets = [0, 0], sizes = [8, 128], strides = [1, 1]} : vector<8x256xf32> to vector<8x128xf32>
    %435 = arith.mulf %434, %425 : vector<8x128xf32>
    %436 = arith.addf %433, %435 : vector<8x128xf32>
    %437 = math.tanh %436 : vector<8x128xf32>
    %438 = arith.mulf %431, %437 : vector<8x128xf32>
    %c0_258 = arith.constant 0 : index
    %c0_259 = arith.constant 0 : index
    %439 = vector.load %arg7[%c0_258, %c0_259] : memref<8x128xf32, #tpu.memory_space<vmem>>, vector<8x128xf32>
    tpu.vector_store %arg7[%c0_258, %c0_259], %416 {strides = array<i32>} : memref<8x128xf32, #tpu.memory_space<vmem>>, vector<8x128xf32>,
    %c0_260 = arith.constant 0 : index
    %c0_261 = arith.constant 0 : index
    %440 = vector.load %arg8[%c0_260, %c0_261] : memref<8x128xf32, #tpu.memory_space<vmem>>, vector<8x128xf32>
    tpu.vector_store %arg8[%c0_260, %c0_261], %414 {strides = array<i32>} : memref<8x128xf32, #tpu.memory_space<vmem>>, vector<8x128xf32>,
    %441 = arith.addf %373, %416 : vector<8x128xf32>
    %c0_262 = arith.constant 0 : index
    %c0_263 = arith.constant 0 : index
    %442 = vector.load %arg9[%c0_262, %c0_263] : memref<8x128xf32, #tpu.memory_space<vmem>>, vector<8x128xf32>
    tpu.vector_store %arg9[%c0_262, %c0_263], %441 {strides = array<i32>} : memref<8x128xf32, #tpu.memory_space<vmem>>, vector<8x128xf32>,
    %c0_264 = arith.constant 0 : index
    %c0_265 = arith.constant 0 : index
    %443 = vector.load %arg10[%c0_264, %c0_265] : memref<8x128xf32, #tpu.memory_space<vmem>>, vector<8x128xf32>
    tpu.vector_store %arg10[%c0_264, %c0_265], %438 {strides = array<i32>} : memref<8x128xf32, #tpu.memory_space<vmem>>, vector<8x128xf32>,
    %c0_266 = arith.constant 0 : index
    %c0_267 = arith.constant 0 : index
    %444 = vector.load %arg11[%c0_266, %c0_267] : memref<8x128xf32, #tpu.memory_space<vmem>>, vector<8x128xf32>
    tpu.vector_store %arg11[%c0_266, %c0_267], %436 {strides = array<i32>} : memref<8x128xf32, #tpu.memory_space<vmem>>, vector<8x128xf32>,
    %445 = arith.addf %374, %438 : vector<8x128xf32>
    %c0_268 = arith.constant 0 : index
    %c0_269 = arith.constant 0 : index
    %446 = vector.load %arg12[%c0_268, %c0_269] : memref<8x128xf32, #tpu.memory_space<vmem>>, vector<8x128xf32>
    tpu.vector_store %arg12[%c0_268, %c0_269], %445 {strides = array<i32>} : memref<8x128xf32, #tpu.memory_space<vmem>>, vector<8x128xf32>,
    %c0_270 = arith.constant 0 : index
    %c0_271 = arith.constant 0 : index
    %447 = vector.load %arg9[%c0_270, %c0_271] : memref<8x128xf32, #tpu.memory_space<vmem>>, vector<8x128xf32>
    %c0_272 = arith.constant 0 : index
    %c0_273 = arith.constant 0 : index
    %448 = vector.load %arg12[%c0_272, %c0_273] : memref<8x128xf32, #tpu.memory_space<vmem>>, vector<8x128xf32>
    %c6 = arith.constant 6 : index
    %c0_274 = arith.constant 0 : index
    %c0_275 = arith.constant 0 : index
    %449 = vector.load %arg5[%c6, %c0_274, %c0_275] : memref<8x8x128xf32, #tpu.memory_space<vmem>>, vector<1x8x128xf32>
    %450 = vector.shape_cast %449 : vector<1x8x128xf32> to vector<8x128xf32>
    %451 = vector.shape_cast %447 : vector<8x128xf32> to vector<1x8x128xf32>
    tpu.vector_store %arg5[%c6, %c0_274, %c0_275], %451 {strides = array<i32>} : memref<8x8x128xf32, #tpu.memory_space<vmem>>, vector<1x8x128xf32>,
    %c6_276 = arith.constant 6 : index
    %c0_277 = arith.constant 0 : index
    %c0_278 = arith.constant 0 : index
    %452 = vector.load %arg6[%c6_276, %c0_277, %c0_278] : memref<8x8x128xf32, #tpu.memory_space<vmem>>, vector<1x8x128xf32>
    %453 = vector.shape_cast %452 : vector<1x8x128xf32> to vector<8x128xf32>
    %454 = vector.shape_cast %448 : vector<8x128xf32> to vector<1x8x128xf32>
    tpu.vector_store %arg6[%c6_276, %c0_277, %c0_278], %454 {strides = array<i32>} : memref<8x8x128xf32, #tpu.memory_space<vmem>>, vector<1x8x128xf32>,
    %c6_279 = arith.constant 6 : index
    %c0_280 = arith.constant 0 : index
    %c0_281 = arith.constant 0 : index
    %455 = vector.load %arg1[%c6_279, %c0_280, %c0_281] : memref<8x8x512xf32, #tpu.memory_space<vmem>>, vector<1x8x512xf32>
    %456 = vector.shape_cast %455 : vector<1x8x512xf32> to vector<8x512xf32>
    %c0_282 = arith.constant 0 : index
    %c0_283 = arith.constant 0 : index
    %457 = vector.load %arg7[%c0_282, %c0_283] : memref<8x128xf32, #tpu.memory_space<vmem>>, vector<8x128xf32>
    %458 = arith.truncf %457 : vector<8x128xf32> to vector<8x128xbf16>
    %c0_284 = arith.constant 0 : index
    %c0_285 = arith.constant 0 : index
    %459 = vector.load %arg3[%c0_284, %c0_285] : memref<128x512xbf16, #tpu.memory_space<vmem>>, vector<128x512xbf16>
    %cst_286 = arith.constant dense<0.000000e+00> : vector<8x512xf32>
    %460 = tpu.matmul %458, %459, %cst_286 {dimension_numbers = #tpu.dot_dimension_numbers<[1], [0], [0], [1], [0, 0, 1, 1], [], []>} : vector<8x128xbf16>, vector<128x512xbf16>, vector<8x512xf32> -> vector<8x512xf32>
    %461 = arith.addf %456, %460 : vector<8x512xf32>
    %c6_287 = arith.constant 6 : index
    %c0_288 = arith.constant 0 : index
    %c0_289 = arith.constant 0 : index
    %462 = vector.load %arg2[%c6_287, %c0_288, %c0_289] : memref<8x8x512xf32, #tpu.memory_space<vmem>>, vector<1x8x512xf32>
    %463 = vector.shape_cast %462 : vector<1x8x512xf32> to vector<8x512xf32>
    %c0_290 = arith.constant 0 : index
    %c0_291 = arith.constant 0 : index
    %464 = vector.load %arg10[%c0_290, %c0_291] : memref<8x128xf32, #tpu.memory_space<vmem>>, vector<8x128xf32>
    %465 = arith.truncf %464 : vector<8x128xf32> to vector<8x128xbf16>
    %c0_292 = arith.constant 0 : index
    %c0_293 = arith.constant 0 : index
    %466 = vector.load %arg4[%c0_292, %c0_293] : memref<128x512xbf16, #tpu.memory_space<vmem>>, vector<128x512xbf16>
    %cst_294 = arith.constant dense<0.000000e+00> : vector<8x512xf32>
    %467 = tpu.matmul %465, %466, %cst_294 {dimension_numbers = #tpu.dot_dimension_numbers<[1], [0], [0], [1], [0, 0, 1, 1], [], []>} : vector<8x128xbf16>, vector<128x512xbf16>, vector<8x512xf32> -> vector<8x512xf32>
    %468 = arith.addf %463, %467 : vector<8x512xf32>
    %c0_295 = arith.constant 0 : index
    %c0_296 = arith.constant 0 : index
    %469 = vector.load %arg8[%c0_295, %c0_296] : memref<8x128xf32, #tpu.memory_space<vmem>>, vector<8x128xf32>
    %470 = vector.extract_strided_slice %461 {offsets = [0, 0], sizes = [8, 256], strides = [1, 1]} : vector<8x512xf32> to vector<8x256xf32>
    %471 = arith.negf %470 : vector<8x256xf32>
    %472 = math.exp %471 : vector<8x256xf32>
    %cst_297 = arith.constant 1.000000e+00 : f32
    %473 = vector.broadcast %cst_297 : f32 to vector<8x256xf32>
    %474 = arith.addf %473, %472 : vector<8x256xf32>
    %475 = arith.divf %473, %474 : vector<8x256xf32>
    %476 = vector.extract_strided_slice %461 {offsets = [0, 256], sizes = [8, 128], strides = [1, 1]} : vector<8x512xf32> to vector<8x128xf32>
    %477 = math.tanh %476 : vector<8x128xf32>
    %478 = vector.extract_strided_slice %461 {offsets = [0, 384], sizes = [8, 128], strides = [1, 1]} : vector<8x512xf32> to vector<8x128xf32>
    %479 = arith.negf %478 : vector<8x128xf32>
    %480 = math.exp %479 : vector<8x128xf32>
    %cst_298 = arith.constant 1.000000e+00 : f32
    %481 = vector.broadcast %cst_298 : f32 to vector<8x128xf32>
    %482 = arith.addf %481, %480 : vector<8x128xf32>
    %483 = arith.divf %481, %482 : vector<8x128xf32>
    %484 = vector.extract_strided_slice %475 {offsets = [0, 128], sizes = [8, 128], strides = [1, 1]} : vector<8x256xf32> to vector<8x128xf32>
    %485 = arith.mulf %484, %469 : vector<8x128xf32>
    %486 = vector.extract_strided_slice %475 {offsets = [0, 0], sizes = [8, 128], strides = [1, 1]} : vector<8x256xf32> to vector<8x128xf32>
    %487 = arith.mulf %486, %477 : vector<8x128xf32>
    %488 = arith.addf %485, %487 : vector<8x128xf32>
    %489 = math.tanh %488 : vector<8x128xf32>
    %490 = arith.mulf %483, %489 : vector<8x128xf32>
    %c0_299 = arith.constant 0 : index
    %c0_300 = arith.constant 0 : index
    %491 = vector.load %arg11[%c0_299, %c0_300] : memref<8x128xf32, #tpu.memory_space<vmem>>, vector<8x128xf32>
    %492 = vector.extract_strided_slice %468 {offsets = [0, 0], sizes = [8, 256], strides = [1, 1]} : vector<8x512xf32> to vector<8x256xf32>
    %493 = arith.negf %492 : vector<8x256xf32>
    %494 = math.exp %493 : vector<8x256xf32>
    %cst_301 = arith.constant 1.000000e+00 : f32
    %495 = vector.broadcast %cst_301 : f32 to vector<8x256xf32>
    %496 = arith.addf %495, %494 : vector<8x256xf32>
    %497 = arith.divf %495, %496 : vector<8x256xf32>
    %498 = vector.extract_strided_slice %468 {offsets = [0, 256], sizes = [8, 128], strides = [1, 1]} : vector<8x512xf32> to vector<8x128xf32>
    %499 = math.tanh %498 : vector<8x128xf32>
    %500 = vector.extract_strided_slice %468 {offsets = [0, 384], sizes = [8, 128], strides = [1, 1]} : vector<8x512xf32> to vector<8x128xf32>
    %501 = arith.negf %500 : vector<8x128xf32>
    %502 = math.exp %501 : vector<8x128xf32>
    %cst_302 = arith.constant 1.000000e+00 : f32
    %503 = vector.broadcast %cst_302 : f32 to vector<8x128xf32>
    %504 = arith.addf %503, %502 : vector<8x128xf32>
    %505 = arith.divf %503, %504 : vector<8x128xf32>
    %506 = vector.extract_strided_slice %497 {offsets = [0, 128], sizes = [8, 128], strides = [1, 1]} : vector<8x256xf32> to vector<8x128xf32>
    %507 = arith.mulf %506, %491 : vector<8x128xf32>
    %508 = vector.extract_strided_slice %497 {offsets = [0, 0], sizes = [8, 128], strides = [1, 1]} : vector<8x256xf32> to vector<8x128xf32>
    %509 = arith.mulf %508, %499 : vector<8x128xf32>
    %510 = arith.addf %507, %509 : vector<8x128xf32>
    %511 = math.tanh %510 : vector<8x128xf32>
    %512 = arith.mulf %505, %511 : vector<8x128xf32>
    %c0_303 = arith.constant 0 : index
    %c0_304 = arith.constant 0 : index
    %513 = vector.load %arg7[%c0_303, %c0_304] : memref<8x128xf32, #tpu.memory_space<vmem>>, vector<8x128xf32>
    tpu.vector_store %arg7[%c0_303, %c0_304], %490 {strides = array<i32>} : memref<8x128xf32, #tpu.memory_space<vmem>>, vector<8x128xf32>,
    %c0_305 = arith.constant 0 : index
    %c0_306 = arith.constant 0 : index
    %514 = vector.load %arg8[%c0_305, %c0_306] : memref<8x128xf32, #tpu.memory_space<vmem>>, vector<8x128xf32>
    tpu.vector_store %arg8[%c0_305, %c0_306], %488 {strides = array<i32>} : memref<8x128xf32, #tpu.memory_space<vmem>>, vector<8x128xf32>,
    %515 = arith.addf %447, %490 : vector<8x128xf32>
    %c0_307 = arith.constant 0 : index
    %c0_308 = arith.constant 0 : index
    %516 = vector.load %arg9[%c0_307, %c0_308] : memref<8x128xf32, #tpu.memory_space<vmem>>, vector<8x128xf32>
    tpu.vector_store %arg9[%c0_307, %c0_308], %515 {strides = array<i32>} : memref<8x128xf32, #tpu.memory_space<vmem>>, vector<8x128xf32>,
    %c0_309 = arith.constant 0 : index
    %c0_310 = arith.constant 0 : index
    %517 = vector.load %arg10[%c0_309, %c0_310] : memref<8x128xf32, #tpu.memory_space<vmem>>, vector<8x128xf32>
    tpu.vector_store %arg10[%c0_309, %c0_310], %512 {strides = array<i32>} : memref<8x128xf32, #tpu.memory_space<vmem>>, vector<8x128xf32>,
    %c0_311 = arith.constant 0 : index
    %c0_312 = arith.constant 0 : index
    %518 = vector.load %arg11[%c0_311, %c0_312] : memref<8x128xf32, #tpu.memory_space<vmem>>, vector<8x128xf32>
    tpu.vector_store %arg11[%c0_311, %c0_312], %510 {strides = array<i32>} : memref<8x128xf32, #tpu.memory_space<vmem>>, vector<8x128xf32>,
    %519 = arith.addf %448, %512 : vector<8x128xf32>
    %c0_313 = arith.constant 0 : index
    %c0_314 = arith.constant 0 : index
    %520 = vector.load %arg12[%c0_313, %c0_314] : memref<8x128xf32, #tpu.memory_space<vmem>>, vector<8x128xf32>
    tpu.vector_store %arg12[%c0_313, %c0_314], %519 {strides = array<i32>} : memref<8x128xf32, #tpu.memory_space<vmem>>, vector<8x128xf32>,
    %c0_315 = arith.constant 0 : index
    %c0_316 = arith.constant 0 : index
    %521 = vector.load %arg9[%c0_315, %c0_316] : memref<8x128xf32, #tpu.memory_space<vmem>>, vector<8x128xf32>
    %c0_317 = arith.constant 0 : index
    %c0_318 = arith.constant 0 : index
    %522 = vector.load %arg12[%c0_317, %c0_318] : memref<8x128xf32, #tpu.memory_space<vmem>>, vector<8x128xf32>
    %c7 = arith.constant 7 : index
    %c0_319 = arith.constant 0 : index
    %c0_320 = arith.constant 0 : index
    %523 = vector.load %arg5[%c7, %c0_319, %c0_320] : memref<8x8x128xf32, #tpu.memory_space<vmem>>, vector<1x8x128xf32>
    %524 = vector.shape_cast %523 : vector<1x8x128xf32> to vector<8x128xf32>
    %525 = vector.shape_cast %521 : vector<8x128xf32> to vector<1x8x128xf32>
    tpu.vector_store %arg5[%c7, %c0_319, %c0_320], %525 {strides = array<i32>} : memref<8x8x128xf32, #tpu.memory_space<vmem>>, vector<1x8x128xf32>,
    %c7_321 = arith.constant 7 : index
    %c0_322 = arith.constant 0 : index
    %c0_323 = arith.constant 0 : index
    %526 = vector.load %arg6[%c7_321, %c0_322, %c0_323] : memref<8x8x128xf32, #tpu.memory_space<vmem>>, vector<1x8x128xf32>
    %527 = vector.shape_cast %526 : vector<1x8x128xf32> to vector<8x128xf32>
    %528 = vector.shape_cast %522 : vector<8x128xf32> to vector<1x8x128xf32>
    tpu.vector_store %arg6[%c7_321, %c0_322, %c0_323], %528 {strides = array<i32>} : memref<8x8x128xf32, #tpu.memory_space<vmem>>, vector<1x8x128xf32>,
    %c7_324 = arith.constant 7 : index
    %c0_325 = arith.constant 0 : index
    %c0_326 = arith.constant 0 : index
    %529 = vector.load %arg1[%c7_324, %c0_325, %c0_326] : memref<8x8x512xf32, #tpu.memory_space<vmem>>, vector<1x8x512xf32>
    %530 = vector.shape_cast %529 : vector<1x8x512xf32> to vector<8x512xf32>
    %c0_327 = arith.constant 0 : index
    %c0_328 = arith.constant 0 : index
    %531 = vector.load %arg7[%c0_327, %c0_328] : memref<8x128xf32, #tpu.memory_space<vmem>>, vector<8x128xf32>
    %532 = arith.truncf %531 : vector<8x128xf32> to vector<8x128xbf16>
    %c0_329 = arith.constant 0 : index
    %c0_330 = arith.constant 0 : index
    %533 = vector.load %arg3[%c0_329, %c0_330] : memref<128x512xbf16, #tpu.memory_space<vmem>>, vector<128x512xbf16>
    %cst_331 = arith.constant dense<0.000000e+00> : vector<8x512xf32>
    %534 = tpu.matmul %532, %533, %cst_331 {dimension_numbers = #tpu.dot_dimension_numbers<[1], [0], [0], [1], [0, 0, 1, 1], [], []>} : vector<8x128xbf16>, vector<128x512xbf16>, vector<8x512xf32> -> vector<8x512xf32>
    %535 = arith.addf %530, %534 : vector<8x512xf32>
    %c7_332 = arith.constant 7 : index
    %c0_333 = arith.constant 0 : index
    %c0_334 = arith.constant 0 : index
    %536 = vector.load %arg2[%c7_332, %c0_333, %c0_334] : memref<8x8x512xf32, #tpu.memory_space<vmem>>, vector<1x8x512xf32>
    %537 = vector.shape_cast %536 : vector<1x8x512xf32> to vector<8x512xf32>
    %c0_335 = arith.constant 0 : index
    %c0_336 = arith.constant 0 : index
    %538 = vector.load %arg10[%c0_335, %c0_336] : memref<8x128xf32, #tpu.memory_space<vmem>>, vector<8x128xf32>
    %539 = arith.truncf %538 : vector<8x128xf32> to vector<8x128xbf16>
    %c0_337 = arith.constant 0 : index
    %c0_338 = arith.constant 0 : index
    %540 = vector.load %arg4[%c0_337, %c0_338] : memref<128x512xbf16, #tpu.memory_space<vmem>>, vector<128x512xbf16>
    %cst_339 = arith.constant dense<0.000000e+00> : vector<8x512xf32>
    %541 = tpu.matmul %539, %540, %cst_339 {dimension_numbers = #tpu.dot_dimension_numbers<[1], [0], [0], [1], [0, 0, 1, 1], [], []>} : vector<8x128xbf16>, vector<128x512xbf16>, vector<8x512xf32> -> vector<8x512xf32>
    %542 = arith.addf %537, %541 : vector<8x512xf32>
    %c0_340 = arith.constant 0 : index
    %c0_341 = arith.constant 0 : index
    %543 = vector.load %arg8[%c0_340, %c0_341] : memref<8x128xf32, #tpu.memory_space<vmem>>, vector<8x128xf32>
    %544 = vector.extract_strided_slice %535 {offsets = [0, 0], sizes = [8, 256], strides = [1, 1]} : vector<8x512xf32> to vector<8x256xf32>
    %545 = arith.negf %544 : vector<8x256xf32>
    %546 = math.exp %545 : vector<8x256xf32>
    %cst_342 = arith.constant 1.000000e+00 : f32
    %547 = vector.broadcast %cst_342 : f32 to vector<8x256xf32>
    %548 = arith.addf %547, %546 : vector<8x256xf32>
    %549 = arith.divf %547, %548 : vector<8x256xf32>
    %550 = vector.extract_strided_slice %535 {offsets = [0, 256], sizes = [8, 128], strides = [1, 1]} : vector<8x512xf32> to vector<8x128xf32>
    %551 = math.tanh %550 : vector<8x128xf32>
    %552 = vector.extract_strided_slice %535 {offsets = [0, 384], sizes = [8, 128], strides = [1, 1]} : vector<8x512xf32> to vector<8x128xf32>
    %553 = arith.negf %552 : vector<8x128xf32>
    %554 = math.exp %553 : vector<8x128xf32>
    %cst_343 = arith.constant 1.000000e+00 : f32
    %555 = vector.broadcast %cst_343 : f32 to vector<8x128xf32>
    %556 = arith.addf %555, %554 : vector<8x128xf32>
    %557 = arith.divf %555, %556 : vector<8x128xf32>
    %558 = vector.extract_strided_slice %549 {offsets = [0, 128], sizes = [8, 128], strides = [1, 1]} : vector<8x256xf32> to vector<8x128xf32>
    %559 = arith.mulf %558, %543 : vector<8x128xf32>
    %560 = vector.extract_strided_slice %549 {offsets = [0, 0], sizes = [8, 128], strides = [1, 1]} : vector<8x256xf32> to vector<8x128xf32>
    %561 = arith.mulf %560, %551 : vector<8x128xf32>
    %562 = arith.addf %559, %561 : vector<8x128xf32>
    %563 = math.tanh %562 : vector<8x128xf32>
    %564 = arith.mulf %557, %563 : vector<8x128xf32>
    %c0_344 = arith.constant 0 : index
    %c0_345 = arith.constant 0 : index
    %565 = vector.load %arg11[%c0_344, %c0_345] : memref<8x128xf32, #tpu.memory_space<vmem>>, vector<8x128xf32>
    %566 = vector.extract_strided_slice %542 {offsets = [0, 0], sizes = [8, 256], strides = [1, 1]} : vector<8x512xf32> to vector<8x256xf32>
    %567 = arith.negf %566 : vector<8x256xf32>
    %568 = math.exp %567 : vector<8x256xf32>
    %cst_346 = arith.constant 1.000000e+00 : f32
    %569 = vector.broadcast %cst_346 : f32 to vector<8x256xf32>
    %570 = arith.addf %569, %568 : vector<8x256xf32>
    %571 = arith.divf %569, %570 : vector<8x256xf32>
    %572 = vector.extract_strided_slice %542 {offsets = [0, 256], sizes = [8, 128], strides = [1, 1]} : vector<8x512xf32> to vector<8x128xf32>
    %573 = math.tanh %572 : vector<8x128xf32>
    %574 = vector.extract_strided_slice %542 {offsets = [0, 384], sizes = [8, 128], strides = [1, 1]} : vector<8x512xf32> to vector<8x128xf32>
    %575 = arith.negf %574 : vector<8x128xf32>
    %576 = math.exp %575 : vector<8x128xf32>
    %cst_347 = arith.constant 1.000000e+00 : f32
    %577 = vector.broadcast %cst_347 : f32 to vector<8x128xf32>
    %578 = arith.addf %577, %576 : vector<8x128xf32>
    %579 = arith.divf %577, %578 : vector<8x128xf32>
    %580 = vector.extract_strided_slice %571 {offsets = [0, 128], sizes = [8, 128], strides = [1, 1]} : vector<8x256xf32> to vector<8x128xf32>
    %581 = arith.mulf %580, %565 : vector<8x128xf32>
    %582 = vector.extract_strided_slice %571 {offsets = [0, 0], sizes = [8, 128], strides = [1, 1]} : vector<8x256xf32> to vector<8x128xf32>
    %583 = arith.mulf %582, %573 : vector<8x128xf32>
    %584 = arith.addf %581, %583 : vector<8x128xf32>
    %585 = math.tanh %584 : vector<8x128xf32>
    %586 = arith.mulf %579, %585 : vector<8x128xf32>
    %c0_348 = arith.constant 0 : index
    %c0_349 = arith.constant 0 : index
    %587 = vector.load %arg7[%c0_348, %c0_349] : memref<8x128xf32, #tpu.memory_space<vmem>>, vector<8x128xf32>
    tpu.vector_store %arg7[%c0_348, %c0_349], %564 {strides = array<i32>} : memref<8x128xf32, #tpu.memory_space<vmem>>, vector<8x128xf32>,
    %c0_350 = arith.constant 0 : index
    %c0_351 = arith.constant 0 : index
    %588 = vector.load %arg8[%c0_350, %c0_351] : memref<8x128xf32, #tpu.memory_space<vmem>>, vector<8x128xf32>
    tpu.vector_store %arg8[%c0_350, %c0_351], %562 {strides = array<i32>} : memref<8x128xf32, #tpu.memory_space<vmem>>, vector<8x128xf32>,
    %589 = arith.addf %521, %564 : vector<8x128xf32>
    %c0_352 = arith.constant 0 : index
    %c0_353 = arith.constant 0 : index
    %590 = vector.load %arg9[%c0_352, %c0_353] : memref<8x128xf32, #tpu.memory_space<vmem>>, vector<8x128xf32>
    tpu.vector_store %arg9[%c0_352, %c0_353], %589 {strides = array<i32>} : memref<8x128xf32, #tpu.memory_space<vmem>>, vector<8x128xf32>,
    %c0_354 = arith.constant 0 : index
    %c0_355 = arith.constant 0 : index
    %591 = vector.load %arg10[%c0_354, %c0_355] : memref<8x128xf32, #tpu.memory_space<vmem>>, vector<8x128xf32>
    tpu.vector_store %arg10[%c0_354, %c0_355], %586 {strides = array<i32>} : memref<8x128xf32, #tpu.memory_space<vmem>>, vector<8x128xf32>,
    %c0_356 = arith.constant 0 : index
    %c0_357 = arith.constant 0 : index
    %592 = vector.load %arg11[%c0_356, %c0_357] : memref<8x128xf32, #tpu.memory_space<vmem>>, vector<8x128xf32>
    tpu.vector_store %arg11[%c0_356, %c0_357], %584 {strides = array<i32>} : memref<8x128xf32, #tpu.memory_space<vmem>>, vector<8x128xf32>,
    %593 = arith.addf %522, %586 : vector<8x128xf32>
    %c0_358 = arith.constant 0 : index
    %c0_359 = arith.constant 0 : index
    %594 = vector.load %arg12[%c0_358, %c0_359] : memref<8x128xf32, #tpu.memory_space<vmem>>, vector<8x128xf32>
    tpu.vector_store %arg12[%c0_358, %c0_359], %593 {strides = array<i32>} : memref<8x128xf32, #tpu.memory_space<vmem>>, vector<8x128xf32>,
    return
  }
  func.func @transform_0(%arg0: i32) -> (i32, i32, i32) {
    %c0_i32 = arith.constant 0 : i32
    %c0_i32_0 = arith.constant 0 : i32
    %c0_i32_1 = arith.constant 0 : i32
    return %arg0, %c0_i32, %c0_i32_0 : i32, i32, i32
  }
  func.func @transform_1(%arg0: i32) -> (i32, i32, i32) {
    %c0_i32 = arith.constant 0 : i32
    %c0_i32_0 = arith.constant 0 : i32
    %c0_i32_1 = arith.constant 0 : i32
    return %arg0, %c0_i32, %c0_i32_0 : i32, i32, i32
  }
  func.func @transform_2(%arg0: i32) -> (i32, i32) {
    %c0_i32 = arith.constant 0 : i32
    %c0_i32_0 = arith.constant 0 : i32
    %c0_i32_1 = arith.constant 0 : i32
    return %c0_i32, %c0_i32_0 : i32, i32
  }
  func.func @transform_3(%arg0: i32) -> (i32, i32) {
    %c0_i32 = arith.constant 0 : i32
    %c0_i32_0 = arith.constant 0 : i32
    %c0_i32_1 = arith.constant 0 : i32
    return %c0_i32, %c0_i32_0 : i32, i32
  }
  func.func @transform_4(%arg0: i32) -> (i32, i32, i32) {
    %c0_i32 = arith.constant 0 : i32
    %c0_i32_0 = arith.constant 0 : i32
    %c0_i32_1 = arith.constant 0 : i32
    return %arg0, %c0_i32, %c0_i32_0 : i32, i32, i32
  }
  func.func @transform_5(%arg0: i32) -> (i32, i32, i32) {
    %c0_i32 = arith.constant 0 : i32
    %c0_i32_0 = arith.constant 0 : i32
    %c0_i32_1 = arith.constant 0 : i32
    return %arg0, %c0_i32, %c0_i32_0 : i32, i32, i32
  }
}

</mosaic_0001>

<bundles_post_ra>
// kernel: lstmhidden_pallas.1
= control target key start
LH: loop header
LB: loop body
LE: loop exit
PB: predicated region body
PF: predicated region fallthrough
CT: control target
= control target key end

     0   :  { %v8551_v2 = vmov 0   ;;  %v8553_v37 = vmov 0.0|0.0   ;;  %s8545_s0 = inlined_call_operand.vmem [shape: f32[8,8,512], index: 0, kind: input, shape index: {}]   ;;  %s8546_s1 = inlined_call_operand.vmem [shape: f32[8,8,512], index: 1, kind: input, shape index: {}]   ;;  %s8547_s2 = inlined_call_operand.vmem [shape: bf16[128,512], index: 2, kind: input, shape index: {}]   ;;  %s8548_s3 = inlined_call_operand.vmem [shape: bf16[128,512], index: 3, kind: input, shape index: {}]   ;;  %s8549_s4 = inlined_call_operand.vmem [shape: f32[8,8,128], index: 4, kind: output, shape index: {0}]   ;;  %s8550_s5 = inlined_call_operand.hbm [shape: f32[8,8,128], index: 5, kind: output, shape index: {1}]  }
   0x1   :  { %v6428_v0 = vld [vmem:[%s8547_s2 + $0x4] ss:$16 sps:$4 sm:$0xff]   ;;  %v6433_v1 = vld [vmem:[%s8547_s2] ss:$16 sps:$4 sm:$0xff]   ;;  %265 = vmatprep.mubr.bf16.mxu0 %v8551_v2  ;;  %306 = vmatprep.mubr.bf16.mxu1 %v8551_v2  ;;  %v6458_v6 = vld [vmem:[%s8547_s2 + $0xc] ss:$16 sps:$4 sm:$0xff]  }
   0x2   :  { %233 = vmatprep.subr.bf16.mxu0 %v6428_v0  ;;  %v6441_v3 = vld [vmem:[%s8547_s2 + $0x24] ss:$16 sps:$4 sm:$0xff]   ;;  %v6447_v4 = vld [vmem:[%s8547_s2 + $0x20] ss:$16 sps:$4 sm:$0xff]   ;;  %v6463_v7 = vld [vmem:[%s8547_s2 + $0x8] ss:$16 sps:$4 sm:$0xff]   ;;  %274 = vmatprep.subr.bf16.mxu1 %v6458_v6 }
   0x3   :  { %234 = vmatpush1.bf16.msra.mxu0 %v6433_v1  ;;  %v6453_v5 = vld [vmem:[%s8547_s2 + $0x44] ss:$16 sps:$4 sm:$0xff]   ;;  %v6469_v8 = vld [vmem:[%s8547_s2 + $0x40] ss:$16 sps:$4 sm:$0xff]   ;;  %275 = vmatpush1.bf16.msra.mxu1 %v6463_v7  ;;  %v6482_v10 = vld [vmem:[%s8547_s2 + $0x2c] ss:$16 sps:$4 sm:$0xff]  }
   0x4   :  { %235 = vmatprep.subr.bf16.mxu0 %v6441_v3  ;;  %v6476_v9 = vld [vmem:[%s8547_s2 + $0x64] ss:$16 sps:$4 sm:$0xff]   ;;  %v6487_v11 = vld [vmem:[%s8547_s2 + $0x28] ss:$16 sps:$4 sm:$0xff]   ;;  %276 = vmatprep.subr.bf16.mxu1 %v6482_v10  ;;  %v6494_v12 = vld [vmem:[%s8547_s2 + $0x60] ss:$16 sps:$4 sm:$0xff]  }
   0x5   :  { %v6499_v13 = vld [vmem:[%s8547_s2 + $0x84] ss:$16 sps:$4 sm:$0xff]   ;;  %v6504_v14 = vld [vmem:[%s8547_s2 + $0x4c] ss:$16 sps:$4 sm:$0xff]   ;;  %v6511_v15 = vld [vmem:[%s8547_s2 + $0x48] ss:$16 sps:$4 sm:$0xff]  }
   0x6   :  { %v6517_v16 = vld [vmem:[%s8547_s2 + $0x6c] ss:$16 sps:$4 sm:$0xff]   ;;  %v6523_v17 = vld [vmem:[%s8547_s2 + $0x80] ss:$16 sps:$4 sm:$0xff]   ;;  %v6529_v18 = vld [vmem:[%s8547_s2 + $0xa4] ss:$16 sps:$4 sm:$0xff]  }
   0x7   :  { %236 = vmatpush1.bf16.msra.mxu0 %v6447_v4  ;;  %277 = vmatpush1.bf16.msra.mxu1 %v6487_v11  ;;  %v6535_v19 = vld [vmem:[%s8547_s2 + $0x68] ss:$16 sps:$4 sm:$0xff]   ;;  %v6541_v20 = vld [vmem:[%s8547_s2 + $0x8c] ss:$16 sps:$4 sm:$0xff]   ;;  %v6547_v21 = vld [vmem:[%s8547_s2 + $0xa0] ss:$16 sps:$4 sm:$0xff]  }
   0x8   :  { %237 = vmatprep.subr.bf16.mxu0 %v6453_v5  ;;  %278 = vmatprep.subr.bf16.mxu1 %v6504_v14  ;;  %v6552_v22 = vld [vmem:[%s8547_s2 + $0xc4] ss:$16 sps:$4 sm:$0xff]   ;;  %v6559_v23 = vld [vmem:[%s8547_s2 + $0x88] ss:$16 sps:$4 sm:$0xff]   ;;  %v6565_v24 = vld [vmem:[%s8547_s2 + $0xac] ss:$16 sps:$4 sm:$0xff]  }
   0x9   :  { %v6571_v25 = vld [vmem:[%s8547_s2 + $0xc0] ss:$16 sps:$4 sm:$0xff]   ;;  %v6577_v26 = vld [vmem:[%s8547_s2 + $0xe4] ss:$16 sps:$4 sm:$0xff]   ;;  %v6583_v27 = vld [vmem:[%s8547_s2 + $0xa8] ss:$16 sps:$4 sm:$0xff]  }
   0xa   :  { %v6589_v28 = vld [vmem:[%s8547_s2 + $0xcc] ss:$16 sps:$4 sm:$0xff]   ;;  %v6595_v29 = vld [vmem:[%s8547_s2 + $0xe0] ss:$16 sps:$4 sm:$0xff]   ;;  %v6600_v30 = vld [vmem:[%s8548_s3 + $0x4] ss:$16 sps:$4 sm:$0xff]  }
   0xb   :  { %238 = vmatpush1.bf16.msra.mxu0 %v6469_v8  ;;  %279 = vmatpush1.bf16.msra.mxu1 %v6511_v15  ;;  %v6607_v31 = vld [vmem:[%s8547_s2 + $0xc8] ss:$16 sps:$4 sm:$0xff]   ;;  %v6613_v32 = vld [vmem:[%s8547_s2 + $0xec] ss:$16 sps:$4 sm:$0xff]   ;;  %v6619_v33 = vld [vmem:[%s8548_s3] ss:$16 sps:$4 sm:$0xff]  }
   0xc   :  { %239 = vmatprep.subr.bf16.mxu0 %v6476_v9  ;;  %280 = vmatprep.subr.bf16.mxu1 %v6517_v16  ;;  %v6624_v34 = vld [vmem:[%s8548_s3 + $0x24] ss:$16 sps:$4 sm:$0xff]   ;;  %v6631_v35 = vld [vmem:[%s8547_s2 + $0xe8] ss:$16 sps:$4 sm:$0xff]   ;;  %v6637_v36 = vld [vmem:[%s8548_s3 + $0xc] ss:$16 sps:$4 sm:$0xff]  }
   0xd   :  { %v6644_v38 = vld [vmem:[%s8548_s3 + $0x20] ss:$16 sps:$4 sm:$0xff]   ;;  %v6649_v39 = vld [vmem:[%s8548_s3 + $0x44] ss:$16 sps:$4 sm:$0xff]   ;;  %v6657_v40 = vld [vmem:[%s8548_s3 + $0x8] ss:$16 sps:$4 sm:$0xff]  }
   0xe   :  { %v6663_v41 = vld [vmem:[%s8548_s3 + $0x2c] ss:$16 sps:$4 sm:$0xff]   ;;  %v6669_v42 = vld [vmem:[%s8548_s3 + $0x40] ss:$16 sps:$4 sm:$0xff]   ;;  %v6674_v43 = vld [vmem:[%s8548_s3 + $0x64] ss:$16 sps:$4 sm:$0xff]  }
   0xf   :  { %240 = vmatpush1.bf16.msra.mxu0 %v6494_v12  ;;  %281 = vmatpush1.bf16.msra.mxu1 %v6535_v19  ;;  %v6682_v44 = vld [vmem:[%s8548_s3 + $0x28] ss:$16 sps:$4 sm:$0xff]   ;;  %v6688_v45 = vld [vmem:[%s8548_s3 + $0x4c] ss:$16 sps:$4 sm:$0xff]   ;;  %v6694_v46 = vld [vmem:[%s8548_s3 + $0x60] ss:$16 sps:$4 sm:$0xff]  }
  0x10   :  { %241 = vmatprep.subr.bf16.mxu0 %v6499_v13  ;;  %282 = vmatprep.subr.bf16.mxu1 %v6541_v20  ;;  %v6699_v47 = vld [vmem:[%s8548_s3 + $0x84] ss:$16 sps:$4 sm:$0xff]   ;;  %v6704_v48 = vld [vmem:[%s8548_s3 + $0x48] ss:$16 sps:$4 sm:$0xff]   ;;  %v6710_v49 = vld [vmem:[%s8548_s3 + $0x6c] ss:$16 sps:$4 sm:$0xff]  }
  0x11   :  { %v6717_v50 = vld [vmem:[%s8548_s3 + $0x80] ss:$16 sps:$4 sm:$0xff]   ;;  %v6723_v51 = vld [vmem:[%s8548_s3 + $0xa4] ss:$16 sps:$4 sm:$0xff]   ;;  %v6728_v52 = vld [vmem:[%s8548_s3 + $0x68] ss:$16 sps:$4 sm:$0xff]  }
  0x12   :  { %v6734_v53 = vld [vmem:[%s8548_s3 + $0x8c] ss:$16 sps:$4 sm:$0xff]   ;;  %v6741_v54 = vld [vmem:[%s8548_s3 + $0xa0] ss:$16 sps:$4 sm:$0xff]   ;;  %v6747_v55 = vld [vmem:[%s8548_s3 + $0xc4] ss:$16 sps:$4 sm:$0xff]  }
  0x13   :  { %242 = vmatpush1.bf16.msra.mxu0 %v6523_v17  ;;  %283 = vmatpush1.bf16.msra.mxu1 %v6559_v23  ;;  %v6752_v56 = vld [vmem:[%s8548_s3 + $0x88] ss:$16 sps:$4 sm:$0xff]   ;;  %v6758_v57 = vld [vmem:[%s8548_s3 + $0xac] ss:$16 sps:$4 sm:$0xff]   ;;  %v6765_v58 = vld [vmem:[%s8548_s3 + $0xc0] ss:$16 sps:$4 sm:$0xff]  }
  0x14   :  { %243 = vmatprep.subr.bf16.mxu0 %v6529_v18  ;;  %284 = vmatprep.subr.bf16.mxu1 %v6565_v24  ;;  %8562 = vst [vmem:[#allocation11_spill] sm:$0xff] %v6765_v58  ;;  %v6771_v59 = vld [vmem:[%s8548_s3 + $0xe4] ss:$16 sps:$4 sm:$0xff]   ;;  %v6776_v60 = vld [vmem:[%s8548_s3 + $0xa8] ss:$16 sps:$4 sm:$0xff]  }
  0x15   :  { %8563 = vst [vmem:[#allocation12_spill] sm:$0xff] %v6771_v59  ;;  %v6782_v61 = vld [vmem:[%s8548_s3 + $0xcc] ss:$16 sps:$4 sm:$0xff]   ;;  %v6789_v62 = vld [vmem:[%s8548_s3 + $0xe0] ss:$16 sps:$4 sm:$0xff]  }
  0x16   :  { %v6795_v63 = vld [vmem:[%s8548_s3 + $0xc8] ss:$16 sps:$4 sm:$0xff]  }
  0x17   :  { %244 = vmatpush1.bf16.msra.mxu0 %v6547_v21  ;;  %285 = vmatpush1.bf16.msra.mxu1 %v6583_v27 }
  0x18   :  { %245 = vmatprep.subr.bf16.mxu0 %v6552_v22  ;;  %286 = vmatprep.subr.bf16.mxu1 %v6589_v28 }
  0x1b   :  { %246 = vmatpush1.bf16.msra.mxu0 %v6571_v25  ;;  %287 = vmatpush1.bf16.msra.mxu1 %v6607_v31 }
  0x1c   :  { %247 = vmatprep.subr.bf16.mxu0 %v6577_v26  ;;  %288 = vmatprep.subr.bf16.mxu1 %v6613_v32 }
  0x1f   :  { %248 = vmatpush1.bf16.msra.mxu0 %v6595_v29  ;;  %289 = vmatpush1.bf16.msra.mxu1 %v6631_v35 }
  0x20   :  { %517 = vmatprep.subr.bf16.mxu0 %v6600_v30  ;;  %558 = vmatprep.subr.bf16.mxu1 %v6637_v36 }
  0x22   :  { %266 = vmatmul.mubr.bf16.vlgmr.msra.gmra.mrb[0].mxu0 %v8553_v37  ;;  %307 = vmatmul.mubr.bf16.vlgmr.msra.gmra.mrb[0].mxu1 %v8553_v37  ;;  %v6809_v37 = vld [vmem:[%s8548_s3 + $0xe8] ss:$16 sps:$4 sm:$0xff]  }
  0x23   :  { %518 = vmatpush1.bf16.msra.mxu0 %v6619_v33  ;;  %549 = vmatprep.mubr.bf16.mxu0 %v8551_v2 }
  0x24   :  { %519 = vmatprep.subr.bf16.mxu0 %v6624_v34  ;;  %559 = vmatpush1.bf16.msra.mxu1 %v6657_v40 }
  0x25   :  { %560 = vmatprep.subr.bf16.mxu1 %v6663_v41  ;;  %590 = vmatprep.mubr.bf16.mxu1 %v8551_v2  ;;  %v6801_v2 = vld [vmem:[%s8548_s3 + $0xec] ss:$16 sps:$4 sm:$0xff]  }
  0x27   :  { %520 = vmatpush1.bf16.msra.mxu0 %v6644_v38 }
  0x28   :  { %521 = vmatprep.subr.bf16.mxu0 %v6649_v39  ;;  %561 = vmatpush1.bf16.msra.mxu1 %v6682_v44 }
  0x29   :  { %562 = vmatprep.subr.bf16.mxu1 %v6688_v45 }
  0x2b   :  { %522 = vmatpush1.bf16.msra.mxu0 %v6669_v42 }
  0x2c   :  { %523 = vmatprep.subr.bf16.mxu0 %v6674_v43  ;;  %563 = vmatpush1.bf16.msra.mxu1 %v6704_v48 }
  0x2d   :  { %564 = vmatprep.subr.bf16.mxu1 %v6710_v49 }
  0x2f   :  { %524 = vmatpush1.bf16.msra.mxu0 %v6694_v46 }
  0x30   :  { %525 = vmatprep.subr.bf16.mxu0 %v6699_v47  ;;  %565 = vmatpush1.bf16.msra.mxu1 %v6728_v52 }
  0x31   :  { %566 = vmatprep.subr.bf16.mxu1 %v6734_v53 }
  0x33   :  { %526 = vmatpush1.bf16.msra.mxu0 %v6717_v50 }
  0x34   :  { %527 = vmatprep.subr.bf16.mxu0 %v6723_v51  ;;  %567 = vmatpush1.bf16.msra.mxu1 %v6752_v56 }
  0x35   :  { %568 = vmatprep.subr.bf16.mxu1 %v6758_v57 }
  0x37   :  { %528 = vmatpush1.bf16.msra.mxu0 %v6741_v54 }
  0x38   :  { %529 = vmatprep.subr.bf16.mxu0 %v6747_v55  ;;  %569 = vmatpush1.bf16.msra.mxu1 %v6776_v60 }
  0x39   :  { %570 = vmatprep.subr.bf16.mxu1 %v6782_v61 }
  0x3b   :  { %530 = vmatpush1.bf16.msra.mxu0 %v6765_v58  ;;  %v8564_v58 = vmov 0.0|0.0  }
  0x3c   :  { %531 = vmatprep.subr.bf16.mxu0 %v6771_v59  ;;  %571 = vmatpush1.bf16.msra.mxu1 %v6795_v63  ;;  %v8565_v59 = vmov 0  }
  0x3d   :  { %572 = vmatprep.subr.bf16.mxu1 %v6801_v2 }
  0x3f   :  { %532 = vmatpush1.bf16.msra.mxu0 %v6789_v62 }
  0x40   :  { %866 = vmatprep.subr.bf16.mxu0 %v6428_v0  ;;  %573 = vmatpush1.bf16.msra.mxu1 %v6809_v37 }
  0x41   :  { %907 = vmatprep.subr.bf16.mxu1 %v6458_v6 }
  0x42   :  { %550 = vmatmul.mubr.bf16.vlgmr.msra.gmra.mrb[4].mxu0 %v8564_v58 }
  0x43   :  { %867 = vmatpush1.bf16.msra.mxu0 %v6433_v1  ;;  %898 = vmatprep.mubr.bf16.mxu0 %v8565_v59 }
  0x44   :  { %868 = vmatprep.subr.bf16.mxu0 %v6441_v3  ;;  %591 = vmatmul.mubr.bf16.vlgmr.msra.gmra.mrb[4].mxu1 %v8564_v58 }
  0x45   :  { %908 = vmatpush1.bf16.msra.mxu1 %v6463_v7  ;;  %939 = vmatprep.mubr.bf16.mxu1 %v8565_v59 }
  0x46   :  { %909 = vmatprep.subr.bf16.mxu1 %v6482_v10 }
  0x47   :  { %869 = vmatpush1.bf16.msra.mxu0 %v6447_v4 }
  0x48   :  { %870 = vmatprep.subr.bf16.mxu0 %v6453_v5 }
  0x49   :  { %910 = vmatpush1.bf16.msra.mxu1 %v6487_v11 }
  0x4a   :  { %911 = vmatprep.subr.bf16.mxu1 %v6504_v14 }
  0x4b   :  { %871 = vmatpush1.bf16.msra.mxu0 %v6469_v8 }
  0x4c   :  { %872 = vmatprep.subr.bf16.mxu0 %v6476_v9 }
  0x4d   :  { %912 = vmatpush1.bf16.msra.mxu1 %v6511_v15 }
  0x4e   :  { %913 = vmatprep.subr.bf16.mxu1 %v6517_v16 }
  0x4f   :  { %873 = vmatpush1.bf16.msra.mxu0 %v6494_v12 }
  0x50   :  { %874 = vmatprep.subr.bf16.mxu0 %v6499_v13 }
  0x51   :  { %914 = vmatpush1.bf16.msra.mxu1 %v6535_v19 }
  0x52   :  { %915 = vmatprep.subr.bf16.mxu1 %v6541_v20 }
  0x53   :  { %875 = vmatpush1.bf16.msra.mxu0 %v6523_v17 }
  0x54   :  { %876 = vmatprep.subr.bf16.mxu0 %v6529_v18 }
  0x55   :  { %916 = vmatpush1.bf16.msra.mxu1 %v6559_v23 }
  0x56   :  { %917 = vmatprep.subr.bf16.mxu1 %v6565_v24 }
  0x57   :  { %877 = vmatpush1.bf16.msra.mxu0 %v6547_v21 }
  0x58   :  { %878 = vmatprep.subr.bf16.mxu0 %v6552_v22 }
  0x59   :  { %918 = vmatpush1.bf16.msra.mxu1 %v6583_v27 }
  0x5a   :  { %919 = vmatprep.subr.bf16.mxu1 %v6589_v28 }
  0x5b   :  { %879 = vmatpush1.bf16.msra.mxu0 %v6571_v25 }
  0x5c   :  { %880 = vmatprep.subr.bf16.mxu0 %v6577_v26 }
  0x5d   :  { %920 = vmatpush1.bf16.msra.mxu1 %v6607_v31 }
  0x5e   :  { %921 = vmatprep.subr.bf16.mxu1 %v6613_v32 }
  0x5f   :  { %881 = vmatpush1.bf16.msra.mxu0 %v6595_v29 }
  0x60   :  { %1151 = vmatprep.subr.bf16.mxu0 %v6600_v30 }
  0x61   :  { %922 = vmatpush1.bf16.msra.mxu1 %v6631_v35 }
  0x62   :  { %1192 = vmatprep.subr.bf16.mxu1 %v6637_v36 }
  0x63   :  { %11 = vsyncpa [#allocation9], 0  ;;  %v35_v0 = vld [vmem:[%s8545_s0] sm:$0xff]  ;;  %v36_v1 = vld [vmem:[%s8545_s0 + $0x8] sm:$0xff] }
  0x64   :  { %v38_v11 = vld [vmem:[%s8545_s0 + $0x18] sm:$0xff]  ;;  %v37_v17 = vld [vmem:[%s8545_s0 + $0x10] sm:$0xff]  ;;  %v319_v32 = vld [vmem:[%s8546_s1] sm:$0xff] }
  0x65   :  { %v320_v35 = vld [vmem:[%s8546_s1 + $0x8] sm:$0xff] }
  0xf5   :  { %v267_v3 = vpop.f32.mrb[0].mxu0  ;;  %v308_v12 = vpop.f32.mrb[0].mxu1 }
  0xf6   :  { %v315_v4 = vadd.f32 %v267_v3, %v35_v0  ;;  %v269_v5 = vpop.f32.mrb[1].mxu0  ;;  %v310_v13 = vpop.f32.mrb[1].mxu1  ;;  %v317_v20 = vadd.f32 %v308_v12, %v37_v17 }
  0xf7   :  { %v316_v6 = vadd.f32 %v269_v5, %v36_v1  ;;  %v271_v7 = vpop.f32.mrb[2].mxu0  ;;  %v318_v14 = vadd.f32 %v310_v13, %v38_v11  ;;  %v312_v15 = vpop.f32.mrb[2].mxu1 }
  0xf8   :  { %v5183_v8 = vmul.f32 -1.442695, %v315_v4  ;;  %v272_v9 = vpop.f32.mrb[3].mxu0  ;;  %v313_v16 = vpop.f32.mrb[3].mxu1 }
  0xf9   :  { %v5184_v10 = vmul.f32 -1.442695, %v316_v6  ;;  %v5185_v18 = vmul.f32 -1.442695, %v318_v14  ;;  %v321_v14 = vld [vmem:[%s8546_s1 + $0x10] sm:$0xff] }
  0xfa   :  { %6132 = vpow2.f32 %v5183_v8  ;;  %v322_v8 = vld [vmem:[%s8546_s1 + $0x18] sm:$0xff] }
  0xfb   :  { %6134 = vpow2.f32 %v5184_v10 }
  0xfc   :  { %6136 = vpow2.f32 %v5185_v18 }
  0xfd   :  { %6138 = vtanh.f32 %v317_v20 }
 0x104   :  { %v6133_v21 = vpop.eup %6132 }
 0x105   :  { %v6135_v22 = vpop.eup %6134  ;;  %v610_v23 = vadd.f32 1.0, %v6133_v21 }
 0x106   :  { %v611_v24 = vadd.f32 1.0, %v6135_v22  ;;  %v6137_v25 = vpop.eup %6136 }
 0x107   :  { %6140 = vrcp.f32 %v610_v23  ;;  %v6139_v26 = vpop.eup %6138  ;;  %v620_v28 = vadd.f32 1.0, %v6137_v25 }
 0x108   :  { %6142 = vrcp.f32 %v611_v24 }
 0x109   :  { %6144 = vrcp.f32 %v620_v28  ;;  %v7007_v28 = vld [vmem:[%s8547_s2 + $0x80] ss:$16 sps:$4 sm:$0xff]  }
 0x111   :  { %v6141_v27 = vpop.eup %6140 }
 0x112   :  { %v6143_v29 = vpop.eup %6142  ;;  %v624_v30 = vmul.f32 %v6141_v27, %v6139_v26 }
 0x113   :  { %v623_v31 = vmul.f32 0.0, %v6143_v29  ;;  %v6145_v15 = vpop.eup %6144  ;;  %v7013_v29 = vld [vmem:[%s8547_s2 + $0x88] ss:$16 sps:$4 sm:$0xff]  }
 0x115   :  { %v6871_v36 = vadd.f32 %v624_v30, %v623_v31  ;;  %v551_v58 = vpop.f32.mrb[4].mxu0  ;;  %v7021_v30 = vld [vmem:[%s8547_s2 + $0xa4] ss:$16 sps:$4 sm:$0xff]   ;;  %v7026_v31 = vld [vmem:[%s8547_s2 + $0xac] ss:$16 sps:$4 sm:$0xff]  }
 0x116   :  { %v599_v0 = vadd.f32 %v551_v58, %v319_v32  ;;  %v553_v1 = vpop.f32.mrb[5].mxu0  ;;  %v7031_v32 = vld [vmem:[%s8547_s2 + $0xa0] ss:$16 sps:$4 sm:$0xff]   ;;  %v7045_v58 = vld [vmem:[%s8547_s2 + $0xc4] ss:$16 sps:$4 sm:$0xff]  }
 0x117   :  { %6146 = vtanh.f32 %v6871_v36  ;;  %v600_v3 = vadd.f32 %v553_v1, %v320_v35  ;;  %v555_v4 = vpop.f32.mrb[6].mxu0  ;;  %v592_v9 = vpop.f32.mrb[4].mxu1  ;;  %v7036_v35 = vld [vmem:[%s8547_s2 + $0xa8] ss:$16 sps:$4 sm:$0xff]   ;;  %v7055_v1 = vld [vmem:[%s8547_s2 + $0xc0] ss:$16 sps:$4 sm:$0xff]  }
 0x118   :  { %v5186_v5 = vmul.f32 -1.442695, %v599_v0  ;;  %v556_v6 = vpop.f32.mrb[7].mxu0  ;;  %v594_v10 = vpop.f32.mrb[5].mxu1  ;;  %v601_v18 = vadd.f32 %v592_v9, %v321_v14  ;;  %v7050_v0 = vld [vmem:[%s8547_s2 + $0xcc] ss:$16 sps:$4 sm:$0xff]  }
 0x119   :  { %v5187_v7 = vmul.f32 -1.442695, %v600_v3  ;;  %v602_v11 = vadd.f32 %v594_v10, %v322_v8  ;;  %v596_v12 = vpop.f32.mrb[6].mxu1  ;;  %v7060_v3 = vld [vmem:[%s8547_s2 + $0xc8] ss:$16 sps:$4 sm:$0xff]   ;;  %v5190_v10 = vld [vmem:[%s8545_s0 + $0x20] sm:$0xff] }
 0x11a   :  { %6148 = vpow2.f32 %v5186_v5  ;;  %v597_v13 = vpop.f32.mrb[7].mxu1  ;;  %v7069_v4 = vld [vmem:[%s8547_s2 + $0xe4] ss:$16 sps:$4 sm:$0xff]   ;;  %v7074_v5 = vld [vmem:[%s8547_s2 + $0xec] ss:$16 sps:$4 sm:$0xff]  }
 0x11b   :  { %6150 = vpow2.f32 %v5187_v7  ;;  %v5188_v16 = vmul.f32 -1.442695, %v602_v11  ;;  %v7079_v6 = vld [vmem:[%s8547_s2 + $0xe0] ss:$16 sps:$4 sm:$0xff]   ;;  %v7084_v7 = vld [vmem:[%s8547_s2 + $0xe8] ss:$16 sps:$4 sm:$0xff]  }
 0x11c   :  { %v7093_v8 = vld [vmem:[%s8548_s3 + $0x4] ss:$16 sps:$4 sm:$0xff]   ;;  %v7098_v9 = vld [vmem:[%s8548_s3 + $0xc] ss:$16 sps:$4 sm:$0xff]  }
 0x11d   :  { %6152 = vpow2.f32 %v5188_v16  ;;  %v5191_v11 = vld [vmem:[%s8545_s0 + $0x28] sm:$0xff] }
 0x11e   :  { %6154 = vtanh.f32 %v601_v18 }
 0x121   :  { %v6147_v17 = vpop.eup %6146 }
 0x122   :  { %v6880_v20 = vmul.f32 %v6147_v17, %v6145_v15 }
 0x124   :  { %v6149_v21 = vpop.eup %6148  ;;  %5189 = vst [vmem:[%s8549_s4 + $0x8] sm:$0xff] %v6880_v20  ;;  %v673_v22 = vpack.c.bf16 %v6880_v20, %v6880_v20 }
 0x125   :  { %v6151_v23 = vpop.eup %6150  ;;  %v635_v24 = vadd.f32 1.0, %v6149_v21 }
 0x126   :  { %v636_v25 = vadd.f32 1.0, %v6151_v23  ;;  %899 = vmatmul.mubr.bf16.vlgmr.msra.gmra.mrb[8].mxu0 %v673_v22  ;;  %940 = vmatmul.mubr.bf16.vlgmr.msra.gmra.mrb[8].mxu1 %v673_v22 }
 0x127   :  { %6156 = vrcp.f32 %v635_v24  ;;  %1152 = vmatpush1.bf16.msra.mxu0 %v6619_v33  ;;  %1193 = vmatpush1.bf16.msra.mxu1 %v6657_v40  ;;  %v6153_v33 = vpop.eup %6152 }
 0x128   :  { %6158 = vrcp.f32 %v636_v25  ;;  %1153 = vmatprep.subr.bf16.mxu0 %v6624_v34  ;;  %1194 = vmatprep.subr.bf16.mxu1 %v6663_v41  ;;  %v6155_v26 = vpop.eup %6154  ;;  %v645_v40 = vadd.f32 1.0, %v6153_v33  ;;  %v5193_v33 = vld [vmem:[%s8545_s0 + $0x38] sm:$0xff] }
 0x129   :  { %1183 = vmatprep.mubr.bf16.mxu0 %v8565_v59  ;;  %1224 = vmatprep.mubr.bf16.mxu1 %v8565_v59 }
 0x12a   :  { %6160 = vrcp.f32 %v645_v40 }
 0x12b   :  { %1154 = vmatpush1.bf16.msra.mxu0 %v6644_v38  ;;  %1195 = vmatpush1.bf16.msra.mxu1 %v6682_v44  ;;  %v8567_v44 = vld [vmem:[#allocation12_spill] sm:$0xff] }
 0x12c   :  { %1155 = vmatprep.subr.bf16.mxu0 %v6649_v39  ;;  %1196 = vmatprep.subr.bf16.mxu1 %v6688_v45 }
 0x12f   :  { %1156 = vmatpush1.bf16.msra.mxu0 %v6669_v42  ;;  %1197 = vmatpush1.bf16.msra.mxu1 %v6704_v48  ;;  %v6356_v48 = vld [vmem:[%s8547_s2 + $0x4] ss:$16 sps:$4 sm:$0xff]  }
 0x130   :  { %1157 = vmatprep.subr.bf16.mxu0 %v6674_v43  ;;  %1198 = vmatprep.subr.bf16.mxu1 %v6710_v49  ;;  %v8566_v43 = vld [vmem:[#allocation11_spill] sm:$0xff]  ;;  %v6359_v49 = vld [vmem:[%s8547_s2 + $0x8] ss:$16 sps:$4 sm:$0xff]  }
 0x131   :  { %v6157_v34 = vpop.eup %6156 }
 0x132   :  { %v6159_v41 = vpop.eup %6158  ;;  %v649_v38 = vmul.f32 %v6157_v34, %v6155_v26  ;;  %v5192_v34 = vld [vmem:[%s8545_s0 + $0x30] sm:$0xff] }
 0x133   :  { %v648_v27 = vmul.f32 0.0, %v6159_v41  ;;  %1158 = vmatpush1.bf16.msra.mxu0 %v6694_v46  ;;  %1199 = vmatpush1.bf16.msra.mxu1 %v6728_v52  ;;  %v6362_v52 = vld [vmem:[%s8547_s2 + $0x4c] ss:$16 sps:$4 sm:$0xff]  }
 0x134   :  { %1159 = vmatprep.subr.bf16.mxu0 %v6699_v47  ;;  %1200 = vmatprep.subr.bf16.mxu1 %v6734_v53  ;;  %v6161_v42 = vpop.eup %6160  ;;  %v6363_v53 = vld [vmem:[%s8547_s2 + $0x48] ss:$16 sps:$4 sm:$0xff]  }
 0x135   :  { %v6906_v39 = vadd.f32 %v649_v38, %v648_v27 }
 0x137   :  { %6162 = vtanh.f32 %v6906_v39  ;;  %1160 = vmatpush1.bf16.msra.mxu0 %v6717_v50  ;;  %1201 = vmatpush1.bf16.msra.mxu1 %v6752_v56  ;;  %v6360_v50 = vld [vmem:[%s8547_s2 + $0x2c] ss:$16 sps:$4 sm:$0xff]   ;;  %v6966_v56 = vld [vmem:[%s8547_s2 + $0x20] ss:$16 sps:$4 sm:$0xff]  }
 0x138   :  { %1161 = vmatprep.subr.bf16.mxu0 %v6723_v51  ;;  %1202 = vmatprep.subr.bf16.mxu1 %v6758_v57  ;;  %v6361_v51 = vld [vmem:[%s8547_s2 + $0x28] ss:$16 sps:$4 sm:$0xff]   ;;  %v6973_v57 = vld [vmem:[%s8547_s2 + $0x44] ss:$16 sps:$4 sm:$0xff]  }
 0x13b   :  { %1162 = vmatpush1.bf16.msra.mxu0 %v6741_v54  ;;  %1203 = vmatpush1.bf16.msra.mxu1 %v6776_v60  ;;  %v6364_v54 = vld [vmem:[%s8547_s2 + $0x6c] ss:$16 sps:$4 sm:$0xff]   ;;  %v6985_v60 = vld [vmem:[%s8547_s2 + $0x64] ss:$16 sps:$4 sm:$0xff]  }
 0x13c   :  { %1163 = vmatprep.subr.bf16.mxu0 %v6747_v55  ;;  %1204 = vmatprep.subr.bf16.mxu1 %v6782_v61  ;;  %v6961_v55 = vld [vmem:[%s8547_s2 + $0x24] ss:$16 sps:$4 sm:$0xff]   ;;  %v6990_v61 = vld [vmem:[%s8547_s2 + $0x60] ss:$16 sps:$4 sm:$0xff]  }
 0x13f   :  { %1164 = vmatpush1.bf16.msra.mxu0 %v8566_v43  ;;  %1205 = vmatpush1.bf16.msra.mxu1 %v6795_v63  ;;  %v7002_v63 = vld [vmem:[%s8547_s2 + $0x8c] ss:$16 sps:$4 sm:$0xff]  }
 0x140   :  { %1165 = vmatprep.subr.bf16.mxu0 %v8567_v44  ;;  %1206 = vmatprep.subr.bf16.mxu1 %v6801_v2  ;;  %v6357_v2 = vld [vmem:[%s8547_s2 + $0xc] ss:$16 sps:$4 sm:$0xff]  }
 0x141   :  { %v6163_v45 = vpop.eup %6162 }
 0x142   :  { %v6921_v46 = vmul.f32 %v6163_v45, %v6161_v42 }
 0x143   :  { %1166 = vmatpush1.bf16.msra.mxu0 %v6789_v62  ;;  %1207 = vmatpush1.bf16.msra.mxu1 %v6809_v37  ;;  %v6358_v37 = vld [vmem:[%s8547_s2] ss:$16 sps:$4 sm:$0xff]   ;;  %v6997_v62 = vld [vmem:[%s8547_s2 + $0x84] ss:$16 sps:$4 sm:$0xff]  }
 0x144   :  { %666 = vst [vmem:[#allocation8 + $0x8] sm:$0xff] %v6921_v46  ;;  %v958_v47 = vpack.c.bf16 %v6921_v46, %v6921_v46  ;;  %1500 = vmatprep.subr.bf16.mxu0 %v6356_v48  ;;  %1541 = vmatprep.subr.bf16.mxu1 %v6357_v2 }
 0x146   :  { %1184 = vmatmul.mubr.bf16.vlgmr.msra.gmra.mrb[12].mxu0 %v958_v47  ;;  %1225 = vmatmul.mubr.bf16.vlgmr.msra.gmra.mrb[12].mxu1 %v958_v47 }
 0x147   :  { %1501 = vmatpush1.bf16.msra.mxu0 %v6358_v37  ;;  %1542 = vmatpush1.bf16.msra.mxu1 %v6359_v49 }
 0x148   :  { %1543 = vmatprep.subr.bf16.mxu1 %v6360_v50  ;;  %1532 = vmatprep.mubr.bf16.mxu0 %v8565_v59  ;;  %v5226_v50 = vld [vmem:[%s8546_s1 + $0x20] sm:$0xff] }
 0x149   :  { %1573 = vmatprep.mubr.bf16.mxu1 %v8565_v59  ;;  %1502 = vmatprep.subr.bf16.mxu0 %v6961_v55 }
 0x14b   :  { %1544 = vmatpush1.bf16.msra.mxu1 %v6361_v51  ;;  %1503 = vmatpush1.bf16.msra.mxu0 %v6966_v56  ;;  %v5227_v51 = vld [vmem:[%s8546_s1 + $0x28] sm:$0xff] }
 0x14c   :  { %1545 = vmatprep.subr.bf16.mxu1 %v6362_v52  ;;  %1504 = vmatprep.subr.bf16.mxu0 %v6973_v57 }
 0x14f   :  { %1546 = vmatpush1.bf16.msra.mxu1 %v6363_v53 }
 0x150   :  { %1547 = vmatprep.subr.bf16.mxu1 %v6364_v54 }
 0x153   :  { %1548 = vmatpush1.bf16.msra.mxu1 %v6535_v19  ;;  %v6978_v19 = vld [vmem:[%s8547_s2 + $0x40] ss:$16 sps:$4 sm:$0xff]  }
 0x154   :  { %1505 = vmatpush1.bf16.msra.mxu0 %v6978_v19  ;;  %1549 = vmatprep.subr.bf16.mxu1 %v7002_v63 }
 0x155   :  { %1506 = vmatprep.subr.bf16.mxu0 %v6985_v60 }
 0x157   :  { %1550 = vmatpush1.bf16.msra.mxu1 %v7013_v29 }
 0x158   :  { %1507 = vmatpush1.bf16.msra.mxu0 %v6990_v61  ;;  %1551 = vmatprep.subr.bf16.mxu1 %v7026_v31 }
 0x159   :  { %1508 = vmatprep.subr.bf16.mxu0 %v6997_v62 }
 0x15b   :  { %1552 = vmatpush1.bf16.msra.mxu1 %v7036_v35 }
 0x15c   :  { %1509 = vmatpush1.bf16.msra.mxu0 %v7007_v28  ;;  %1553 = vmatprep.subr.bf16.mxu1 %v7050_v0 }
 0x15d   :  { %1510 = vmatprep.subr.bf16.mxu0 %v7021_v30 }
 0x15f   :  { %1554 = vmatpush1.bf16.msra.mxu1 %v7060_v3 }
 0x160   :  { %1511 = vmatpush1.bf16.msra.mxu0 %v7031_v32  ;;  %1555 = vmatprep.subr.bf16.mxu1 %v7074_v5 }
 0x161   :  { %1512 = vmatprep.subr.bf16.mxu0 %v7045_v58 }
 0x163   :  { %1556 = vmatpush1.bf16.msra.mxu1 %v7084_v7 }
 0x164   :  { %1513 = vmatpush1.bf16.msra.mxu0 %v7055_v1  ;;  %1826 = vmatprep.subr.bf16.mxu1 %v7098_v9 }
 0x165   :  { %1514 = vmatprep.subr.bf16.mxu0 %v7069_v4 }
 0x168   :  { %1515 = vmatpush1.bf16.msra.mxu0 %v7079_v6 }
 0x169   :  { %1785 = vmatprep.subr.bf16.mxu0 %v7093_v8 }
 0x1f9   :  { %v900_v12 = vpop.f32.mrb[8].mxu0  ;;  %v941_v13 = vpop.f32.mrb[8].mxu1 }
 0x1fa   :  { %v948_v14 = vadd.f32 %v5190_v10, %v900_v12  ;;  %v902_v15 = vpop.f32.mrb[9].mxu0  ;;  %v943_v16 = vpop.f32.mrb[9].mxu1  ;;  %v950_v41 = vadd.f32 %v5192_v34, %v941_v13 }
 0x1fb   :  { %v949_v17 = vadd.f32 %v5191_v11, %v902_v15  ;;  %v904_v18 = vpop.f32.mrb[10].mxu0  ;;  %v945_v21 = vpop.f32.mrb[10].mxu1  ;;  %v951_v26 = vadd.f32 %v5193_v33, %v943_v16 }
 0x1fc   :  { %v5262_v22 = vmul.f32 -1.442695, %v948_v14  ;;  %v905_v23 = vpop.f32.mrb[11].mxu0  ;;  %v946_v24 = vpop.f32.mrb[11].mxu1  ;;  %v5229_v21 = vld [vmem:[%s8546_s1 + $0x38] sm:$0xff] }
 0x1fd   :  { %v5263_v25 = vmul.f32 -1.442695, %v949_v17  ;;  %v5264_v40 = vmul.f32 -1.442695, %v951_v26  ;;  %v5228_v23 = vld [vmem:[%s8546_s1 + $0x30] sm:$0xff] }
 0x1fe   :  { %6164 = vpow2.f32 %v5262_v22 }
 0x1ff   :  { %6166 = vpow2.f32 %v5263_v25 }
 0x200   :  { %6168 = vpow2.f32 %v5264_v40  ;;  %v7133_v40 = vld [vmem:[%s8548_s3] ss:$16 sps:$4 sm:$0xff]  }
 0x201   :  { %6170 = vtanh.f32 %v950_v41  ;;  %v7138_v41 = vld [vmem:[%s8548_s3 + $0x8] ss:$16 sps:$4 sm:$0xff]  }
 0x208   :  { %v6165_v38 = vpop.eup %6164 }
 0x209   :  { %v6167_v27 = vpop.eup %6166  ;;  %v1244_v42 = vadd.f32 1.0, %v6165_v38 }
 0x20a   :  { %v1245_v43 = vadd.f32 1.0, %v6167_v27  ;;  %v6169_v44 = vpop.eup %6168 }
 0x20b   :  { %6172 = vrcp.f32 %v1244_v42  ;;  %v6171_v45 = vpop.eup %6170  ;;  %v1254_v37 = vadd.f32 1.0, %v6169_v44  ;;  %v7151_v44 = vld [vmem:[%s8548_s3 + $0x2c] ss:$16 sps:$4 sm:$0xff]  }
 0x20c   :  { %6174 = vrcp.f32 %v1245_v43  ;;  %v7146_v43 = vld [vmem:[%s8548_s3 + $0x24] ss:$16 sps:$4 sm:$0xff]  }
 0x20d   :  { %6176 = vrcp.f32 %v1254_v37  ;;  %v7174_v37 = vld [vmem:[%s8548_s3 + $0x44] ss:$16 sps:$4 sm:$0xff]  }
 0x215   :  { %v6173_v47 = vpop.eup %6172 }
 0x216   :  { %v6175_v48 = vpop.eup %6174  ;;  %v1258_v2 = vmul.f32 %v6173_v47, %v6171_v45 }
 0x217   :  { %v1257_v49 = vmul.f32 %v6175_v48, %v6871_v36  ;;  %v6177_v24 = vpop.eup %6176 }
 0x219   :  { %v7121_v52 = vadd.f32 %v1258_v2, %v1257_v49  ;;  %v1185_v53 = vpop.f32.mrb[12].mxu0  ;;  %v1226_v54 = vpop.f32.mrb[12].mxu1  ;;  %v7167_v2 = vld [vmem:[%s8548_s3 + $0x28] ss:$16 sps:$4 sm:$0xff]   ;;  %v7179_v49 = vld [vmem:[%s8548_s3 + $0x4c] ss:$16 sps:$4 sm:$0xff]  }
 0x21a   :  { %v1233_v10 = vadd.f32 %v5226_v50, %v1185_v53  ;;  %v1187_v11 = vpop.f32.mrb[13].mxu0  ;;  %v1228_v12 = vpop.f32.mrb[13].mxu1  ;;  %v1235_v26 = vadd.f32 %v5228_v23, %v1226_v54  ;;  %v7188_v50 = vld [vmem:[%s8548_s3 + $0x40] ss:$16 sps:$4 sm:$0xff]   ;;  %v7200_v53 = vld [vmem:[%s8548_s3 + $0x64] ss:$16 sps:$4 sm:$0xff]  }
 0x21b   :  { %6178 = vtanh.f32 %v7121_v52  ;;  %v1234_v13 = vadd.f32 %v5227_v51, %v1187_v11  ;;  %v1189_v36 = vpop.f32.mrb[14].mxu0  ;;  %v1230_v14 = vpop.f32.mrb[14].mxu1  ;;  %v1236_v22 = vadd.f32 %v5229_v21, %v1228_v12  ;;  %v7193_v51 = vld [vmem:[%s8548_s3 + $0x48] ss:$16 sps:$4 sm:$0xff]   ;;  %v7205_v54 = vld [vmem:[%s8548_s3 + $0x6c] ss:$16 sps:$4 sm:$0xff]  }
 0x21c   :  { %v5265_v15 = vmul.f32 -1.442695, %v1233_v10  ;;  %v1190_v16 = vpop.f32.mrb[15].mxu0  ;;  %v1231_v17 = vpop.f32.mrb[15].mxu1  ;;  %v7212_v11 = vld [vmem:[%s8548_s3 + $0x60] ss:$16 sps:$4 sm:$0xff]  }
 0x21d   :  { %v5266_v18 = vmul.f32 -1.442695, %v1234_v13  ;;  %v5267_v33 = vmul.f32 -1.442695, %v1236_v22  ;;  %v7217_v12 = vld [vmem:[%s8548_s3 + $0x68] ss:$16 sps:$4 sm:$0xff]  }
 0x21e   :  { %6180 = vpow2.f32 %v5265_v15  ;;  %v7224_v36 = vld [vmem:[%s8548_s3 + $0x84] ss:$16 sps:$4 sm:$0xff]   ;;  %v7229_v14 = vld [vmem:[%s8548_s3 + $0x8c] ss:$16 sps:$4 sm:$0xff]   ;;  %v7237_v22 = vld [vmem:[%s8548_s3 + $0x80] ss:$16 sps:$4 sm:$0xff]  }
 0x21f   :  { %6182 = vpow2.f32 %v5266_v18  ;;  %v7242_v23 = vld [vmem:[%s8548_s3 + $0x88] ss:$16 sps:$4 sm:$0xff]  }
 0x220   :  { %6184 = vpow2.f32 %v5267_v33  ;;  %v7264_v33 = vld [vmem:[%s8548_s3 + $0xa0] ss:$16 sps:$4 sm:$0xff]  }
 0x221   :  { %6186 = vtanh.f32 %v1235_v26  ;;  %v7269_v26 = vld [vmem:[%s8548_s3 + $0xa8] ss:$16 sps:$4 sm:$0xff]  }
 0x225   :  { %v6179_v25 = vpop.eup %6178 }
 0x226   :  { %v1261_v34 = vmul.f32 %v6179_v25, %v6177_v24  ;;  %v7254_v24 = vld [vmem:[%s8548_s3 + $0xac] ss:$16 sps:$4 sm:$0xff]  }
 0x228   :  { %v6181_v38 = vpop.eup %6180  ;;  %v7141_v27 = vadd.f32 %v1261_v34, %v6880_v20  ;;  %v1307_v42 = vpack.c.bf16 %v1261_v34, %v1261_v34  ;;  %v7162_v20 = vld [vmem:[%s8548_s3 + $0x20] ss:$16 sps:$4 sm:$0xff]   ;;  %v7276_v34 = vld [vmem:[%s8548_s3 + $0xc4] ss:$16 sps:$4 sm:$0xff]  }
 0x229   :  { %v6183_v45 = vpop.eup %6182  ;;  %v1269_v47 = vadd.f32 1.0, %v6181_v38  ;;  %v7281_v38 = vld [vmem:[%s8548_s3 + $0xcc] ss:$16 sps:$4 sm:$0xff]  }
 0x22a   :  { %v1270_v48 = vadd.f32 1.0, %v6183_v45  ;;  %5268 = vst [vmem:[%s8549_s4 + $0x10] sm:$0xff] %v7141_v27  ;;  %1533 = vmatmul.mubr.bf16.vlgmr.msra.gmra.mrb[16].mxu0 %v1307_v42  ;;  %1574 = vmatmul.mubr.bf16.vlgmr.msra.gmra.mrb[16].mxu1 %v1307_v42  ;;  %v6185_v10 = vpop.eup %6184  ;;  %v7288_v42 = vld [vmem:[%s8548_s3 + $0xc0] ss:$16 sps:$4 sm:$0xff]   ;;  %v7293_v45 = vld [vmem:[%s8548_s3 + $0xc8] ss:$16 sps:$4 sm:$0xff]  }
 0x22b   :  { %6188 = vrcp.f32 %v1269_v47  ;;  %1786 = vmatpush1.bf16.msra.mxu0 %v7133_v40  ;;  %1827 = vmatpush1.bf16.msra.mxu1 %v7138_v41  ;;  %v6187_v13 = vpop.eup %6186  ;;  %v1279_v18 = vadd.f32 1.0, %v6185_v10  ;;  %v7300_v47 = vld [vmem:[%s8548_s3 + $0xe4] ss:$16 sps:$4 sm:$0xff]   ;;  %v7312_v10 = vld [vmem:[%s8548_s3 + $0xe0] ss:$16 sps:$4 sm:$0xff]  }
 0x22c   :  { %6190 = vrcp.f32 %v1270_v48  ;;  %1787 = vmatprep.subr.bf16.mxu0 %v7146_v43  ;;  %1828 = vmatprep.subr.bf16.mxu1 %v7151_v44  ;;  %v7305_v48 = vld [vmem:[%s8548_s3 + $0xec] ss:$16 sps:$4 sm:$0xff]  }
 0x22d   :  { %1817 = vmatprep.mubr.bf16.mxu0 %v8565_v59  ;;  %1858 = vmatprep.mubr.bf16.mxu1 %v8565_v59  ;;  %6192 = vrcp.f32 %v1279_v18 }
 0x22f   :  { %1788 = vmatpush1.bf16.msra.mxu0 %v7162_v20  ;;  %1829 = vmatpush1.bf16.msra.mxu1 %v7167_v2 }
 0x230   :  { %1789 = vmatprep.subr.bf16.mxu0 %v7174_v37  ;;  %1830 = vmatprep.subr.bf16.mxu1 %v7179_v49 }
 0x233   :  { %1790 = vmatpush1.bf16.msra.mxu0 %v7188_v50  ;;  %1831 = vmatpush1.bf16.msra.mxu1 %v7193_v51 }
 0x234   :  { %1791 = vmatprep.subr.bf16.mxu0 %v7200_v53  ;;  %1832 = vmatprep.subr.bf16.mxu1 %v7205_v54 }
 0x235   :  { %v6189_v15 = vpop.eup %6188 }
 0x236   :  { %v6191_v16 = vpop.eup %6190  ;;  %v1283_v17 = vmul.f32 %v6189_v15, %v6187_v13  ;;  %v7317_v13 = vld [vmem:[%s8548_s3 + $0xe8] ss:$16 sps:$4 sm:$0xff]  }
 0x237   :  { %v1282_v21 = vmul.f32 %v6191_v16, %v6906_v39  ;;  %1792 = vmatpush1.bf16.msra.mxu0 %v7212_v11  ;;  %1833 = vmatpush1.bf16.msra.mxu1 %v7217_v12  ;;  %v7249_v39 = vld [vmem:[%s8548_s3 + $0xa4] ss:$16 sps:$4 sm:$0xff]   ;;  %v6193_v15 = vpop.eup %6192 }
 0x238   :  { %1793 = vmatprep.subr.bf16.mxu0 %v7224_v36  ;;  %1834 = vmatprep.subr.bf16.mxu1 %v7229_v14 }
 0x239   :  { %v7256_v25 = vadd.f32 %v1283_v17, %v1282_v21 }
 0x23b   :  { %6194 = vtanh.f32 %v7256_v25  ;;  %1794 = vmatpush1.bf16.msra.mxu0 %v7237_v22  ;;  %1835 = vmatpush1.bf16.msra.mxu1 %v7242_v23 }
 0x23c   :  { %1795 = vmatprep.subr.bf16.mxu0 %v7249_v39  ;;  %1836 = vmatprep.subr.bf16.mxu1 %v7254_v24 }
 0x23f   :  { %1796 = vmatpush1.bf16.msra.mxu0 %v7264_v33  ;;  %1837 = vmatpush1.bf16.msra.mxu1 %v7269_v26 }
 0x240   :  { %1797 = vmatprep.subr.bf16.mxu0 %v7276_v34  ;;  %1838 = vmatprep.subr.bf16.mxu1 %v7281_v38 }
 0x243   :  { %1798 = vmatpush1.bf16.msra.mxu0 %v7288_v42  ;;  %1839 = vmatpush1.bf16.msra.mxu1 %v7293_v45 }
 0x244   :  { %1799 = vmatprep.subr.bf16.mxu0 %v7300_v47  ;;  %1840 = vmatprep.subr.bf16.mxu1 %v7305_v48 }
 0x245   :  { %v6195_v16 = vpop.eup %6194 }
 0x246   :  { %v1286_v17 = vmul.f32 %v6195_v16, %v6193_v15  ;;  %v7332_v15 = vld [vmem:[%s8547_s2 + $0x4] ss:$16 sps:$4 sm:$0xff]   ;;  %v7337_v16 = vld [vmem:[%s8547_s2 + $0xc] ss:$16 sps:$4 sm:$0xff]  }
 0x247   :  { %1800 = vmatpush1.bf16.msra.mxu0 %v7312_v10  ;;  %1841 = vmatpush1.bf16.msra.mxu1 %v7317_v13 }
 0x248   :  { %v7324_v18 = vadd.f32 %v1286_v17, %v6921_v46  ;;  %v1592_v21 = vpack.c.bf16 %v1286_v17, %v1286_v17  ;;  %v7342_v46 = vld [vmem:[%s8547_s2] ss:$16 sps:$4 sm:$0xff]   ;;  %v7347_v17 = vld [vmem:[%s8547_s2 + $0x8] ss:$16 sps:$4 sm:$0xff]   ;;  %2134 = vmatprep.subr.bf16.mxu0 %v7332_v15  ;;  %2175 = vmatprep.subr.bf16.mxu1 %v7337_v16 }
 0x249   :  { %8569 = vst [vmem:[#allocation12_spill] sm:$0xff] %v7347_v17 }
 0x24a   :  { %8568 = vst [vmem:[#allocation11_spill] sm:$0xff] %v7324_v18  ;;  %1300 = vst [vmem:[#allocation8 + $0x10] sm:$0xff] %v7324_v18  ;;  %1818 = vmatmul.mubr.bf16.vlgmr.msra.gmra.mrb[20].mxu0 %v1592_v21  ;;  %1859 = vmatmul.mubr.bf16.vlgmr.msra.gmra.mrb[20].mxu1 %v1592_v21  ;;  %v7357_v21 = vld [vmem:[%s8547_s2 + $0x2c] ss:$16 sps:$4 sm:$0xff]   ;;  %v7362_v18 = vld [vmem:[%s8547_s2 + $0x28] ss:$16 sps:$4 sm:$0xff]  }
 0x24b   :  { %2166 = vmatprep.mubr.bf16.mxu0 %v8565_v59  ;;  %2207 = vmatprep.mubr.bf16.mxu1 %v8565_v59 }
 0x24c   :  { %2135 = vmatpush1.bf16.msra.mxu0 %v7342_v46  ;;  %2176 = vmatpush1.bf16.msra.mxu1 %v7347_v17  ;;  %v7376_v17 = vld [vmem:[%s8547_s2 + $0x48] ss:$16 sps:$4 sm:$0xff]  }
 0x24d   :  { %2136 = vmatprep.subr.bf16.mxu0 %v6961_v55  ;;  %2177 = vmatprep.subr.bf16.mxu1 %v7357_v21  ;;  %v7371_v55 = vld [vmem:[%s8547_s2 + $0x4c] ss:$16 sps:$4 sm:$0xff]  }
 0x250   :  { %2137 = vmatpush1.bf16.msra.mxu0 %v6966_v56  ;;  %2178 = vmatpush1.bf16.msra.mxu1 %v7362_v18  ;;  %v7385_v56 = vld [vmem:[%s8547_s2 + $0x6c] ss:$16 sps:$4 sm:$0xff]  }
 0x251   :  { %2138 = vmatprep.subr.bf16.mxu0 %v6973_v57  ;;  %2179 = vmatprep.subr.bf16.mxu1 %v7371_v55  ;;  %v7390_v57 = vld [vmem:[%s8547_s2 + $0x68] ss:$16 sps:$4 sm:$0xff]  }
 0x254   :  { %2139 = vmatpush1.bf16.msra.mxu0 %v6978_v19  ;;  %2180 = vmatpush1.bf16.msra.mxu1 %v7376_v17  ;;  %v5269_v19 = vld [vmem:[%s8545_s0 + $0x40] sm:$0xff] }
 0x255   :  { %2140 = vmatprep.subr.bf16.mxu0 %v6985_v60  ;;  %2181 = vmatprep.subr.bf16.mxu1 %v7385_v56  ;;  %v5270_v60 = vld [vmem:[%s8545_s0 + $0x48] sm:$0xff] }
 0x258   :  { %2141 = vmatpush1.bf16.msra.mxu0 %v6990_v61  ;;  %2182 = vmatpush1.bf16.msra.mxu1 %v7390_v57 }
 0x259   :  { %2142 = vmatprep.subr.bf16.mxu0 %v6997_v62  ;;  %2183 = vmatprep.subr.bf16.mxu1 %v7002_v63 }
 0x25c   :  { %2143 = vmatpush1.bf16.msra.mxu0 %v7007_v28  ;;  %2184 = vmatpush1.bf16.msra.mxu1 %v7013_v29 }
 0x25d   :  { %2144 = vmatprep.subr.bf16.mxu0 %v7021_v30  ;;  %2185 = vmatprep.subr.bf16.mxu1 %v7026_v31 }
 0x260   :  { %2145 = vmatpush1.bf16.msra.mxu0 %v7031_v32  ;;  %2186 = vmatpush1.bf16.msra.mxu1 %v7036_v35 }
 0x261   :  { %2146 = vmatprep.subr.bf16.mxu0 %v7045_v58  ;;  %2187 = vmatprep.subr.bf16.mxu1 %v7050_v0 }
 0x264   :  { %2147 = vmatpush1.bf16.msra.mxu0 %v7055_v1  ;;  %2188 = vmatpush1.bf16.msra.mxu1 %v7060_v3  ;;  %v5272_v3 = vld [vmem:[%s8545_s0 + $0x58] sm:$0xff] }
 0x265   :  { %2148 = vmatprep.subr.bf16.mxu0 %v7069_v4  ;;  %2189 = vmatprep.subr.bf16.mxu1 %v7074_v5  ;;  %v5271_v5 = vld [vmem:[%s8545_s0 + $0x50] sm:$0xff] }
 0x268   :  { %2149 = vmatpush1.bf16.msra.mxu0 %v7079_v6  ;;  %2190 = vmatpush1.bf16.msra.mxu1 %v7084_v7 }
 0x269   :  { %2419 = vmatprep.subr.bf16.mxu0 %v7093_v8  ;;  %2460 = vmatprep.subr.bf16.mxu1 %v7098_v9 }
 0x2fd   :  { %v1534_v61 = vpop.f32.mrb[16].mxu0  ;;  %v1575_v62 = vpop.f32.mrb[16].mxu1 }
 0x2fe   :  { %v1582_v63 = vadd.f32 %v5269_v19, %v1534_v61  ;;  %v1536_v28 = vpop.f32.mrb[17].mxu0  ;;  %v1577_v29 = vpop.f32.mrb[17].mxu1  ;;  %v1584_v7 = vadd.f32 %v5271_v5, %v1575_v62  ;;  %v5305_v62 = vld [vmem:[%s8546_s1 + $0x40] sm:$0xff] }
 0x2ff   :  { %v1583_v30 = vadd.f32 %v5270_v60, %v1536_v28  ;;  %v1538_v31 = vpop.f32.mrb[18].mxu0  ;;  %v1579_v32 = vpop.f32.mrb[18].mxu1  ;;  %v1585_v4 = vadd.f32 %v5272_v3, %v1577_v29 }
 0x300   :  { %v5341_v35 = vmul.f32 -1.442695, %v1582_v63  ;;  %v1539_v58 = vpop.f32.mrb[19].mxu0  ;;  %v1580_v0 = vpop.f32.mrb[19].mxu1 }
 0x301   :  { %v5342_v1 = vmul.f32 -1.442695, %v1583_v30  ;;  %v5343_v6 = vmul.f32 -1.442695, %v1585_v4 }
 0x302   :  { %6196 = vpow2.f32 %v5341_v35  ;;  %v5306_v35 = vld [vmem:[%s8546_s1 + $0x48] sm:$0xff] }
 0x303   :  { %6198 = vpow2.f32 %v5342_v1 }
 0x304   :  { %6200 = vpow2.f32 %v5343_v6 }
 0x305   :  { %6202 = vtanh.f32 %v1584_v7 }
 0x30c   :  { %v6197_v8 = vpop.eup %6196 }
 0x30d   :  { %v6199_v9 = vpop.eup %6198  ;;  %v1878_v19 = vadd.f32 1.0, %v6197_v8 }
 0x30e   :  { %v1879_v60 = vadd.f32 1.0, %v6199_v9  ;;  %v6201_v61 = vpop.eup %6200 }
 0x30f   :  { %6204 = vrcp.f32 %v1878_v19  ;;  %v6203_v63 = vpop.eup %6202  ;;  %v1888_v29 = vadd.f32 1.0, %v6201_v61  ;;  %v5308_v61 = vld [vmem:[%s8546_s1 + $0x58] sm:$0xff] }
 0x310   :  { %6206 = vrcp.f32 %v1879_v60 }
 0x311   :  { %6208 = vrcp.f32 %v1888_v29 }
 0x319   :  { %v6205_v28 = vpop.eup %6204 }
 0x31a   :  { %v6207_v30 = vpop.eup %6206  ;;  %v1892_v31 = vmul.f32 %v6205_v28, %v6203_v63  ;;  %v5307_v28 = vld [vmem:[%s8546_s1 + $0x50] sm:$0xff] }
 0x31b   :  { %v1891_v32 = vmul.f32 %v6207_v30, %v7121_v52  ;;  %v6209_v30 = vpop.eup %6208 }
 0x31d   :  { %v7432_v58 = vadd.f32 %v1892_v31, %v1891_v32  ;;  %v1819_v0 = vpop.f32.mrb[20].mxu0  ;;  %v1860_v1 = vpop.f32.mrb[20].mxu1 }
 0x31e   :  { %v1867_v3 = vadd.f32 %v5305_v62, %v1819_v0  ;;  %v1821_v4 = vpop.f32.mrb[21].mxu0  ;;  %v1862_v5 = vpop.f32.mrb[21].mxu1  ;;  %v1869_v32 = vadd.f32 %v5307_v28, %v1860_v1 }
 0x31f   :  { %6210 = vtanh.f32 %v7432_v58  ;;  %v1868_v6 = vadd.f32 %v5306_v35, %v1821_v4  ;;  %v1823_v52 = vpop.f32.mrb[22].mxu0  ;;  %v1864_v7 = vpop.f32.mrb[22].mxu1  ;;  %v1870_v63 = vadd.f32 %v5308_v61, %v1862_v5 }
 0x320   :  { %v5344_v8 = vmul.f32 -1.442695, %v1867_v3  ;;  %v1824_v9 = vpop.f32.mrb[23].mxu0  ;;  %v1865_v19 = vpop.f32.mrb[23].mxu1 }
 0x321   :  { %v5345_v60 = vmul.f32 -1.442695, %v1868_v6  ;;  %v5346_v29 = vmul.f32 -1.442695, %v1870_v63 }
 0x322   :  { %6212 = vpow2.f32 %v5344_v8 }
 0x323   :  { %6214 = vpow2.f32 %v5345_v60 }
 0x324   :  { %6216 = vpow2.f32 %v5346_v29  ;;  %v5351_v29 = vld [vmem:[%s8545_s0 + $0x78] sm:$0xff] }
 0x325   :  { %6218 = vtanh.f32 %v1869_v32 }
 0x329   :  { %v6211_v31 = vpop.eup %6210 }
 0x32a   :  { %v1895_v62 = vmul.f32 %v6211_v31, %v6209_v30 }
 0x32c   :  { %v6213_v35 = vpop.eup %6212  ;;  %v7442_v0 = vadd.f32 %v1895_v62, %v7141_v27  ;;  %v1941_v3 = vpack.c.bf16 %v1895_v62, %v1895_v62  ;;  %v5350_v62 = vld [vmem:[%s8545_s0 + $0x70] sm:$0xff] }
 0x32d   :  { %v6215_v4 = vpop.eup %6214  ;;  %v1903_v6 = vadd.f32 1.0, %v6213_v35 }
 0x32e   :  { %v1904_v52 = vadd.f32 1.0, %v6215_v4  ;;  %5347 = vst [vmem:[%s8549_s4 + $0x18] sm:$0xff] %v7442_v0  ;;  %2167 = vmatmul.mubr.bf16.vlgmr.msra.gmra.mrb[24].mxu0 %v1941_v3  ;;  %2208 = vmatmul.mubr.bf16.vlgmr.msra.gmra.mrb[24].mxu1 %v1941_v3 }
 0x32f   :  { %6220 = vrcp.f32 %v1903_v6  ;;  %2420 = vmatpush1.bf16.msra.mxu0 %v7133_v40  ;;  %2461 = vmatpush1.bf16.msra.mxu1 %v7138_v41  ;;  %v6217_v40 = vpop.eup %6216 }
 0x330   :  { %6222 = vrcp.f32 %v1904_v52  ;;  %2421 = vmatprep.subr.bf16.mxu0 %v7146_v43  ;;  %2462 = vmatprep.subr.bf16.mxu1 %v7151_v44  ;;  %v6219_v41 = vpop.eup %6218 }
 0x331   :  { %2451 = vmatprep.mubr.bf16.mxu0 %v8565_v59  ;;  %2492 = vmatprep.mubr.bf16.mxu1 %v8565_v59 }
 0x333   :  { %2422 = vmatpush1.bf16.msra.mxu0 %v7162_v20  ;;  %2463 = vmatpush1.bf16.msra.mxu1 %v7167_v2  ;;  %v1913_v20 = vadd.f32 1.0, %v6217_v40 }
 0x334   :  { %2423 = vmatprep.subr.bf16.mxu0 %v7174_v37  ;;  %2464 = vmatprep.subr.bf16.mxu1 %v7179_v49 }
 0x335   :  { %6224 = vrcp.f32 %v1913_v20 }
 0x337   :  { %2424 = vmatpush1.bf16.msra.mxu0 %v7188_v50  ;;  %2465 = vmatpush1.bf16.msra.mxu1 %v7193_v51 }
 0x338   :  { %2425 = vmatprep.subr.bf16.mxu0 %v7200_v53  ;;  %2466 = vmatprep.subr.bf16.mxu1 %v7205_v54  ;;  %v8570_v53 = vld [vmem:[#allocation11_spill] sm:$0xff] }
 0x339   :  { %v6221_v27 = vpop.eup %6220 }
 0x33a   :  { %v6223_v43 = vpop.eup %6222  ;;  %v1917_v44 = vmul.f32 %v6221_v27, %v6219_v41 }
 0x33b   :  { %v1916_v2 = vmul.f32 %v6223_v43, %v7256_v25  ;;  %2426 = vmatpush1.bf16.msra.mxu0 %v7212_v11  ;;  %2467 = vmatpush1.bf16.msra.mxu1 %v7217_v12  ;;  %v8571_v12 = vld [vmem:[#allocation12_spill] sm:$0xff]  ;;  %v7539_v25 = vld [vmem:[%s8547_s2 + $0x84] ss:$16 sps:$4 sm:$0xff]  }
 0x33c   :  { %2427 = vmatprep.subr.bf16.mxu0 %v7224_v36  ;;  %2468 = vmatprep.subr.bf16.mxu1 %v7229_v14  ;;  %v7503_v36 = vld [vmem:[%s8547_s2 + $0x24] ss:$16 sps:$4 sm:$0xff]   ;;  %v7508_v14 = vld [vmem:[%s8547_s2 + $0x20] ss:$16 sps:$4 sm:$0xff]  }
 0x33d   :  { %v7467_v37 = vadd.f32 %v1917_v44, %v1916_v2 }
 0x33f   :  { %6226 = vtanh.f32 %v7467_v37  ;;  %2428 = vmatpush1.bf16.msra.mxu0 %v7237_v22  ;;  %2469 = vmatpush1.bf16.msra.mxu1 %v7242_v23  ;;  %v6225_v49 = vpop.eup %6224  ;;  %v7515_v22 = vld [vmem:[%s8547_s2 + $0x44] ss:$16 sps:$4 sm:$0xff]   ;;  %v7520_v23 = vld [vmem:[%s8547_s2 + $0x40] ss:$16 sps:$4 sm:$0xff]  }
 0x340   :  { %2429 = vmatprep.subr.bf16.mxu0 %v7249_v39  ;;  %2470 = vmatprep.subr.bf16.mxu1 %v7254_v24  ;;  %v7527_v39 = vld [vmem:[%s8547_s2 + $0x64] ss:$16 sps:$4 sm:$0xff]   ;;  %v7532_v24 = vld [vmem:[%s8547_s2 + $0x60] ss:$16 sps:$4 sm:$0xff]  }
 0x343   :  { %2430 = vmatpush1.bf16.msra.mxu0 %v7264_v33  ;;  %2471 = vmatpush1.bf16.msra.mxu1 %v7269_v26  ;;  %v7544_v33 = vld [vmem:[%s8547_s2 + $0x8c] ss:$16 sps:$4 sm:$0xff]   ;;  %v7549_v26 = vld [vmem:[%s8547_s2 + $0x80] ss:$16 sps:$4 sm:$0xff]  }
 0x344   :  { %2431 = vmatprep.subr.bf16.mxu0 %v7276_v34  ;;  %2472 = vmatprep.subr.bf16.mxu1 %v7281_v38  ;;  %v7555_v34 = vld [vmem:[%s8547_s2 + $0x88] ss:$16 sps:$4 sm:$0xff]   ;;  %v7563_v38 = vld [vmem:[%s8547_s2 + $0xa4] ss:$16 sps:$4 sm:$0xff]  }
 0x347   :  { %2432 = vmatpush1.bf16.msra.mxu0 %v7288_v42  ;;  %2473 = vmatpush1.bf16.msra.mxu1 %v7293_v45  ;;  %v7568_v42 = vld [vmem:[%s8547_s2 + $0xac] ss:$16 sps:$4 sm:$0xff]   ;;  %v7573_v45 = vld [vmem:[%s8547_s2 + $0xa0] ss:$16 sps:$4 sm:$0xff]  }
 0x348   :  { %2433 = vmatprep.subr.bf16.mxu0 %v7300_v47  ;;  %2474 = vmatprep.subr.bf16.mxu1 %v7305_v48  ;;  %v7578_v47 = vld [vmem:[%s8547_s2 + $0xa8] ss:$16 sps:$4 sm:$0xff]   ;;  %v7587_v48 = vld [vmem:[%s8547_s2 + $0xc4] ss:$16 sps:$4 sm:$0xff]  }
 0x349   :  { %v6227_v50 = vpop.eup %6226 }
 0x34a   :  { %v1920_v51 = vmul.f32 %v6227_v50, %v6225_v49  ;;  %v5384_v50 = vld [vmem:[%s8546_s1 + $0x60] sm:$0xff] }
 0x34b   :  { %2434 = vmatpush1.bf16.msra.mxu0 %v7312_v10  ;;  %2475 = vmatpush1.bf16.msra.mxu1 %v7317_v13  ;;  %v7592_v10 = vld [vmem:[%s8547_s2 + $0xcc] ss:$16 sps:$4 sm:$0xff]   ;;  %v7597_v13 = vld [vmem:[%s8547_s2 + $0xc0] ss:$16 sps:$4 sm:$0xff]  }
 0x34c   :  { %v7485_v54 = vadd.f32 %v1920_v51, %v8570_v53  ;;  %v2226_v11 = vpack.c.bf16 %v1920_v51, %v1920_v51  ;;  %2768 = vmatprep.subr.bf16.mxu0 %v7332_v15  ;;  %2809 = vmatprep.subr.bf16.mxu1 %v7337_v16  ;;  %v7611_v15 = vld [vmem:[%s8547_s2 + $0xe4] ss:$16 sps:$4 sm:$0xff]   ;;  %v7616_v16 = vld [vmem:[%s8547_s2 + $0xec] ss:$16 sps:$4 sm:$0xff]  }
 0x34d   :  { %v5385_v51 = vld [vmem:[%s8546_s1 + $0x68] sm:$0xff] }
 0x34e   :  { %1934 = vst [vmem:[#allocation8 + $0x18] sm:$0xff] %v7485_v54  ;;  %2452 = vmatmul.mubr.bf16.vlgmr.msra.gmra.mrb[28].mxu0 %v2226_v11  ;;  %2493 = vmatmul.mubr.bf16.vlgmr.msra.gmra.mrb[28].mxu1 %v2226_v11 }
 0x34f   :  { %2769 = vmatpush1.bf16.msra.mxu0 %v7342_v46  ;;  %2810 = vmatpush1.bf16.msra.mxu1 %v8571_v12  ;;  %v7621_v46 = vld [vmem:[%s8547_s2 + $0xe0] ss:$16 sps:$4 sm:$0xff]  }
 0x350   :  { %2811 = vmatprep.subr.bf16.mxu1 %v7357_v21  ;;  %2800 = vmatprep.mubr.bf16.mxu0 %v8565_v59  ;;  %v7635_v21 = vld [vmem:[%s8548_s3 + $0x4] ss:$16 sps:$4 sm:$0xff]  }
 0x351   :  { %2841 = vmatprep.mubr.bf16.mxu1 %v8565_v59  ;;  %2770 = vmatprep.subr.bf16.mxu0 %v7503_v36 }
 0x353   :  { %2812 = vmatpush1.bf16.msra.mxu1 %v7362_v18  ;;  %2771 = vmatpush1.bf16.msra.mxu0 %v7508_v14  ;;  %v7602_v18 = vld [vmem:[%s8547_s2 + $0xc8] ss:$16 sps:$4 sm:$0xff]  }
 0x354   :  { %2813 = vmatprep.subr.bf16.mxu1 %v7371_v55  ;;  %2772 = vmatprep.subr.bf16.mxu0 %v7515_v22  ;;  %v7640_v55 = vld [vmem:[%s8548_s3 + $0xc] ss:$16 sps:$4 sm:$0xff]  }
 0x357   :  { %2814 = vmatpush1.bf16.msra.mxu1 %v7376_v17  ;;  %2773 = vmatpush1.bf16.msra.mxu0 %v7520_v23  ;;  %v7626_v17 = vld [vmem:[%s8547_s2 + $0xe8] ss:$16 sps:$4 sm:$0xff]  }
 0x358   :  { %2815 = vmatprep.subr.bf16.mxu1 %v7385_v56  ;;  %2774 = vmatprep.subr.bf16.mxu0 %v7527_v39  ;;  %v5348_v56 = vld [vmem:[%s8545_s0 + $0x60] sm:$0xff] }
 0x35b   :  { %2816 = vmatpush1.bf16.msra.mxu1 %v7390_v57  ;;  %2775 = vmatpush1.bf16.msra.mxu0 %v7532_v24  ;;  %v5349_v57 = vld [vmem:[%s8545_s0 + $0x68] sm:$0xff] }
 0x35c   :  { %2776 = vmatprep.subr.bf16.mxu0 %v7539_v25  ;;  %2817 = vmatprep.subr.bf16.mxu1 %v7544_v33 }
 0x35f   :  { %2777 = vmatpush1.bf16.msra.mxu0 %v7549_v26  ;;  %2818 = vmatpush1.bf16.msra.mxu1 %v7555_v34 }
 0x360   :  { %2778 = vmatprep.subr.bf16.mxu0 %v7563_v38  ;;  %2819 = vmatprep.subr.bf16.mxu1 %v7568_v42 }
 0x363   :  { %2779 = vmatpush1.bf16.msra.mxu0 %v7573_v45  ;;  %2820 = vmatpush1.bf16.msra.mxu1 %v7578_v47 }
 0x364   :  { %2780 = vmatprep.subr.bf16.mxu0 %v7587_v48  ;;  %2821 = vmatprep.subr.bf16.mxu1 %v7592_v10 }
 0x367   :  { %2781 = vmatpush1.bf16.msra.mxu0 %v7597_v13  ;;  %2822 = vmatpush1.bf16.msra.mxu1 %v7602_v18 }
 0x368   :  { %2782 = vmatprep.subr.bf16.mxu0 %v7611_v15  ;;  %2823 = vmatprep.subr.bf16.mxu1 %v7616_v16 }
 0x36b   :  { %2783 = vmatpush1.bf16.msra.mxu0 %v7621_v46  ;;  %2824 = vmatpush1.bf16.msra.mxu1 %v7626_v17 }
 0x36c   :  { %3053 = vmatprep.subr.bf16.mxu0 %v7635_v21  ;;  %3094 = vmatprep.subr.bf16.mxu1 %v7640_v55 }
 0x401   :  { %v2168_v1 = vpop.f32.mrb[24].mxu0  ;;  %v2209_v5 = vpop.f32.mrb[24].mxu1 }
 0x402   :  { %v2216_v7 = vadd.f32 %v5348_v56, %v2168_v1  ;;  %v2170_v8 = vpop.f32.mrb[25].mxu0  ;;  %v2211_v9 = vpop.f32.mrb[25].mxu1  ;;  %v2218_v3 = vadd.f32 %v5350_v62, %v2209_v5 }
 0x403   :  { %v2217_v19 = vadd.f32 %v5349_v57, %v2170_v8  ;;  %v2172_v60 = vpop.f32.mrb[26].mxu0  ;;  %v2213_v61 = vpop.f32.mrb[26].mxu1  ;;  %v2219_v32 = vadd.f32 %v5351_v29, %v2211_v9 }
 0x404   :  { %v5420_v63 = vmul.f32 -1.442695, %v2216_v7  ;;  %v2173_v28 = vpop.f32.mrb[27].mxu0  ;;  %v2214_v30 = vpop.f32.mrb[27].mxu1  ;;  %v5387_v61 = vld [vmem:[%s8546_s1 + $0x78] sm:$0xff] }
 0x405   :  { %v5421_v31 = vmul.f32 -1.442695, %v2217_v19  ;;  %v5422_v35 = vmul.f32 -1.442695, %v2219_v32  ;;  %v5386_v28 = vld [vmem:[%s8546_s1 + $0x70] sm:$0xff] }
 0x406   :  { %6228 = vpow2.f32 %v5420_v63 }
 0x407   :  { %6230 = vpow2.f32 %v5421_v31 }
 0x408   :  { %6232 = vpow2.f32 %v5422_v35  ;;  %v7675_v35 = vld [vmem:[%s8548_s3] ss:$16 sps:$4 sm:$0xff]  }
 0x409   :  { %6234 = vtanh.f32 %v2218_v3  ;;  %v7680_v3 = vld [vmem:[%s8548_s3 + $0x8] ss:$16 sps:$4 sm:$0xff]  }
 0x410   :  { %v6229_v4 = vpop.eup %6228 }
 0x411   :  { %v6231_v6 = vpop.eup %6230  ;;  %v2512_v52 = vadd.f32 1.0, %v6229_v4 }
 0x412   :  { %v2513_v40 = vadd.f32 1.0, %v6231_v6  ;;  %v6233_v41 = vpop.eup %6232 }
 0x413   :  { %6236 = vrcp.f32 %v2512_v52  ;;  %v6235_v27 = vpop.eup %6234  ;;  %v2522_v2 = vadd.f32 1.0, %v6233_v41  ;;  %v7693_v41 = vld [vmem:[%s8548_s3 + $0x2c] ss:$16 sps:$4 sm:$0xff]  }
 0x414   :  { %6238 = vrcp.f32 %v2513_v40  ;;  %v7688_v40 = vld [vmem:[%s8548_s3 + $0x24] ss:$16 sps:$4 sm:$0xff]  }
 0x415   :  { %6240 = vrcp.f32 %v2522_v2  ;;  %v7716_v2 = vld [vmem:[%s8548_s3 + $0x44] ss:$16 sps:$4 sm:$0xff]  }
 0x41d   :  { %v6237_v43 = vpop.eup %6236 }
 0x41e   :  { %v6239_v44 = vpop.eup %6238  ;;  %v2526_v20 = vmul.f32 %v6237_v43, %v6235_v27 }
 0x41f   :  { %v2525_v49 = vmul.f32 %v6239_v44, %v7432_v58  ;;  %v6241_v30 = vpop.eup %6240 }
 0x421   :  { %v7663_v53 = vadd.f32 %v2526_v20, %v2525_v49  ;;  %v2453_v11 = vpop.f32.mrb[28].mxu0  ;;  %v2494_v12 = vpop.f32.mrb[28].mxu1  ;;  %v7709_v20 = vld [vmem:[%s8548_s3 + $0x28] ss:$16 sps:$4 sm:$0xff]   ;;  %v7721_v49 = vld [vmem:[%s8548_s3 + $0x4c] ss:$16 sps:$4 sm:$0xff]  }
 0x422   :  { %v2501_v56 = vadd.f32 %v5384_v50, %v2453_v11  ;;  %v2455_v57 = vpop.f32.mrb[29].mxu0  ;;  %v2496_v1 = vpop.f32.mrb[29].mxu1  ;;  %v2503_v32 = vadd.f32 %v5386_v28, %v2494_v12  ;;  %v7730_v50 = vld [vmem:[%s8548_s3 + $0x40] ss:$16 sps:$4 sm:$0xff]   ;;  %v7742_v11 = vld [vmem:[%s8548_s3 + $0x64] ss:$16 sps:$4 sm:$0xff]  }
 0x423   :  { %6242 = vtanh.f32 %v7663_v53  ;;  %v2502_v5 = vadd.f32 %v5385_v51, %v2455_v57  ;;  %v2457_v58 = vpop.f32.mrb[30].mxu0  ;;  %v2498_v7 = vpop.f32.mrb[30].mxu1  ;;  %v2504_v63 = vadd.f32 %v5387_v61, %v2496_v1  ;;  %v7735_v51 = vld [vmem:[%s8548_s3 + $0x48] ss:$16 sps:$4 sm:$0xff]   ;;  %v7747_v12 = vld [vmem:[%s8548_s3 + $0x6c] ss:$16 sps:$4 sm:$0xff]  }
 0x424   :  { %v5423_v8 = vmul.f32 -1.442695, %v2501_v56  ;;  %v2458_v9 = vpop.f32.mrb[31].mxu0  ;;  %v2499_v19 = vpop.f32.mrb[31].mxu1  ;;  %v7754_v57 = vld [vmem:[%s8548_s3 + $0x60] ss:$16 sps:$4 sm:$0xff]  }
 0x425   :  { %v5424_v60 = vmul.f32 -1.442695, %v2502_v5  ;;  %v5425_v29 = vmul.f32 -1.442695, %v2504_v63  ;;  %v7759_v1 = vld [vmem:[%s8548_s3 + $0x68] ss:$16 sps:$4 sm:$0xff]  }
 0x426   :  { %6244 = vpow2.f32 %v5423_v8  ;;  %v7766_v58 = vld [vmem:[%s8548_s3 + $0x84] ss:$16 sps:$4 sm:$0xff]   ;;  %v7771_v7 = vld [vmem:[%s8548_s3 + $0x8c] ss:$16 sps:$4 sm:$0xff]   ;;  %v7779_v63 = vld [vmem:[%s8548_s3 + $0x80] ss:$16 sps:$4 sm:$0xff]  }
 0x427   :  { %6246 = vpow2.f32 %v5424_v60  ;;  %v7784_v28 = vld [vmem:[%s8548_s3 + $0x88] ss:$16 sps:$4 sm:$0xff]  }
 0x428   :  { %6248 = vpow2.f32 %v5425_v29  ;;  %v7806_v29 = vld [vmem:[%s8548_s3 + $0xa0] ss:$16 sps:$4 sm:$0xff]  }
 0x429   :  { %6250 = vtanh.f32 %v2503_v32  ;;  %v7811_v32 = vld [vmem:[%s8548_s3 + $0xa8] ss:$16 sps:$4 sm:$0xff]  }
 0x42d   :  { %v6243_v31 = vpop.eup %6242 }
 0x42e   :  { %v2529_v62 = vmul.f32 %v6243_v31, %v6241_v30  ;;  %v7796_v30 = vld [vmem:[%s8548_s3 + $0xac] ss:$16 sps:$4 sm:$0xff]  }
 0x430   :  { %v6245_v4 = vpop.eup %6244  ;;  %v7683_v6 = vadd.f32 %v2529_v62, %v7442_v0  ;;  %v2575_v52 = vpack.c.bf16 %v2529_v62, %v2529_v62  ;;  %v7704_v0 = vld [vmem:[%s8548_s3 + $0x20] ss:$16 sps:$4 sm:$0xff]   ;;  %v7818_v62 = vld [vmem:[%s8548_s3 + $0xc4] ss:$16 sps:$4 sm:$0xff]  }
 0x431   :  { %v6247_v27 = vpop.eup %6246  ;;  %v2537_v43 = vadd.f32 1.0, %v6245_v4  ;;  %v7823_v4 = vld [vmem:[%s8548_s3 + $0xcc] ss:$16 sps:$4 sm:$0xff]  }
 0x432   :  { %v2538_v44 = vadd.f32 1.0, %v6247_v27  ;;  %5426 = vst [vmem:[%s8549_s4 + $0x20] sm:$0xff] %v7683_v6  ;;  %2801 = vmatmul.mubr.bf16.vlgmr.msra.gmra.mrb[32].mxu0 %v2575_v52  ;;  %2842 = vmatmul.mubr.bf16.vlgmr.msra.gmra.mrb[32].mxu1 %v2575_v52  ;;  %v6249_v56 = vpop.eup %6248  ;;  %v7830_v52 = vld [vmem:[%s8548_s3 + $0xc0] ss:$16 sps:$4 sm:$0xff]   ;;  %v7835_v27 = vld [vmem:[%s8548_s3 + $0xc8] ss:$16 sps:$4 sm:$0xff]  }
 0x433   :  { %6252 = vrcp.f32 %v2537_v43  ;;  %3054 = vmatpush1.bf16.msra.mxu0 %v7675_v35  ;;  %3095 = vmatpush1.bf16.msra.mxu1 %v7680_v3  ;;  %v6251_v5 = vpop.eup %6250  ;;  %v2547_v60 = vadd.f32 1.0, %v6249_v56  ;;  %v7842_v43 = vld [vmem:[%s8548_s3 + $0xe4] ss:$16 sps:$4 sm:$0xff]   ;;  %v7854_v56 = vld [vmem:[%s8548_s3 + $0xe0] ss:$16 sps:$4 sm:$0xff]  }
 0x434   :  { %6254 = vrcp.f32 %v2538_v44  ;;  %3055 = vmatprep.subr.bf16.mxu0 %v7688_v40  ;;  %3096 = vmatprep.subr.bf16.mxu1 %v7693_v41  ;;  %v7847_v44 = vld [vmem:[%s8548_s3 + $0xec] ss:$16 sps:$4 sm:$0xff]  }
 0x435   :  { %3085 = vmatprep.mubr.bf16.mxu0 %v8565_v59  ;;  %3126 = vmatprep.mubr.bf16.mxu1 %v8565_v59  ;;  %6256 = vrcp.f32 %v2547_v60 }
 0x437   :  { %3056 = vmatpush1.bf16.msra.mxu0 %v7704_v0  ;;  %3097 = vmatpush1.bf16.msra.mxu1 %v7709_v20 }
 0x438   :  { %3057 = vmatprep.subr.bf16.mxu0 %v7716_v2  ;;  %3098 = vmatprep.subr.bf16.mxu1 %v7721_v49 }
 0x43b   :  { %3058 = vmatpush1.bf16.msra.mxu0 %v7730_v50  ;;  %3099 = vmatpush1.bf16.msra.mxu1 %v7735_v51 }
 0x43c   :  { %3059 = vmatprep.subr.bf16.mxu0 %v7742_v11  ;;  %3100 = vmatprep.subr.bf16.mxu1 %v7747_v12 }
 0x43d   :  { %v6253_v8 = vpop.eup %6252 }
 0x43e   :  { %v6255_v9 = vpop.eup %6254  ;;  %v2551_v19 = vmul.f32 %v6253_v8, %v6251_v5  ;;  %v7859_v5 = vld [vmem:[%s8548_s3 + $0xe8] ss:$16 sps:$4 sm:$0xff]  }
 0x43f   :  { %v2550_v61 = vmul.f32 %v6255_v9, %v7467_v37  ;;  %3060 = vmatpush1.bf16.msra.mxu0 %v7754_v57  ;;  %3101 = vmatpush1.bf16.msra.mxu1 %v7759_v1  ;;  %v7791_v37 = vld [vmem:[%s8548_s3 + $0xa4] ss:$16 sps:$4 sm:$0xff]   ;;  %v6257_v8 = vpop.eup %6256 }
 0x440   :  { %3061 = vmatprep.subr.bf16.mxu0 %v7766_v58  ;;  %3102 = vmatprep.subr.bf16.mxu1 %v7771_v7 }
 0x441   :  { %v7798_v31 = vadd.f32 %v2551_v19, %v2550_v61 }
 0x443   :  { %6258 = vtanh.f32 %v7798_v31  ;;  %3062 = vmatpush1.bf16.msra.mxu0 %v7779_v63  ;;  %3103 = vmatpush1.bf16.msra.mxu1 %v7784_v28 }
 0x444   :  { %3063 = vmatprep.subr.bf16.mxu0 %v7791_v37  ;;  %3104 = vmatprep.subr.bf16.mxu1 %v7796_v30 }
 0x447   :  { %3064 = vmatpush1.bf16.msra.mxu0 %v7806_v29  ;;  %3105 = vmatpush1.bf16.msra.mxu1 %v7811_v32 }
 0x448   :  { %3065 = vmatprep.subr.bf16.mxu0 %v7818_v62  ;;  %3106 = vmatprep.subr.bf16.mxu1 %v7823_v4 }
 0x44b   :  { %3066 = vmatpush1.bf16.msra.mxu0 %v7830_v52  ;;  %3107 = vmatpush1.bf16.msra.mxu1 %v7835_v27 }
 0x44c   :  { %3067 = vmatprep.subr.bf16.mxu0 %v7842_v43  ;;  %3108 = vmatprep.subr.bf16.mxu1 %v7847_v44 }
 0x44d   :  { %v6259_v9 = vpop.eup %6258 }
 0x44e   :  { %v2554_v19 = vmul.f32 %v6259_v9, %v6257_v8  ;;  %v7874_v8 = vld [vmem:[%s8547_s2 + $0x4] ss:$16 sps:$4 sm:$0xff]   ;;  %v7879_v9 = vld [vmem:[%s8547_s2 + $0xc] ss:$16 sps:$4 sm:$0xff]  }
 0x44f   :  { %3068 = vmatpush1.bf16.msra.mxu0 %v7854_v56  ;;  %3109 = vmatpush1.bf16.msra.mxu1 %v7859_v5 }
 0x450   :  { %v7866_v60 = vadd.f32 %v2554_v19, %v7485_v54  ;;  %v2860_v61 = vpack.c.bf16 %v2554_v19, %v2554_v19  ;;  %v7884_v54 = vld [vmem:[%s8547_s2] ss:$16 sps:$4 sm:$0xff]   ;;  %v7889_v19 = vld [vmem:[%s8547_s2 + $0x8] ss:$16 sps:$4 sm:$0xff]   ;;  %3402 = vmatprep.subr.bf16.mxu0 %v7874_v8  ;;  %3443 = vmatprep.subr.bf16.mxu1 %v7879_v9 }
 0x451   :  { %8573 = vst [vmem:[#allocation12_spill] sm:$0xff] %v7889_v19 }
 0x452   :  { %8572 = vst [vmem:[#allocation11_spill] sm:$0xff] %v7866_v60  ;;  %2568 = vst [vmem:[#allocation8 + $0x20] sm:$0xff] %v7866_v60  ;;  %3086 = vmatmul.mubr.bf16.vlgmr.msra.gmra.mrb[36].mxu0 %v2860_v61  ;;  %3127 = vmatmul.mubr.bf16.vlgmr.msra.gmra.mrb[36].mxu1 %v2860_v61  ;;  %v7899_v61 = vld [vmem:[%s8547_s2 + $0x2c] ss:$16 sps:$4 sm:$0xff]   ;;  %v7904_v60 = vld [vmem:[%s8547_s2 + $0x28] ss:$16 sps:$4 sm:$0xff]  }
 0x453   :  { %3434 = vmatprep.mubr.bf16.mxu0 %v8565_v59  ;;  %3475 = vmatprep.mubr.bf16.mxu1 %v8565_v59 }
 0x454   :  { %3403 = vmatpush1.bf16.msra.mxu0 %v7884_v54  ;;  %3444 = vmatpush1.bf16.msra.mxu1 %v7889_v19  ;;  %v7918_v19 = vld [vmem:[%s8547_s2 + $0x48] ss:$16 sps:$4 sm:$0xff]  }
 0x455   :  { %3404 = vmatprep.subr.bf16.mxu0 %v7503_v36  ;;  %3445 = vmatprep.subr.bf16.mxu1 %v7899_v61  ;;  %v7913_v36 = vld [vmem:[%s8547_s2 + $0x4c] ss:$16 sps:$4 sm:$0xff]  }
 0x458   :  { %3405 = vmatpush1.bf16.msra.mxu0 %v7508_v14  ;;  %3446 = vmatpush1.bf16.msra.mxu1 %v7904_v60  ;;  %v7927_v14 = vld [vmem:[%s8547_s2 + $0x6c] ss:$16 sps:$4 sm:$0xff]  }
 0x459   :  { %3406 = vmatprep.subr.bf16.mxu0 %v7515_v22  ;;  %3447 = vmatprep.subr.bf16.mxu1 %v7913_v36  ;;  %v7932_v22 = vld [vmem:[%s8547_s2 + $0x68] ss:$16 sps:$4 sm:$0xff]  }
 0x45c   :  { %3407 = vmatpush1.bf16.msra.mxu0 %v7520_v23  ;;  %3448 = vmatpush1.bf16.msra.mxu1 %v7918_v19  ;;  %v5427_v23 = vld [vmem:[%s8545_s0 + $0x80] sm:$0xff] }
 0x45d   :  { %3408 = vmatprep.subr.bf16.mxu0 %v7527_v39  ;;  %3449 = vmatprep.subr.bf16.mxu1 %v7927_v14  ;;  %v5428_v39 = vld [vmem:[%s8545_s0 + $0x88] sm:$0xff] }
 0x460   :  { %3409 = vmatpush1.bf16.msra.mxu0 %v7532_v24  ;;  %3450 = vmatpush1.bf16.msra.mxu1 %v7932_v22 }
 0x461   :  { %3410 = vmatprep.subr.bf16.mxu0 %v7539_v25  ;;  %3451 = vmatprep.subr.bf16.mxu1 %v7544_v33 }
 0x464   :  { %3411 = vmatpush1.bf16.msra.mxu0 %v7549_v26  ;;  %3452 = vmatpush1.bf16.msra.mxu1 %v7555_v34 }
 0x465   :  { %3412 = vmatprep.subr.bf16.mxu0 %v7563_v38  ;;  %3453 = vmatprep.subr.bf16.mxu1 %v7568_v42 }
 0x468   :  { %3413 = vmatpush1.bf16.msra.mxu0 %v7573_v45  ;;  %3454 = vmatpush1.bf16.msra.mxu1 %v7578_v47 }
 0x469   :  { %3414 = vmatprep.subr.bf16.mxu0 %v7587_v48  ;;  %3455 = vmatprep.subr.bf16.mxu1 %v7592_v10 }
 0x46c   :  { %3415 = vmatpush1.bf16.msra.mxu0 %v7597_v13  ;;  %3456 = vmatpush1.bf16.msra.mxu1 %v7602_v18  ;;  %v5430_v18 = vld [vmem:[%s8545_s0 + $0x98] sm:$0xff] }
 0x46d   :  { %3416 = vmatprep.subr.bf16.mxu0 %v7611_v15  ;;  %3457 = vmatprep.subr.bf16.mxu1 %v7616_v16  ;;  %v5429_v16 = vld [vmem:[%s8545_s0 + $0x90] sm:$0xff] }
 0x470   :  { %3417 = vmatpush1.bf16.msra.mxu0 %v7621_v46  ;;  %3458 = vmatpush1.bf16.msra.mxu1 %v7626_v17 }
 0x471   :  { %3687 = vmatprep.subr.bf16.mxu0 %v7635_v21  ;;  %3728 = vmatprep.subr.bf16.mxu1 %v7640_v55 }
 0x505   :  { %v2802_v24 = vpop.f32.mrb[32].mxu0  ;;  %v2843_v25 = vpop.f32.mrb[32].mxu1 }
 0x506   :  { %v2850_v33 = vadd.f32 %v5427_v23, %v2802_v24  ;;  %v2804_v26 = vpop.f32.mrb[33].mxu0  ;;  %v2845_v34 = vpop.f32.mrb[33].mxu1  ;;  %v2852_v17 = vadd.f32 %v5429_v16, %v2843_v25  ;;  %v5463_v25 = vld [vmem:[%s8546_s1 + $0x80] sm:$0xff] }
 0x507   :  { %v2851_v38 = vadd.f32 %v5428_v39, %v2804_v26  ;;  %v2806_v42 = vpop.f32.mrb[34].mxu0  ;;  %v2847_v45 = vpop.f32.mrb[34].mxu1  ;;  %v2853_v15 = vadd.f32 %v5430_v18, %v2845_v34 }
 0x508   :  { %v5499_v47 = vmul.f32 -1.442695, %v2850_v33  ;;  %v2807_v48 = vpop.f32.mrb[35].mxu0  ;;  %v2848_v10 = vpop.f32.mrb[35].mxu1 }
 0x509   :  { %v5500_v13 = vmul.f32 -1.442695, %v2851_v38  ;;  %v5501_v46 = vmul.f32 -1.442695, %v2853_v15 }
 0x50a   :  { %6260 = vpow2.f32 %v5499_v47  ;;  %v5464_v47 = vld [vmem:[%s8546_s1 + $0x88] sm:$0xff] }
 0x50b   :  { %6262 = vpow2.f32 %v5500_v13 }
 0x50c   :  { %6264 = vpow2.f32 %v5501_v46 }
 0x50d   :  { %6266 = vtanh.f32 %v2852_v17 }
 0x514   :  { %v6261_v21 = vpop.eup %6260 }
 0x515   :  { %v6263_v55 = vpop.eup %6262  ;;  %v3146_v23 = vadd.f32 1.0, %v6261_v21 }
 0x516   :  { %v3147_v39 = vadd.f32 1.0, %v6263_v55  ;;  %v6265_v24 = vpop.eup %6264 }
 0x517   :  { %6268 = vrcp.f32 %v3146_v23  ;;  %v6267_v33 = vpop.eup %6266  ;;  %v3156_v34 = vadd.f32 1.0, %v6265_v24  ;;  %v5466_v24 = vld [vmem:[%s8546_s1 + $0x98] sm:$0xff] }
 0x518   :  { %6270 = vrcp.f32 %v3147_v39 }
 0x519   :  { %6272 = vrcp.f32 %v3156_v34 }
 0x521   :  { %v6269_v26 = vpop.eup %6268 }
 0x522   :  { %v6271_v38 = vpop.eup %6270  ;;  %v3160_v42 = vmul.f32 %v6269_v26, %v6267_v33  ;;  %v5465_v26 = vld [vmem:[%s8546_s1 + $0x90] sm:$0xff] }
 0x523   :  { %v3159_v45 = vmul.f32 %v6271_v38, %v7663_v53  ;;  %v6273_v38 = vpop.eup %6272 }
 0x525   :  { %v7974_v48 = vadd.f32 %v3160_v42, %v3159_v45  ;;  %v3087_v10 = vpop.f32.mrb[36].mxu0  ;;  %v3128_v13 = vpop.f32.mrb[36].mxu1 }
 0x526   :  { %v3135_v18 = vadd.f32 %v5463_v25, %v3087_v10  ;;  %v3089_v15 = vpop.f32.mrb[37].mxu0  ;;  %v3130_v16 = vpop.f32.mrb[37].mxu1  ;;  %v3137_v45 = vadd.f32 %v5465_v26, %v3128_v13 }
 0x527   :  { %6274 = vtanh.f32 %v7974_v48  ;;  %v3136_v46 = vadd.f32 %v5464_v47, %v3089_v15  ;;  %v3091_v53 = vpop.f32.mrb[38].mxu0  ;;  %v3132_v17 = vpop.f32.mrb[38].mxu1  ;;  %v3138_v33 = vadd.f32 %v5466_v24, %v3130_v16 }
 0x528   :  { %v5502_v21 = vmul.f32 -1.442695, %v3135_v18  ;;  %v3092_v55 = vpop.f32.mrb[39].mxu0  ;;  %v3133_v23 = vpop.f32.mrb[39].mxu1 }
 0x529   :  { %v5503_v39 = vmul.f32 -1.442695, %v3136_v46  ;;  %v5504_v34 = vmul.f32 -1.442695, %v3138_v33 }
 0x52a   :  { %6276 = vpow2.f32 %v5502_v21 }
 0x52b   :  { %6278 = vpow2.f32 %v5503_v39 }
 0x52c   :  { %6280 = vpow2.f32 %v5504_v34  ;;  %v5509_v34 = vld [vmem:[%s8545_s0 + $0xb8] sm:$0xff] }
 0x52d   :  { %6282 = vtanh.f32 %v3137_v45 }
 0x531   :  { %v6275_v42 = vpop.eup %6274 }
 0x532   :  { %v3163_v25 = vmul.f32 %v6275_v42, %v6273_v38 }
 0x534   :  { %v6277_v47 = vpop.eup %6276  ;;  %v7984_v10 = vadd.f32 %v3163_v25, %v7683_v6  ;;  %v3209_v18 = vpack.c.bf16 %v3163_v25, %v3163_v25  ;;  %v5508_v25 = vld [vmem:[%s8545_s0 + $0xb0] sm:$0xff] }
 0x535   :  { %v6279_v15 = vpop.eup %6278  ;;  %v3171_v46 = vadd.f32 1.0, %v6277_v47 }
 0x536   :  { %v3172_v53 = vadd.f32 1.0, %v6279_v15  ;;  %5505 = vst [vmem:[%s8549_s4 + $0x28] sm:$0xff] %v7984_v10  ;;  %3435 = vmatmul.mubr.bf16.vlgmr.msra.gmra.mrb[40].mxu0 %v3209_v18  ;;  %3476 = vmatmul.mubr.bf16.vlgmr.msra.gmra.mrb[40].mxu1 %v3209_v18 }
 0x537   :  { %6284 = vrcp.f32 %v3171_v46  ;;  %3688 = vmatpush1.bf16.msra.mxu0 %v7675_v35  ;;  %3729 = vmatpush1.bf16.msra.mxu1 %v7680_v3  ;;  %v6281_v35 = vpop.eup %6280 }
 0x538   :  { %6286 = vrcp.f32 %v3172_v53  ;;  %3689 = vmatprep.subr.bf16.mxu0 %v7688_v40  ;;  %3730 = vmatprep.subr.bf16.mxu1 %v7693_v41  ;;  %v6283_v3 = vpop.eup %6282 }
 0x539   :  { %3719 = vmatprep.mubr.bf16.mxu0 %v8565_v59  ;;  %3760 = vmatprep.mubr.bf16.mxu1 %v8565_v59 }
 0x53b   :  { %3690 = vmatpush1.bf16.msra.mxu0 %v7704_v0  ;;  %3731 = vmatpush1.bf16.msra.mxu1 %v7709_v20  ;;  %v3181_v0 = vadd.f32 1.0, %v6281_v35 }
 0x53c   :  { %3691 = vmatprep.subr.bf16.mxu0 %v7716_v2  ;;  %3732 = vmatprep.subr.bf16.mxu1 %v7721_v49 }
 0x53d   :  { %6288 = vrcp.f32 %v3181_v0 }
 0x53f   :  { %3692 = vmatpush1.bf16.msra.mxu0 %v7730_v50  ;;  %3733 = vmatpush1.bf16.msra.mxu1 %v7735_v51 }
 0x540   :  { %3693 = vmatprep.subr.bf16.mxu0 %v7742_v11  ;;  %3734 = vmatprep.subr.bf16.mxu1 %v7747_v12  ;;  %v8574_v11 = vld [vmem:[#allocation11_spill] sm:$0xff] }
 0x541   :  { %v6285_v6 = vpop.eup %6284 }
 0x542   :  { %v6287_v40 = vpop.eup %6286  ;;  %v3185_v41 = vmul.f32 %v6285_v6, %v6283_v3 }
 0x543   :  { %v3184_v20 = vmul.f32 %v6287_v40, %v7798_v31  ;;  %3694 = vmatpush1.bf16.msra.mxu0 %v7754_v57  ;;  %3735 = vmatpush1.bf16.msra.mxu1 %v7759_v1  ;;  %v8575_v1 = vld [vmem:[#allocation12_spill] sm:$0xff]  ;;  %v8081_v31 = vld [vmem:[%s8547_s2 + $0x84] ss:$16 sps:$4 sm:$0xff]  }
 0x544   :  { %3695 = vmatprep.subr.bf16.mxu0 %v7766_v58  ;;  %3736 = vmatprep.subr.bf16.mxu1 %v7771_v7  ;;  %v8045_v58 = vld [vmem:[%s8547_s2 + $0x24] ss:$16 sps:$4 sm:$0xff]   ;;  %v8050_v7 = vld [vmem:[%s8547_s2 + $0x20] ss:$16 sps:$4 sm:$0xff]  }
 0x545   :  { %v8009_v2 = vadd.f32 %v3185_v41, %v3184_v20 }
 0x547   :  { %6290 = vtanh.f32 %v8009_v2  ;;  %3696 = vmatpush1.bf16.msra.mxu0 %v7779_v63  ;;  %3737 = vmatpush1.bf16.msra.mxu1 %v7784_v28  ;;  %v6289_v49 = vpop.eup %6288  ;;  %v8057_v63 = vld [vmem:[%s8547_s2 + $0x44] ss:$16 sps:$4 sm:$0xff]   ;;  %v8062_v28 = vld [vmem:[%s8547_s2 + $0x40] ss:$16 sps:$4 sm:$0xff]  }
 0x548   :  { %3697 = vmatprep.subr.bf16.mxu0 %v7791_v37  ;;  %3738 = vmatprep.subr.bf16.mxu1 %v7796_v30  ;;  %v8069_v37 = vld [vmem:[%s8547_s2 + $0x64] ss:$16 sps:$4 sm:$0xff]   ;;  %v8074_v30 = vld [vmem:[%s8547_s2 + $0x60] ss:$16 sps:$4 sm:$0xff]  }
 0x54b   :  { %3698 = vmatpush1.bf16.msra.mxu0 %v7806_v29  ;;  %3739 = vmatpush1.bf16.msra.mxu1 %v7811_v32  ;;  %v8086_v29 = vld [vmem:[%s8547_s2 + $0x8c] ss:$16 sps:$4 sm:$0xff]   ;;  %v8091_v32 = vld [vmem:[%s8547_s2 + $0x80] ss:$16 sps:$4 sm:$0xff]  }
 0x54c   :  { %3699 = vmatprep.subr.bf16.mxu0 %v7818_v62  ;;  %3740 = vmatprep.subr.bf16.mxu1 %v7823_v4  ;;  %v8097_v62 = vld [vmem:[%s8547_s2 + $0x88] ss:$16 sps:$4 sm:$0xff]   ;;  %v8105_v4 = vld [vmem:[%s8547_s2 + $0xa4] ss:$16 sps:$4 sm:$0xff]  }
 0x54f   :  { %3700 = vmatpush1.bf16.msra.mxu0 %v7830_v52  ;;  %3741 = vmatpush1.bf16.msra.mxu1 %v7835_v27  ;;  %v8110_v52 = vld [vmem:[%s8547_s2 + $0xac] ss:$16 sps:$4 sm:$0xff]   ;;  %v8115_v27 = vld [vmem:[%s8547_s2 + $0xa0] ss:$16 sps:$4 sm:$0xff]  }
 0x550   :  { %3701 = vmatprep.subr.bf16.mxu0 %v7842_v43  ;;  %3742 = vmatprep.subr.bf16.mxu1 %v7847_v44  ;;  %v8120_v43 = vld [vmem:[%s8547_s2 + $0xa8] ss:$16 sps:$4 sm:$0xff]   ;;  %v8129_v44 = vld [vmem:[%s8547_s2 + $0xc4] ss:$16 sps:$4 sm:$0xff]  }
 0x551   :  { %v6291_v50 = vpop.eup %6290 }
 0x552   :  { %v3188_v51 = vmul.f32 %v6291_v50, %v6289_v49  ;;  %v5542_v50 = vld [vmem:[%s8546_s1 + $0xa0] sm:$0xff] }
 0x553   :  { %3702 = vmatpush1.bf16.msra.mxu0 %v7854_v56  ;;  %3743 = vmatpush1.bf16.msra.mxu1 %v7859_v5  ;;  %v8134_v56 = vld [vmem:[%s8547_s2 + $0xcc] ss:$16 sps:$4 sm:$0xff]   ;;  %v8139_v5 = vld [vmem:[%s8547_s2 + $0xc0] ss:$16 sps:$4 sm:$0xff]  }
 0x554   :  { %v8027_v12 = vadd.f32 %v3188_v51, %v8574_v11  ;;  %v3494_v57 = vpack.c.bf16 %v3188_v51, %v3188_v51  ;;  %4036 = vmatprep.subr.bf16.mxu0 %v7874_v8  ;;  %4077 = vmatprep.subr.bf16.mxu1 %v7879_v9  ;;  %v8153_v8 = vld [vmem:[%s8547_s2 + $0xe4] ss:$16 sps:$4 sm:$0xff]   ;;  %v8158_v9 = vld [vmem:[%s8547_s2 + $0xec] ss:$16 sps:$4 sm:$0xff]  }
 0x555   :  { %v5543_v51 = vld [vmem:[%s8546_s1 + $0xa8] sm:$0xff] }
 0x556   :  { %3202 = vst [vmem:[#allocation8 + $0x28] sm:$0xff] %v8027_v12  ;;  %3720 = vmatmul.mubr.bf16.vlgmr.msra.gmra.mrb[44].mxu0 %v3494_v57  ;;  %3761 = vmatmul.mubr.bf16.vlgmr.msra.gmra.mrb[44].mxu1 %v3494_v57 }
 0x557   :  { %4037 = vmatpush1.bf16.msra.mxu0 %v7884_v54  ;;  %4078 = vmatpush1.bf16.msra.mxu1 %v8575_v1  ;;  %v8163_v54 = vld [vmem:[%s8547_s2 + $0xe0] ss:$16 sps:$4 sm:$0xff]  }
 0x558   :  { %4079 = vmatprep.subr.bf16.mxu1 %v7899_v61  ;;  %4068 = vmatprep.mubr.bf16.mxu0 %v8565_v59  ;;  %v8177_v61 = vld [vmem:[%s8548_s3 + $0x4] ss:$16 sps:$4 sm:$0xff]  }
 0x559   :  { %4109 = vmatprep.mubr.bf16.mxu1 %v8565_v59  ;;  %4038 = vmatprep.subr.bf16.mxu0 %v8045_v58 }
 0x55b   :  { %4080 = vmatpush1.bf16.msra.mxu1 %v7904_v60  ;;  %4039 = vmatpush1.bf16.msra.mxu0 %v8050_v7  ;;  %v8144_v60 = vld [vmem:[%s8547_s2 + $0xc8] ss:$16 sps:$4 sm:$0xff]  }
 0x55c   :  { %4081 = vmatprep.subr.bf16.mxu1 %v7913_v36  ;;  %4040 = vmatprep.subr.bf16.mxu0 %v8057_v63  ;;  %v8182_v36 = vld [vmem:[%s8548_s3 + $0xc] ss:$16 sps:$4 sm:$0xff]  }
 0x55f   :  { %4082 = vmatpush1.bf16.msra.mxu1 %v7918_v19  ;;  %4041 = vmatpush1.bf16.msra.mxu0 %v8062_v28  ;;  %v8168_v19 = vld [vmem:[%s8547_s2 + $0xe8] ss:$16 sps:$4 sm:$0xff]  }
 0x560   :  { %4083 = vmatprep.subr.bf16.mxu1 %v7927_v14  ;;  %4042 = vmatprep.subr.bf16.mxu0 %v8069_v37  ;;  %v5506_v14 = vld [vmem:[%s8545_s0 + $0xa0] sm:$0xff] }
 0x563   :  { %4084 = vmatpush1.bf16.msra.mxu1 %v7932_v22  ;;  %4043 = vmatpush1.bf16.msra.mxu0 %v8074_v30  ;;  %v5507_v22 = vld [vmem:[%s8545_s0 + $0xa8] sm:$0xff] }
 0x564   :  { %4044 = vmatprep.subr.bf16.mxu0 %v8081_v31  ;;  %4085 = vmatprep.subr.bf16.mxu1 %v8086_v29 }
 0x567   :  { %4045 = vmatpush1.bf16.msra.mxu0 %v8091_v32  ;;  %4086 = vmatpush1.bf16.msra.mxu1 %v8097_v62 }
 0x568   :  { %4046 = vmatprep.subr.bf16.mxu0 %v8105_v4  ;;  %4087 = vmatprep.subr.bf16.mxu1 %v8110_v52 }
 0x56b   :  { %4047 = vmatpush1.bf16.msra.mxu0 %v8115_v27  ;;  %4088 = vmatpush1.bf16.msra.mxu1 %v8120_v43 }
 0x56c   :  { %4048 = vmatprep.subr.bf16.mxu0 %v8129_v44  ;;  %4089 = vmatprep.subr.bf16.mxu1 %v8134_v56 }
 0x56f   :  { %4049 = vmatpush1.bf16.msra.mxu0 %v8139_v5  ;;  %4090 = vmatpush1.bf16.msra.mxu1 %v8144_v60 }
 0x570   :  { %4050 = vmatprep.subr.bf16.mxu0 %v8153_v8  ;;  %4091 = vmatprep.subr.bf16.mxu1 %v8158_v9 }
 0x573   :  { %4051 = vmatpush1.bf16.msra.mxu0 %v8163_v54  ;;  %4092 = vmatpush1.bf16.msra.mxu1 %v8168_v19 }
 0x574   :  { %4321 = vmatprep.subr.bf16.mxu0 %v8177_v61  ;;  %4362 = vmatprep.subr.bf16.mxu1 %v8182_v36 }
 0x609   :  { %v3436_v13 = vpop.f32.mrb[40].mxu0  ;;  %v3477_v16 = vpop.f32.mrb[40].mxu1 }
 0x60a   :  { %v3484_v17 = vadd.f32 %v5506_v14, %v3436_v13  ;;  %v3438_v21 = vpop.f32.mrb[41].mxu0  ;;  %v3479_v55 = vpop.f32.mrb[41].mxu1  ;;  %v3486_v18 = vadd.f32 %v5508_v25, %v3477_v16 }
 0x60b   :  { %v3485_v23 = vadd.f32 %v5507_v22, %v3438_v21  ;;  %v3440_v39 = vpop.f32.mrb[42].mxu0  ;;  %v3481_v24 = vpop.f32.mrb[42].mxu1  ;;  %v3487_v45 = vadd.f32 %v5509_v34, %v3479_v55 }
 0x60c   :  { %v5578_v33 = vmul.f32 -1.442695, %v3484_v17  ;;  %v3441_v26 = vpop.f32.mrb[43].mxu0  ;;  %v3482_v38 = vpop.f32.mrb[43].mxu1  ;;  %v5545_v24 = vld [vmem:[%s8546_s1 + $0xb8] sm:$0xff] }
 0x60d   :  { %v5579_v42 = vmul.f32 -1.442695, %v3485_v23  ;;  %v5580_v47 = vmul.f32 -1.442695, %v3487_v45  ;;  %v5544_v26 = vld [vmem:[%s8546_s1 + $0xb0] sm:$0xff] }
 0x60e   :  { %6292 = vpow2.f32 %v5578_v33 }
 0x60f   :  { %6294 = vpow2.f32 %v5579_v42 }
 0x610   :  { %6296 = vpow2.f32 %v5580_v47  ;;  %v8217_v47 = vld [vmem:[%s8548_s3] ss:$16 sps:$4 sm:$0xff]  }
 0x611   :  { %6298 = vtanh.f32 %v3486_v18  ;;  %v8222_v18 = vld [vmem:[%s8548_s3 + $0x8] ss:$16 sps:$4 sm:$0xff]  }
 0x618   :  { %v6293_v15 = vpop.eup %6292 }
 0x619   :  { %v6295_v46 = vpop.eup %6294  ;;  %v3780_v53 = vadd.f32 1.0, %v6293_v15 }
 0x61a   :  { %v3781_v35 = vadd.f32 1.0, %v6295_v46  ;;  %v6297_v3 = vpop.eup %6296 }
 0x61b   :  { %6300 = vrcp.f32 %v3780_v53  ;;  %v6299_v6 = vpop.eup %6298  ;;  %v3790_v20 = vadd.f32 1.0, %v6297_v3  ;;  %v8235_v3 = vld [vmem:[%s8548_s3 + $0x2c] ss:$16 sps:$4 sm:$0xff]  }
 0x61c   :  { %6302 = vrcp.f32 %v3781_v35  ;;  %v8230_v35 = vld [vmem:[%s8548_s3 + $0x24] ss:$16 sps:$4 sm:$0xff]  }
 0x61d   :  { %6304 = vrcp.f32 %v3790_v20  ;;  %v8258_v20 = vld [vmem:[%s8548_s3 + $0x44] ss:$16 sps:$4 sm:$0xff]  }
 0x625   :  { %v6301_v40 = vpop.eup %6300 }
 0x626   :  { %v6303_v41 = vpop.eup %6302  ;;  %v3794_v0 = vmul.f32 %v6301_v40, %v6299_v6 }
 0x627   :  { %v3793_v49 = vmul.f32 %v6303_v41, %v7974_v48  ;;  %v6305_v38 = vpop.eup %6304 }
 0x629   :  { %v8205_v11 = vadd.f32 %v3794_v0, %v3793_v49  ;;  %v3721_v57 = vpop.f32.mrb[44].mxu0  ;;  %v3762_v1 = vpop.f32.mrb[44].mxu1  ;;  %v8251_v0 = vld [vmem:[%s8548_s3 + $0x28] ss:$16 sps:$4 sm:$0xff]   ;;  %v8263_v49 = vld [vmem:[%s8548_s3 + $0x4c] ss:$16 sps:$4 sm:$0xff]  }
 0x62a   :  { %v3769_v14 = vadd.f32 %v5542_v50, %v3721_v57  ;;  %v3723_v22 = vpop.f32.mrb[45].mxu0  ;;  %v3764_v13 = vpop.f32.mrb[45].mxu1  ;;  %v3771_v45 = vadd.f32 %v5544_v26, %v3762_v1  ;;  %v8272_v50 = vld [vmem:[%s8548_s3 + $0x40] ss:$16 sps:$4 sm:$0xff]   ;;  %v8284_v57 = vld [vmem:[%s8548_s3 + $0x64] ss:$16 sps:$4 sm:$0xff]  }
 0x62b   :  { %6306 = vtanh.f32 %v8205_v11  ;;  %v3770_v16 = vadd.f32 %v5543_v51, %v3723_v22  ;;  %v3725_v48 = vpop.f32.mrb[46].mxu0  ;;  %v3766_v17 = vpop.f32.mrb[46].mxu1  ;;  %v3772_v33 = vadd.f32 %v5545_v24, %v3764_v13  ;;  %v8277_v51 = vld [vmem:[%s8548_s3 + $0x48] ss:$16 sps:$4 sm:$0xff]   ;;  %v8289_v1 = vld [vmem:[%s8548_s3 + $0x6c] ss:$16 sps:$4 sm:$0xff]  }
 0x62c   :  { %v5581_v21 = vmul.f32 -1.442695, %v3769_v14  ;;  %v3726_v55 = vpop.f32.mrb[47].mxu0  ;;  %v3767_v23 = vpop.f32.mrb[47].mxu1  ;;  %v8296_v22 = vld [vmem:[%s8548_s3 + $0x60] ss:$16 sps:$4 sm:$0xff]  }
 0x62d   :  { %v5582_v39 = vmul.f32 -1.442695, %v3770_v16  ;;  %v5583_v34 = vmul.f32 -1.442695, %v3772_v33  ;;  %v8301_v13 = vld [vmem:[%s8548_s3 + $0x68] ss:$16 sps:$4 sm:$0xff]  }
 0x62e   :  { %6308 = vpow2.f32 %v5581_v21  ;;  %v8308_v48 = vld [vmem:[%s8548_s3 + $0x84] ss:$16 sps:$4 sm:$0xff]   ;;  %v8313_v17 = vld [vmem:[%s8548_s3 + $0x8c] ss:$16 sps:$4 sm:$0xff]   ;;  %v8321_v33 = vld [vmem:[%s8548_s3 + $0x80] ss:$16 sps:$4 sm:$0xff]  }
 0x62f   :  { %6310 = vpow2.f32 %v5582_v39  ;;  %v8326_v26 = vld [vmem:[%s8548_s3 + $0x88] ss:$16 sps:$4 sm:$0xff]  }
 0x630   :  { %6312 = vpow2.f32 %v5583_v34  ;;  %v8348_v34 = vld [vmem:[%s8548_s3 + $0xa0] ss:$16 sps:$4 sm:$0xff]  }
 0x631   :  { %6314 = vtanh.f32 %v3771_v45  ;;  %v8353_v45 = vld [vmem:[%s8548_s3 + $0xa8] ss:$16 sps:$4 sm:$0xff]  }
 0x635   :  { %v6307_v42 = vpop.eup %6306 }
 0x636   :  { %v3797_v25 = vmul.f32 %v6307_v42, %v6305_v38  ;;  %v8338_v38 = vld [vmem:[%s8548_s3 + $0xac] ss:$16 sps:$4 sm:$0xff]  }
 0x638   :  { %v6309_v15 = vpop.eup %6308  ;;  %v8225_v46 = vadd.f32 %v3797_v25, %v7984_v10  ;;  %v3843_v53 = vpack.c.bf16 %v3797_v25, %v3797_v25  ;;  %v8246_v10 = vld [vmem:[%s8548_s3 + $0x20] ss:$16 sps:$4 sm:$0xff]   ;;  %v8360_v25 = vld [vmem:[%s8548_s3 + $0xc4] ss:$16 sps:$4 sm:$0xff]  }
 0x639   :  { %v6311_v6 = vpop.eup %6310  ;;  %v3805_v40 = vadd.f32 1.0, %v6309_v15  ;;  %v8365_v15 = vld [vmem:[%s8548_s3 + $0xcc] ss:$16 sps:$4 sm:$0xff]  }
 0x63a   :  { %v3806_v41 = vadd.f32 1.0, %v6311_v6  ;;  %5584 = vst [vmem:[%s8549_s4 + $0x30] sm:$0xff] %v8225_v46  ;;  %4069 = vmatmul.mubr.bf16.vlgmr.msra.gmra.mrb[48].mxu0 %v3843_v53  ;;  %4110 = vmatmul.mubr.bf16.vlgmr.msra.gmra.mrb[48].mxu1 %v3843_v53  ;;  %v6313_v14 = vpop.eup %6312  ;;  %v8372_v53 = vld [vmem:[%s8548_s3 + $0xc0] ss:$16 sps:$4 sm:$0xff]   ;;  %v8377_v6 = vld [vmem:[%s8548_s3 + $0xc8] ss:$16 sps:$4 sm:$0xff]  }
 0x63b   :  { %6316 = vrcp.f32 %v3805_v40  ;;  %4322 = vmatpush1.bf16.msra.mxu0 %v8217_v47  ;;  %4363 = vmatpush1.bf16.msra.mxu1 %v8222_v18  ;;  %v6315_v16 = vpop.eup %6314  ;;  %v3815_v39 = vadd.f32 1.0, %v6313_v14  ;;  %v8384_v40 = vld [vmem:[%s8548_s3 + $0xe4] ss:$16 sps:$4 sm:$0xff]   ;;  %v8396_v14 = vld [vmem:[%s8548_s3 + $0xe0] ss:$16 sps:$4 sm:$0xff]  }
 0x63c   :  { %6318 = vrcp.f32 %v3806_v41  ;;  %4323 = vmatprep.subr.bf16.mxu0 %v8230_v35  ;;  %4364 = vmatprep.subr.bf16.mxu1 %v8235_v3  ;;  %v8389_v41 = vld [vmem:[%s8548_s3 + $0xec] ss:$16 sps:$4 sm:$0xff]  }
 0x63d   :  { %4353 = vmatprep.mubr.bf16.mxu0 %v8565_v59  ;;  %4394 = vmatprep.mubr.bf16.mxu1 %v8565_v59  ;;  %6320 = vrcp.f32 %v3815_v39 }
 0x63f   :  { %4324 = vmatpush1.bf16.msra.mxu0 %v8246_v10  ;;  %4365 = vmatpush1.bf16.msra.mxu1 %v8251_v0 }
 0x640   :  { %4325 = vmatprep.subr.bf16.mxu0 %v8258_v20  ;;  %4366 = vmatprep.subr.bf16.mxu1 %v8263_v49 }
 0x643   :  { %4326 = vmatpush1.bf16.msra.mxu0 %v8272_v50  ;;  %4367 = vmatpush1.bf16.msra.mxu1 %v8277_v51 }
 0x644   :  { %4327 = vmatprep.subr.bf16.mxu0 %v8284_v57  ;;  %4368 = vmatprep.subr.bf16.mxu1 %v8289_v1 }
 0x645   :  { %v6317_v21 = vpop.eup %6316 }
 0x646   :  { %v6319_v55 = vpop.eup %6318  ;;  %v3819_v23 = vmul.f32 %v6317_v21, %v6315_v16  ;;  %v8401_v16 = vld [vmem:[%s8548_s3 + $0xe8] ss:$16 sps:$4 sm:$0xff]  }
 0x647   :  { %v3818_v24 = vmul.f32 %v6319_v55, %v8009_v2  ;;  %4328 = vmatpush1.bf16.msra.mxu0 %v8296_v22  ;;  %4369 = vmatpush1.bf16.msra.mxu1 %v8301_v13  ;;  %v8333_v2 = vld [vmem:[%s8548_s3 + $0xa4] ss:$16 sps:$4 sm:$0xff]   ;;  %v6321_v21 = vpop.eup %6320 }
 0x648   :  { %4329 = vmatprep.subr.bf16.mxu0 %v8308_v48  ;;  %4370 = vmatprep.subr.bf16.mxu1 %v8313_v17 }
 0x649   :  { %v8340_v42 = vadd.f32 %v3819_v23, %v3818_v24 }
 0x64b   :  { %6322 = vtanh.f32 %v8340_v42  ;;  %4330 = vmatpush1.bf16.msra.mxu0 %v8321_v33  ;;  %4371 = vmatpush1.bf16.msra.mxu1 %v8326_v26 }
 0x64c   :  { %4331 = vmatprep.subr.bf16.mxu0 %v8333_v2  ;;  %4372 = vmatprep.subr.bf16.mxu1 %v8338_v38 }
 0x64f   :  { %4332 = vmatpush1.bf16.msra.mxu0 %v8348_v34  ;;  %4373 = vmatpush1.bf16.msra.mxu1 %v8353_v45 }
 0x650   :  { %4333 = vmatprep.subr.bf16.mxu0 %v8360_v25  ;;  %4374 = vmatprep.subr.bf16.mxu1 %v8365_v15 }
 0x653   :  { %4334 = vmatpush1.bf16.msra.mxu0 %v8372_v53  ;;  %4375 = vmatpush1.bf16.msra.mxu1 %v8377_v6 }
 0x654   :  { %4335 = vmatprep.subr.bf16.mxu0 %v8384_v40  ;;  %4376 = vmatprep.subr.bf16.mxu1 %v8389_v41 }
 0x655   :  { %v6323_v55 = vpop.eup %6322 }
 0x656   :  { %v3822_v23 = vmul.f32 %v6323_v55, %v6321_v21  ;;  %v6119_v21 = vld [vmem:[%s8547_s2 + $0x4] ss:$16 sps:$4 sm:$0xff]   ;;  %v6122_v55 = vld [vmem:[%s8547_s2 + $0xc] ss:$16 sps:$4 sm:$0xff]  }
 0x657   :  { %4336 = vmatpush1.bf16.msra.mxu0 %v8396_v14  ;;  %4377 = vmatpush1.bf16.msra.mxu1 %v8401_v16 }
 0x658   :  { %v8408_v39 = vadd.f32 %v3822_v23, %v8027_v12  ;;  %v4128_v24 = vpack.c.bf16 %v3822_v23, %v3822_v23  ;;  %v6117_v12 = vld [vmem:[%s8547_s2] ss:$16 sps:$4 sm:$0xff]   ;;  %v6120_v23 = vld [vmem:[%s8547_s2 + $0x8] ss:$16 sps:$4 sm:$0xff]   ;;  %4670 = vmatprep.subr.bf16.mxu0 %v6119_v21  ;;  %4711 = vmatprep.subr.bf16.mxu1 %v6122_v55  ;;  %v6128_v21 = vld [vmem:[%s8547_s2 + $0x4c] ss:$16 sps:$4 sm:$0xff]  }
 0x65a   :  { %8576 = vst [vmem:[#allocation11_spill] sm:$0xff] %v8408_v39  ;;  %3836 = vst [vmem:[#allocation8 + $0x30] sm:$0xff] %v8408_v39  ;;  %4354 = vmatmul.mubr.bf16.vlgmr.msra.gmra.mrb[52].mxu0 %v4128_v24  ;;  %4395 = vmatmul.mubr.bf16.vlgmr.msra.gmra.mrb[52].mxu1 %v4128_v24  ;;  %v6125_v24 = vld [vmem:[%s8547_s2 + $0x2c] ss:$16 sps:$4 sm:$0xff]   ;;  %v6123_v39 = vld [vmem:[%s8547_s2 + $0x28] ss:$16 sps:$4 sm:$0xff]  }
 0x65b   :  { %4702 = vmatprep.mubr.bf16.mxu0 %v8565_v59  ;;  %4743 = vmatprep.mubr.bf16.mxu1 %v8565_v59 }
 0x65c   :  { %4671 = vmatpush1.bf16.msra.mxu0 %v6117_v12  ;;  %4712 = vmatpush1.bf16.msra.mxu1 %v6120_v23 }
 0x65d   :  { %4672 = vmatprep.subr.bf16.mxu0 %v8045_v58  ;;  %4713 = vmatprep.subr.bf16.mxu1 %v6125_v24  ;;  %v6126_v58 = vld [vmem:[%s8547_s2 + $0x48] ss:$16 sps:$4 sm:$0xff]  }
 0x660   :  { %4673 = vmatpush1.bf16.msra.mxu0 %v8050_v7  ;;  %4714 = vmatpush1.bf16.msra.mxu1 %v6123_v39  ;;  %v6131_v7 = vld [vmem:[%s8547_s2 + $0x6c] ss:$16 sps:$4 sm:$0xff]  }
 0x661   :  { %4674 = vmatprep.subr.bf16.mxu0 %v8057_v63  ;;  %4715 = vmatprep.subr.bf16.mxu1 %v6128_v21  ;;  %v6129_v63 = vld [vmem:[%s8547_s2 + $0x68] ss:$16 sps:$4 sm:$0xff]  }
 0x664   :  { %4675 = vmatpush1.bf16.msra.mxu0 %v8062_v28  ;;  %4716 = vmatpush1.bf16.msra.mxu1 %v6126_v58  ;;  %v5585_v28 = vld [vmem:[%s8545_s0 + $0xc0] sm:$0xff] }
 0x665   :  { %4676 = vmatprep.subr.bf16.mxu0 %v8069_v37  ;;  %4717 = vmatprep.subr.bf16.mxu1 %v6131_v7  ;;  %v5586_v37 = vld [vmem:[%s8545_s0 + $0xc8] sm:$0xff] }
 0x668   :  { %4677 = vmatpush1.bf16.msra.mxu0 %v8074_v30  ;;  %4718 = vmatpush1.bf16.msra.mxu1 %v6129_v63 }
 0x669   :  { %4678 = vmatprep.subr.bf16.mxu0 %v8081_v31  ;;  %4719 = vmatprep.subr.bf16.mxu1 %v8086_v29 }
 0x66c   :  { %4679 = vmatpush1.bf16.msra.mxu0 %v8091_v32  ;;  %4720 = vmatpush1.bf16.msra.mxu1 %v8097_v62 }
 0x66d   :  { %4680 = vmatprep.subr.bf16.mxu0 %v8105_v4  ;;  %4721 = vmatprep.subr.bf16.mxu1 %v8110_v52 }
 0x670   :  { %4681 = vmatpush1.bf16.msra.mxu0 %v8115_v27  ;;  %4722 = vmatpush1.bf16.msra.mxu1 %v8120_v43 }
 0x671   :  { %4682 = vmatprep.subr.bf16.mxu0 %v8129_v44  ;;  %4723 = vmatprep.subr.bf16.mxu1 %v8134_v56 }
 0x674   :  { %4683 = vmatpush1.bf16.msra.mxu0 %v8139_v5  ;;  %4724 = vmatpush1.bf16.msra.mxu1 %v8144_v60  ;;  %v5588_v60 = vld [vmem:[%s8545_s0 + $0xd8] sm:$0xff] }
 0x675   :  { %4684 = vmatprep.subr.bf16.mxu0 %v8153_v8  ;;  %4725 = vmatprep.subr.bf16.mxu1 %v8158_v9  ;;  %v5587_v9 = vld [vmem:[%s8545_s0 + $0xd0] sm:$0xff] }
 0x678   :  { %4685 = vmatpush1.bf16.msra.mxu0 %v8163_v54  ;;  %4726 = vmatpush1.bf16.msra.mxu1 %v8168_v19 }
 0x679   :  { %4955 = vmatprep.subr.bf16.mxu0 %v8177_v61  ;;  %4996 = vmatprep.subr.bf16.mxu1 %v8182_v36 }
 0x70d   :  { %v4070_v30 = vpop.f32.mrb[48].mxu0  ;;  %v4111_v31 = vpop.f32.mrb[48].mxu1 }
 0x70e   :  { %v4118_v29 = vadd.f32 %v5585_v28, %v4070_v30  ;;  %v4072_v32 = vpop.f32.mrb[49].mxu0  ;;  %v4113_v62 = vpop.f32.mrb[49].mxu1  ;;  %v4120_v19 = vadd.f32 %v5587_v9, %v4111_v31  ;;  %v5621_v28 = vld [vmem:[%s8546_s1 + $0xc0] sm:$0xff]  ;;  %v5623_v9 = vld [vmem:[%s8546_s1 + $0xd0] sm:$0xff] }
 0x70f   :  { %v4119_v4 = vadd.f32 %v5586_v37, %v4072_v32  ;;  %v4074_v52 = vpop.f32.mrb[50].mxu0  ;;  %v4115_v27 = vpop.f32.mrb[50].mxu1  ;;  %v4121_v8 = vadd.f32 %v5588_v60, %v4113_v62  ;;  %v5622_v37 = vld [vmem:[%s8546_s1 + $0xc8] sm:$0xff]  ;;  %v5624_v60 = vld [vmem:[%s8546_s1 + $0xd8] sm:$0xff]  ;;  %s6391_s1 = smov [#allocation8]  }
 0x710   :  { %v5657_v43 = vmul.f32 -1.442695, %v4118_v29  ;;  %v4075_v44 = vpop.f32.mrb[51].mxu0  ;;  %v4116_v56 = vpop.f32.mrb[51].mxu1  ;;  %s5106_s20 = sshll.u32 %s6391_s1, 4  ;;  %s5107_s20 = int_to_ptr.vmem [resolvable:$true] %s5106_s20 }
 0x711   :  { %v5658_v5 = vmul.f32 -1.442695, %v4119_v4  ;;  %v5659_v54 = vmul.f32 -1.442695, %v4121_v8  ;;  %s6365_s23 = scalar_lea.vmem %s5107_s20, 1024  ;;  %p6370_p1 = scmp.lt.s32.totalorder %s5107_s20, %s5107_s20 }
 0x712   :  { %6324 = vpow2.f32 %v5657_v43  ;;  %p6366_p0 = scmp.ne.s32.totalorder %s5107_s20, %s6365_s23  ;;  %p6371_p2 = scmp.lt.s32.totalorder %s6365_s23, %s6365_s23 }
 0x713   :  { %6326 = vpow2.f32 %v5658_v5 }
 0x714   :  { %6328 = vpow2.f32 %v5659_v54  ;;  %p6372_p3 = por %p6371_p2, %p6370_p1 }
 0x715   :  { %6330 = vtanh.f32 %v4120_v19 }
 0x716   :  { %p6373_p4 = pnand %p6372_p3, %p6366_p0 }
 0x71c   :  { %v6325_v61 = vpop.eup %6324 }
 0x71d   :  { %v6327_v36 = vpop.eup %6326  ;;  %v4414_v39 = vadd.f32 1.0, %v6325_v61 }
 0x71e   :  { %v4415_v55 = vadd.f32 1.0, %v6327_v36  ;;  %v6329_v12 = vpop.eup %6328 }
 0x71f   :  { %6332 = vrcp.f32 %v4414_v39  ;;  %v6331_v23 = vpop.eup %6330  ;;  %v4424_v7 = vadd.f32 1.0, %v6329_v12 }
 0x720   :  { %6334 = vrcp.f32 %v4415_v55 }
 0x721   :  { %6336 = vrcp.f32 %v4424_v7 }
 0x729   :  { %v6333_v24 = vpop.eup %6332 }
 0x72a   :  { %v6335_v21 = vpop.eup %6334  ;;  %v4428_v58 = vmul.f32 %v6333_v24, %v6331_v23 }
 0x72b   :  { %v4427_v63 = vmul.f32 %v6335_v21, %v8205_v11  ;;  %v6337_v54 = vpop.eup %6336 }
 0x72d   :  { %v4429_v30 = vadd.f32 %v4428_v58, %v4427_v63  ;;  %v4355_v31 = vpop.f32.mrb[52].mxu0  ;;  %v4396_v29 = vpop.f32.mrb[52].mxu1 }
 0x72e   :  { %v4403_v32 = vadd.f32 %v5621_v28, %v4355_v31  ;;  %v4357_v62 = vpop.f32.mrb[53].mxu0  ;;  %v4398_v4 = vpop.f32.mrb[53].mxu1  ;;  %v4405_v36 = vadd.f32 %v5623_v9, %v4396_v29 }
 0x72f   :  { %6338 = vtanh.f32 %v4429_v30  ;;  %v4404_v52 = vadd.f32 %v5622_v37, %v4357_v62  ;;  %v4359_v27 = vpop.f32.mrb[54].mxu0  ;;  %v4400_v43 = vpop.f32.mrb[54].mxu1  ;;  %v4406_v8 = vadd.f32 %v5624_v60, %v4398_v4 }
 0x730   :  { %v5660_v11 = vmul.f32 -1.442695, %v4403_v32  ;;  %v4360_v44 = vpop.f32.mrb[55].mxu0  ;;  %v4401_v56 = vpop.f32.mrb[55].mxu1 }
 0x731   :  { %v5661_v5 = vmul.f32 -1.442695, %v4404_v52  ;;  %v5662_v61 = vmul.f32 -1.442695, %v4406_v8 }
 0x732   :  { %6340 = vpow2.f32 %v5660_v11 }
 0x733   :  { %6342 = vpow2.f32 %v5661_v5 }
 0x734   :  { %6344 = vpow2.f32 %v5662_v61 }
 0x735   :  { %6346 = vtanh.f32 %v4405_v36 }
 0x739   :  { %v6339_v19 = vpop.eup %6338 }
 0x73a   :  { %v4431_v39 = vmul.f32 %v6339_v19, %v6337_v54 }
 0x73c   :  { %v6341_v55 = vpop.eup %6340  ;;  %v4459_v12 = vadd.f32 %v4431_v39, %v8225_v46  ;;  %v4477_v23 = vpack.c.bf16 %v4431_v39, %v4431_v39 }
 0x73d   :  { %v6343_v24 = vpop.eup %6342  ;;  %v4439_v21 = vadd.f32 1.0, %v6341_v55 }
 0x73e   :  { %v4440_v58 = vadd.f32 1.0, %v6343_v24  ;;  %5663 = vst [vmem:[%s8549_s4 + $0x38] sm:$0xff] %v4459_v12  ;;  %4703 = vmatmul.mubr.bf16.vlgmr.msra.gmra.mrb[56].mxu0 %v4477_v23  ;;  %4744 = vmatmul.mubr.bf16.vlgmr.msra.gmra.mrb[56].mxu1 %v4477_v23 }
 0x73f   :  { %6348 = vrcp.f32 %v4439_v21  ;;  %4956 = vmatpush1.bf16.msra.mxu0 %v8217_v47  ;;  %4997 = vmatpush1.bf16.msra.mxu1 %v8222_v18  ;;  %v6345_v47 = vpop.eup %6344 }
 0x740   :  { %6350 = vrcp.f32 %v4440_v58  ;;  %4957 = vmatprep.subr.bf16.mxu0 %v8230_v35  ;;  %4998 = vmatprep.subr.bf16.mxu1 %v8235_v3  ;;  %v6347_v18 = vpop.eup %6346  ;;  %v4449_v3 = vadd.f32 1.0, %v6345_v47 }
 0x741   :  { %4987 = vmatprep.mubr.bf16.mxu0 %v8565_v59  ;;  %5028 = vmatprep.mubr.bf16.mxu1 %v8565_v59 }
 0x742   :  { %6352 = vrcp.f32 %v4449_v3 }
 0x743   :  { %4958 = vmatpush1.bf16.msra.mxu0 %v8246_v10  ;;  %4999 = vmatpush1.bf16.msra.mxu1 %v8251_v0 }
 0x744   :  { %4959 = vmatprep.subr.bf16.mxu0 %v8258_v20  ;;  %5000 = vmatprep.subr.bf16.mxu1 %v8263_v49 }
 0x747   :  { %4960 = vmatpush1.bf16.msra.mxu0 %v8272_v50  ;;  %5001 = vmatpush1.bf16.msra.mxu1 %v8277_v51  ;;  %v8577_v51 = vld [vmem:[#allocation11_spill] sm:$0xff] }
 0x748   :  { %4961 = vmatprep.subr.bf16.mxu0 %v8284_v57  ;;  %5002 = vmatprep.subr.bf16.mxu1 %v8289_v1 }
 0x749   :  { %v6349_v46 = vpop.eup %6348 }
 0x74a   :  { %v6351_v59 = vpop.eup %6350  ;;  %v4453_v35 = vmul.f32 %v6349_v46, %v6347_v18 }
 0x74b   :  { %v4452_v10 = vmul.f32 %v6351_v59, %v8340_v42  ;;  %4962 = vmatpush1.bf16.msra.mxu0 %v8296_v22  ;;  %5003 = vmatpush1.bf16.msra.mxu1 %v8301_v13  ;;  %v6392_v22 = vmov 0.0  }
 0x74c   :  { %4963 = vmatprep.subr.bf16.mxu0 %v8308_v48  ;;  %5004 = vmatprep.subr.bf16.mxu1 %v8313_v17  ;;  %v6353_v20 = vpop.eup %6352  ;;  %33 = vst [vmem:[%s8549_s4] sm:$0xff] %v6392_v22  ;;  %34 = vst [vmem:[#allocation8] sm:$0xff] %v6392_v22 }
 0x74d   :  { %v4454_v0 = vadd.f32 %v4453_v35, %v4452_v10 }
 0x74f   :  { %6354 = vtanh.f32 %v4454_v0  ;;  %4964 = vmatpush1.bf16.msra.mxu0 %v8321_v33  ;;  %5005 = vmatpush1.bf16.msra.mxu1 %v8326_v26 }
 0x750   :  { %4965 = vmatprep.subr.bf16.mxu0 %v8333_v2  ;;  %5006 = vmatprep.subr.bf16.mxu1 %v8338_v38 }
 0x753   :  { %4966 = vmatpush1.bf16.msra.mxu0 %v8348_v34  ;;  %5007 = vmatpush1.bf16.msra.mxu1 %v8353_v45 }
 0x754   :  { %4967 = vmatprep.subr.bf16.mxu0 %v8360_v25  ;;  %5008 = vmatprep.subr.bf16.mxu1 %v8365_v15 }
 0x757   :  { %4968 = vmatpush1.bf16.msra.mxu0 %v8372_v53  ;;  %5009 = vmatpush1.bf16.msra.mxu1 %v8377_v6 }
 0x758   :  { %4969 = vmatprep.subr.bf16.mxu0 %v8384_v40  ;;  %5010 = vmatprep.subr.bf16.mxu1 %v8389_v41 }
 0x759   :  { %v6355_v49 = vpop.eup %6354 }
 0x75a   :  { %v4456_v50 = vmul.f32 %v6355_v49, %v6353_v20 }
 0x75b   :  { %4970 = vmatpush1.bf16.msra.mxu0 %v8396_v14  ;;  %5011 = vmatpush1.bf16.msra.mxu1 %v8401_v16 }
 0x75c   :  { %v4463_v57 = vadd.f32 %v4456_v50, %v8577_v51  ;;  %v4762_v1 = vpack.c.bf16 %v4456_v50, %v4456_v50 }
 0x75e   :  { %4470 = vst [vmem:[#allocation8 + $0x38] sm:$0xff] %v4463_v57  ;;  %4988 = vmatmul.mubr.bf16.vlgmr.msra.gmra.mrb[60].mxu0 %v4762_v1  ;;  %5029 = vmatmul.mubr.bf16.vlgmr.msra.gmra.mrb[60].mxu1 %v4762_v1 }
 0x75f   :  { %6376 = shalt.err (!%p6373_p4)
}
 0x760   :  { %s6377_s26 = scalar_lea.hbm %s8550_s5, 1024 }
 0x761   :  { %p6378_p5 = scmp.ne.s32.totalorder %s8550_s5, %s6377_s26  ;;  %p6381_p6 = scmp.lt.u32.totalorder %s6377_s26, %s8550_s5 }
 0x763   :  { %p6383_p7 = pnand %p6381_p6, %p6378_p5 }
 0x765   :  { %6386 = shalt.err (!%p6383_p7)
}
 0x766   :  { %s6393_s4 = smov 128   ;;  %s6394_s30 = smov 8  }
 0x767   :  { %5112 = dma.vmem_to_hbm [thread:$0]  %s5107_s20, 1024, %s8550_s5, [#allocation9], %s6393_s4, %s6393_s4, %s6394_s30  }
 0x811   :  { %v4704_v13 = vpop.f32.mrb[56].mxu0  ;;  %v4745_v48 = vpop.f32.mrb[56].mxu1 }
 0x812   :  { %v4706_v17 = vpop.f32.mrb[57].mxu0  ;;  %v4747_v33 = vpop.f32.mrb[57].mxu1 }
 0x813   :  { %v4708_v26 = vpop.f32.mrb[58].mxu0  ;;  %v4749_v2 = vpop.f32.mrb[58].mxu1 }
 0x814   :  { %v4709_v38 = vpop.f32.mrb[59].mxu0  ;;  %v4750_v42 = vpop.f32.mrb[59].mxu1 }
 0x831   :  { %v4989_v34 = vpop.f32.mrb[60].mxu0  ;;  %v5030_v45 = vpop.f32.mrb[60].mxu1 }
 0x832   :  { %v4991_v25 = vpop.f32.mrb[61].mxu0  ;;  %v5032_v15 = vpop.f32.mrb[61].mxu1 }
 0x833   :  { %v4993_v53 = vpop.f32.mrb[62].mxu0  ;;  %v5034_v6 = vpop.f32.mrb[62].mxu1 }
 0x834   :  { %v4994_v40 = vpop.f32.mrb[63].mxu0  ;;  %v5035_v41 = vpop.f32.mrb[63].mxu1 }
 0x835   :  { %6387 = dma.done.wait [#allocation9], 1024  }
 0x836   :  { %6388 = vsyncadd [#allocation9], 4294966272 }
 0x837   :  { %5118 = vsyncpa [#allocation9], 1 }

</bundles_post_ra>
